<compile_context>
chip_gen: v6e
topology: v6e:2x2x1
jax: 0.10.0
libtpu: 0.0.40
codegen_flags: <defaults>
</compile_context>

<pallas_src>
import jax
import jax.numpy as jnp
from jax.experimental import pallas as pl
from jax.experimental.pallas import tpu as pltpu


def _round_up(x, m):
    return (x + m - 1) // m * m


# ----------------------------------------------------------------------------
# Fused kernel: one grid step == Bt images end-to-end.
# ----------------------------------------------------------------------------
def _lenet_kernel(xe_ref, xo_ref, m1_ref, b1_ref, pw1_ref, m2_ref, b2_ref,
                  wbig_ref, bfc1_ref, wfc2_ref, bfc2_ref, wfc3_ref, bfc3_ref,
                  out_ref):
    f32, bf16 = jnp.float32, jnp.bfloat16
    Bt = out_ref.shape[0]

    xe = xe_ref[...]                       # (16, Bt, 32) bf16: x rows 0,2,...
    xo = xo_ref[...]                       # (16, Bt, 32) bf16: x rows 1,3,...

    # ---- conv1 (5x5 valid) as two deep-K matmuls (even / odd output rows) --
    # Even output row 2h uses x rows 2h..2h+4; odd row 2h+1 uses 2h+1..2h+5.
    lhs_e = jnp.concatenate(
        [xe[0:14], xo[0:14], xe[1:15], xo[1:15], xe[2:16]], axis=-1
    ).reshape(14 * Bt, 160)
    lhs_o = jnp.concatenate(
        [xo[0:14], xe[1:15], xo[1:15], xe[2:16], xo[2:16]], axis=-1
    ).reshape(14 * Bt, 160)
    m1 = m1_ref[...]
    b1 = b1_ref[...]
    y1e = jnp.maximum(jnp.dot(lhs_e, m1, preferred_element_type=f32) + b1, 0.0)
    y1o = jnp.maximum(jnp.dot(lhs_o, m1, preferred_element_type=f32) + b1, 0.0)

    # ---- avgpool1: height = mean(even, odd) rows; width = 0.5-banded matmul
    p1 = jnp.dot((0.5 * (y1e + y1o)).astype(bf16), pw1_ref[...],
                 preferred_element_type=f32)                  # (14*Bt, 84)
    p1 = p1.astype(bf16).reshape(14, Bt, 84)

    # ---- conv2 (5x5 valid) + bias + ReLU as one deep-K matmul --------------
    lhs2 = jnp.concatenate([p1[kh:kh + 10] for kh in range(5)],
                           axis=-1).reshape(10 * Bt, 420)
    y2 = jnp.dot(lhs2, m2_ref[...], preferred_element_type=f32)  # (10*Bt,160)
    y2 = jnp.maximum(y2 + b2_ref[...], 0.0)
    y2 = y2.astype(bf16).reshape(10, Bt, 160)

    # ---- fc1 + ReLU (avgpool2 + PyTorch flatten folded into wbig) ----------
    a1 = jnp.zeros((Bt, 128), f32)
    for i in range(10):                    # 10 accumulating (Bt,160)x(160,128)
        a1 += jnp.dot(y2[i], wbig_ref[i], preferred_element_type=f32)
    a1 = jnp.maximum(a1 + bfc1_ref[...], 0.0)

    # ---- fc2 + ReLU, fc3 ----------------------------------------------------
    a2 = jnp.dot(a1.astype(bf16), wfc2_ref[...], preferred_element_type=f32)
    a2 = jnp.maximum(a2 + bfc2_ref[...], 0.0)
    logits = jnp.dot(a2.astype(bf16), wfc3_ref[...], preferred_element_type=f32)
    out_ref[...] = logits + bfc3_ref[...]


# ----------------------------------------------------------------------------
# One-time parameter preparation: banded conv matrices (K-stacked), pool-width
# matrix, avgpool2+flatten folded into fc1, lane padding, bf16 cast.
# ----------------------------------------------------------------------------
def prepare_params(params):
    f32, bf16 = jnp.float32, jnp.bfloat16

    def band(w, w_in, w_out):
        # w: (O, C, KH, KW).  band[kh, wi*C+c, p*O+o] = w[o, c, kh, wi - p]
        # for 0 <= wi - p < KW, else 0.
        O, C, KH, KW = w.shape
        sel = (jnp.arange(w_in)[None, None, :] ==
               (jnp.arange(w_out)[:, None, None]
                + jnp.arange(KW)[None, :, None])).astype(f32)      # (p, k, v)
        m = jnp.einsum("pkv,ochk->hvcpo", sel, w.astype(f32))
        return m.reshape(KH, w_in * C, w_out * O)

    # conv1: kh chunks of 32 stacked along K -> (160, 168)
    M1 = band(params["conv1_w"], 32, 28).reshape(5 * 32, 28 * 6)
    # conv2: kh chunks of 84 stacked along K -> (420, 160)
    M2 = band(params["conv2_w"], 14, 10).reshape(5 * 84, 10 * 16)

    # avgpool1 width half: col (w*6+c) -> (q*6+c), factor 0.5 per column.
    half = ((jnp.arange(28)[:, None] // 2) ==
            jnp.arange(14)[None, :]).astype(f32) * 0.5              # (28, 14)
    PW1 = jnp.einsum("wp,cd->wcpd", half,
                     jnp.eye(6, dtype=f32)).reshape(28 * 6, 14 * 6)

    # fc1 with avgpool2 + PyTorch (c,h,w)-flatten folded in:
    #   Wbig[i, p*16+o, n] = 0.25 * fc1_w[n, o*25 + (i//2)*5 + (p//2)]
    fc1 = params["fc1_w"].astype(f32).reshape(120, 16, 5, 5)       # (n,o,h,w)
    idx = jnp.arange(10) // 2
    Wbig = fc1[:, :, idx, :][:, :, :, idx]                         # (n,o,i,p)
    Wbig = 0.25 * jnp.transpose(Wbig, (2, 3, 1, 0))                # (i,p,o,n)
    Wbig = jnp.pad(Wbig.reshape(10, 160, 120), ((0, 0), (0, 0), (0, 8)))

    Wfc2 = jnp.pad(params["fc2_w"].astype(f32).T, ((0, 8), (0, 44)))    # 128x128
    Wfc3 = jnp.pad(params["fc3_w"].astype(f32).T, ((0, 44), (0, 118)))  # 128x128

    return {
        "M1": M1.astype(bf16),
        "b1": jnp.tile(params["conv1_b"].astype(f32), 28).reshape(1, 168),
        "PW1": PW1.astype(bf16),
        "M2": M2.astype(bf16),
        "b2": jnp.tile(params["conv2_b"].astype(f32), 10).reshape(1, 160),
        "Wbig": Wbig.astype(bf16),
        "bfc1": jnp.pad(params["fc1_b"].astype(f32), (0, 8)).reshape(1, 128),
        "Wfc2": Wfc2.astype(bf16),
        "bfc2": jnp.pad(params["fc2_b"].astype(f32), (0, 44)).reshape(1, 128),
        "Wfc3": Wfc3.astype(bf16),
        "bfc3": jnp.pad(params["fc3_b"].astype(f32), (0, 118)).reshape(1, 128),
    }


# ----------------------------------------------------------------------------
# Forward pass: one pallas_call for the entire network, batch-tiled.
# ----------------------------------------------------------------------------
def lenet_forward(prep, x_nchw, block_b=128):
    B = x_nchw.shape[0]
    assert x_nchw.shape[1:] == (1, 32, 32)
    x = x_nchw.reshape(B, 32, 32).astype(jnp.bfloat16)

    Bt = min(block_b, _round_up(B, 16))     # batch tile, multiple of 16
    Bp = _round_up(B, Bt)
    if Bp != B:
        x = jnp.pad(x, ((0, Bp - B), (0, 0), (0, 0)))

    # Pre-split even/odd image rows, batch on the sublane axis:
    #   xe[j, b, :] = x[b, 2j, :],  xo[j, b, :] = x[b, 2j+1, :].
    xe = jnp.transpose(x[:, 0::2, :], (1, 0, 2))                 # (16, Bp, 32)
    xo = jnp.transpose(x[:, 1::2, :], (1, 0, 2))                 # (16, Bp, 32)

    out = pl.pallas_call(
        _lenet_kernel,
        out_shape=jax.ShapeDtypeStruct((Bp, 128), jnp.float32),
        grid=(Bp // Bt,),
        in_specs=[
            pl.BlockSpec((16, Bt, 32), lambda t: (0, t, 0)),      # xe
            pl.BlockSpec((16, Bt, 32), lambda t: (0, t, 0)),      # xo
            pl.BlockSpec((160, 168), lambda t: (0, 0)),           # M1
            pl.BlockSpec((1, 168), lambda t: (0, 0)),             # b1
            pl.BlockSpec((168, 84), lambda t: (0, 0)),            # PW1
            pl.BlockSpec((420, 160), lambda t: (0, 0)),           # M2
            pl.BlockSpec((1, 160), lambda t: (0, 0)),             # b2
            pl.BlockSpec((10, 160, 128), lambda t: (0, 0, 0)),    # Wbig
            pl.BlockSpec((1, 128), lambda t: (0, 0)),             # bfc1
            pl.BlockSpec((128, 128), lambda t: (0, 0)),           # Wfc2
            pl.BlockSpec((1, 128), lambda t: (0, 0)),             # bfc2
            pl.BlockSpec((128, 128), lambda t: (0, 0)),           # Wfc3
            pl.BlockSpec((1, 128), lambda t: (0, 0)),             # bfc3
        ],
        out_specs=pl.BlockSpec((Bt, 128), lambda t: (t, 0)),
        compiler_params=pltpu.CompilerParams(
            dimension_semantics=("parallel",),
            vmem_limit_bytes=48 * 1024 * 1024,
        ),
    )(xe, xo, prep["M1"], prep["b1"], prep["PW1"], prep["M2"], prep["b2"],
      prep["Wbig"], prep["bfc1"], prep["Wfc2"], prep["bfc2"],
      prep["Wfc3"], prep["bfc3"])

    return out[:B, :10]


# ----------------------------------------------------------------------------
# PyTorch-layout parameters + pure-JAX f32 reference (for validation).
# ----------------------------------------------------------------------------
def init_params(key):
    ks = jax.random.split(key, 10)

    def u(k, shape, fan_in):
        bound = 1.0 / jnp.sqrt(jnp.float32(fan_in))
        return jax.random.uniform(k, shape, jnp.float32, -bound, bound)

    return {
        "conv1_w": u(ks[0], (6, 1, 5, 5), 1 * 5 * 5),
        "conv1_b": u(ks[1], (6,), 1 * 5 * 5),
        "conv2_w": u(ks[2], (16, 6, 5, 5), 6 * 5 * 5),
        "conv2_b": u(ks[3], (16,), 6 * 5 * 5),
        "fc1_w": u(ks[4], (120, 400), 400),
        "fc1_b": u(ks[5], (120,), 400),
        "fc2_w": u(ks[6], (84, 120), 120),
        "fc2_b": u(ks[7], (84,), 120),
        "fc3_w": u(ks[8], (10, 84), 84),
        "fc3_b": u(ks[9], (10,), 84),
    }


def _avgpool2_ref(x):  # NCHW, kernel 2 stride 2
    B, C, H, W = x.shape
    return x.reshape(B, C, H // 2, 2, W // 2, 2).mean(axis=(3, 5))


def lenet_reference(params, x_nchw):
    dn = ("NCHW", "OIHW", "NCHW")
    y = jax.lax.conv_general_dilated(x_nchw.astype(jnp.float32),
                                     params["conv1_w"], (1, 1), "VALID",
                                     dimension_numbers=dn)
    y = jnp.maximum(y + params["conv1_b"][None, :, None, None], 0.0)
    y = _avgpool2_ref(y)
    y = jax.lax.conv_general_dilated(y, params["conv2_w"], (1, 1), "VALID",
                                     dimension_numbers=dn)
    y = jnp.maximum(y + params["conv2_b"][None, :, None, None], 0.0)
    y = _avgpool2_ref(y)
    f = y.reshape(y.shape[0], -1)
    f = jnp.maximum(f @ params["fc1_w"].T + params["fc1_b"], 0.0)
    f = jnp.maximum(f @ params["fc2_w"].T + params["fc2_b"], 0.0)
    return f @ params["fc3_w"].T + params["fc3_b"]


if __name__ == "__main__":
    key = jax.random.PRNGKey(0)
    k_params, k_x = jax.random.split(key)
    params = init_params(k_params)
    x = jax.random.normal(k_x, (12, 1, 32, 32), dtype=jnp.float32)

    prep = prepare_params(params)                 # one-time weight folding
    logits = jax.jit(lenet_forward)(prep, x)
    logits = jax.block_until_ready(logits)

    assert logits.shape == (12, 10), logits.shape
    assert logits.dtype == jnp.float32

    # Loose tolerance: kernel uses bf16 operands with f32 accumulation.
    ref = lenet_reference(params, x)
    max_err = float(jnp.max(jnp.abs(logits - ref)))
    assert max_err < 5e-2, f"max abs err vs f32 reference: {max_err}"
    print("KERNEL_OK")
</pallas_src>

<mosaic_0001>
module attributes {stable_mosaic.version = 11 : i64} {
  func.func @_lenet_kernel(%arg0: i32, %arg1: memref<16x16x32xbf16, #tpu.memory_space<vmem>>, %arg2: memref<16x16x32xbf16, #tpu.memory_space<vmem>>, %arg3: memref<160x168xbf16, #tpu.memory_space<vmem>>, %arg4: memref<1x168xf32, #tpu.memory_space<vmem>>, %arg5: memref<168x84xbf16, #tpu.memory_space<vmem>>, %arg6: memref<420x160xbf16, #tpu.memory_space<vmem>>, %arg7: memref<1x160xf32, #tpu.memory_space<vmem>>, %arg8: memref<10x160x128xbf16, #tpu.memory_space<vmem>>, %arg9: memref<1x128xf32, #tpu.memory_space<vmem>>, %arg10: memref<128x128xbf16, #tpu.memory_space<vmem>>, %arg11: memref<1x128xf32, #tpu.memory_space<vmem>>, %arg12: memref<128x128xbf16, #tpu.memory_space<vmem>>, %arg13: memref<1x128xf32, #tpu.memory_space<vmem>>, %arg14: memref<16x128xf32, #tpu.memory_space<vmem>>) attributes {dimension_semantics = [#tpu.dimension_semantics<parallel>], iteration_bounds = array<i64: 1>, scalar_prefetch = 0 : i64, scratch_operands = 0 : i64, tpu.core_type = #tpu.core_type<tc>, window_params = [{transform_indices = @transform_0, window_bounds = array<i64: 16, 16, 32>}, {transform_indices = @transform_1, window_bounds = array<i64: 16, 16, 32>}, {pipeline_mode = #tpu.pipeline_mode<synchronous>, transform_indices = @transform_2, window_bounds = array<i64: 160, 168>}, {pipeline_mode = #tpu.pipeline_mode<synchronous>, transform_indices = @transform_3, window_bounds = array<i64: 1, 168>}, {pipeline_mode = #tpu.pipeline_mode<synchronous>, transform_indices = @transform_4, window_bounds = array<i64: 168, 84>}, {pipeline_mode = #tpu.pipeline_mode<synchronous>, transform_indices = @transform_5, window_bounds = array<i64: 420, 160>}, {pipeline_mode = #tpu.pipeline_mode<synchronous>, transform_indices = @transform_6, window_bounds = array<i64: 1, 160>}, {pipeline_mode = #tpu.pipeline_mode<synchronous>, transform_indices = @transform_7, window_bounds = array<i64: 10, 160, 128>}, {pipeline_mode = #tpu.pipeline_mode<synchronous>, transform_indices = @transform_8, window_bounds = array<i64: 1, 128>}, {pipeline_mode = #tpu.pipeline_mode<synchronous>, transform_indices = @transform_9, window_bounds = array<i64: 128, 128>}, {pipeline_mode = #tpu.pipeline_mode<synchronous>, transform_indices = @transform_10, window_bounds = array<i64: 1, 128>}, {pipeline_mode = #tpu.pipeline_mode<synchronous>, transform_indices = @transform_11, window_bounds = array<i64: 128, 128>}, {pipeline_mode = #tpu.pipeline_mode<synchronous>, transform_indices = @transform_12, window_bounds = array<i64: 1, 128>}, {transform_indices = @transform_13, window_bounds = array<i64: 16, 128>}]} {
    %c0 = arith.constant 0 : index
    %c0_0 = arith.constant 0 : index
    %c0_1 = arith.constant 0 : index
    %0 = vector.load %arg1[%c0, %c0_0, %c0_1] : memref<16x16x32xbf16, #tpu.memory_space<vmem>>, vector<16x16x32xbf16>
    %c0_2 = arith.constant 0 : index
    %c0_3 = arith.constant 0 : index
    %c0_4 = arith.constant 0 : index
    %1 = vector.load %arg2[%c0_2, %c0_3, %c0_4] : memref<16x16x32xbf16, #tpu.memory_space<vmem>>, vector<16x16x32xbf16>
    %2 = vector.extract_strided_slice %0 {offsets = [0, 0, 0], sizes = [14, 16, 32], strides = [1, 1, 1]} : vector<16x16x32xbf16> to vector<14x16x32xbf16>
    %3 = vector.extract_strided_slice %1 {offsets = [0, 0, 0], sizes = [14, 16, 32], strides = [1, 1, 1]} : vector<16x16x32xbf16> to vector<14x16x32xbf16>
    %4 = vector.extract_strided_slice %0 {offsets = [1, 0, 0], sizes = [14, 16, 32], strides = [1, 1, 1]} : vector<16x16x32xbf16> to vector<14x16x32xbf16>
    %5 = vector.extract_strided_slice %1 {offsets = [1, 0, 0], sizes = [14, 16, 32], strides = [1, 1, 1]} : vector<16x16x32xbf16> to vector<14x16x32xbf16>
    %6 = vector.extract_strided_slice %0 {offsets = [2, 0, 0], sizes = [14, 16, 32], strides = [1, 1, 1]} : vector<16x16x32xbf16> to vector<14x16x32xbf16>
    %7 = tpu.concatenate %2, %3, %4, %5, %6 in 2 : vector<14x16x32xbf16>, vector<14x16x32xbf16>, vector<14x16x32xbf16>, vector<14x16x32xbf16>, vector<14x16x32xbf16> -> vector<14x16x160xbf16>
    %8 = vector.shape_cast %7 : vector<14x16x160xbf16> to vector<224x160xbf16>
    %9 = vector.extract_strided_slice %1 {offsets = [0, 0, 0], sizes = [14, 16, 32], strides = [1, 1, 1]} : vector<16x16x32xbf16> to vector<14x16x32xbf16>
    %10 = vector.extract_strided_slice %0 {offsets = [1, 0, 0], sizes = [14, 16, 32], strides = [1, 1, 1]} : vector<16x16x32xbf16> to vector<14x16x32xbf16>
    %11 = vector.extract_strided_slice %1 {offsets = [1, 0, 0], sizes = [14, 16, 32], strides = [1, 1, 1]} : vector<16x16x32xbf16> to vector<14x16x32xbf16>
    %12 = vector.extract_strided_slice %0 {offsets = [2, 0, 0], sizes = [14, 16, 32], strides = [1, 1, 1]} : vector<16x16x32xbf16> to vector<14x16x32xbf16>
    %13 = vector.extract_strided_slice %1 {offsets = [2, 0, 0], sizes = [14, 16, 32], strides = [1, 1, 1]} : vector<16x16x32xbf16> to vector<14x16x32xbf16>
    %14 = tpu.concatenate %9, %10, %11, %12, %13 in 2 : vector<14x16x32xbf16>, vector<14x16x32xbf16>, vector<14x16x32xbf16>, vector<14x16x32xbf16>, vector<14x16x32xbf16> -> vector<14x16x160xbf16>
    %15 = vector.shape_cast %14 : vector<14x16x160xbf16> to vector<224x160xbf16>
    %c0_5 = arith.constant 0 : index
    %c0_6 = arith.constant 0 : index
    %16 = vector.load %arg3[%c0_5, %c0_6] : memref<160x168xbf16, #tpu.memory_space<vmem>>, vector<160x168xbf16>
    %c0_7 = arith.constant 0 : index
    %c0_8 = arith.constant 0 : index
    %17 = vector.load %arg4[%c0_7, %c0_8] : memref<1x168xf32, #tpu.memory_space<vmem>>, vector<1x168xf32>
    %cst = arith.constant dense<0.000000e+00> : vector<224x168xf32>
    %18 = tpu.matmul %8, %16, %cst {dimension_numbers = #tpu.dot_dimension_numbers<[1], [0], [0], [1], [0, 0, 1, 1], [], []>} : vector<224x160xbf16>, vector<160x168xbf16>, vector<224x168xf32> -> vector<224x168xf32>
    %19 = vector.broadcast %17 : vector<1x168xf32> to vector<224x168xf32>
    %20 = arith.addf %18, %19 : vector<224x168xf32>
    %cst_9 = arith.constant 0.000000e+00 : f32
    %21 = vector.broadcast %cst_9 : f32 to vector<224x168xf32>
    %22 = arith.maximumf %20, %21 : vector<224x168xf32>
    %cst_10 = arith.constant dense<0.000000e+00> : vector<224x168xf32>
    %23 = tpu.matmul %15, %16, %cst_10 {dimension_numbers = #tpu.dot_dimension_numbers<[1], [0], [0], [1], [0, 0, 1, 1], [], []>} : vector<224x160xbf16>, vector<160x168xbf16>, vector<224x168xf32> -> vector<224x168xf32>
    %24 = vector.broadcast %17 : vector<1x168xf32> to vector<224x168xf32>
    %25 = arith.addf %23, %24 : vector<224x168xf32>
    %cst_11 = arith.constant 0.000000e+00 : f32
    %26 = vector.broadcast %cst_11 : f32 to vector<224x168xf32>
    %27 = arith.maximumf %25, %26 : vector<224x168xf32>
    %28 = arith.addf %22, %27 : vector<224x168xf32>
    %cst_12 = arith.constant 5.000000e-01 : f32
    %29 = vector.broadcast %cst_12 : f32 to vector<224x168xf32>
    %30 = arith.mulf %29, %28 : vector<224x168xf32>
    %31 = arith.truncf %30 : vector<224x168xf32> to vector<224x168xbf16>
    %c0_13 = arith.constant 0 : index
    %c0_14 = arith.constant 0 : index
    %32 = vector.load %arg5[%c0_13, %c0_14] : memref<168x84xbf16, #tpu.memory_space<vmem>>, vector<168x84xbf16>
    %cst_15 = arith.constant dense<0.000000e+00> : vector<224x84xf32>
    %33 = tpu.matmul %31, %32, %cst_15 {dimension_numbers = #tpu.dot_dimension_numbers<[1], [0], [0], [1], [0, 0, 1, 1], [], []>} : vector<224x168xbf16>, vector<168x84xbf16>, vector<224x84xf32> -> vector<224x84xf32>
    %34 = arith.truncf %33 : vector<224x84xf32> to vector<224x84xbf16>
    %35 = vector.shape_cast %34 : vector<224x84xbf16> to vector<14x16x84xbf16>
    %36 = vector.extract_strided_slice %35 {offsets = [0, 0, 0], sizes = [10, 16, 84], strides = [1, 1, 1]} : vector<14x16x84xbf16> to vector<10x16x84xbf16>
    %37 = vector.extract_strided_slice %35 {offsets = [1, 0, 0], sizes = [10, 16, 84], strides = [1, 1, 1]} : vector<14x16x84xbf16> to vector<10x16x84xbf16>
    %38 = vector.extract_strided_slice %35 {offsets = [2, 0, 0], sizes = [10, 16, 84], strides = [1, 1, 1]} : vector<14x16x84xbf16> to vector<10x16x84xbf16>
    %39 = vector.extract_strided_slice %35 {offsets = [3, 0, 0], sizes = [10, 16, 84], strides = [1, 1, 1]} : vector<14x16x84xbf16> to vector<10x16x84xbf16>
    %40 = vector.extract_strided_slice %35 {offsets = [4, 0, 0], sizes = [10, 16, 84], strides = [1, 1, 1]} : vector<14x16x84xbf16> to vector<10x16x84xbf16>
    %41 = tpu.concatenate %36, %37, %38, %39, %40 in 2 : vector<10x16x84xbf16>, vector<10x16x84xbf16>, vector<10x16x84xbf16>, vector<10x16x84xbf16>, vector<10x16x84xbf16> -> vector<10x16x420xbf16>
    %42 = vector.shape_cast %41 : vector<10x16x420xbf16> to vector<160x420xbf16>
    %c0_16 = arith.constant 0 : index
    %c0_17 = arith.constant 0 : index
    %43 = vector.load %arg6[%c0_16, %c0_17] : memref<420x160xbf16, #tpu.memory_space<vmem>>, vector<420x160xbf16>
    %cst_18 = arith.constant dense<0.000000e+00> : vector<160x160xf32>
    %44 = tpu.matmul %42, %43, %cst_18 {dimension_numbers = #tpu.dot_dimension_numbers<[1], [0], [0], [1], [0, 0, 1, 1], [], []>} : vector<160x420xbf16>, vector<420x160xbf16>, vector<160x160xf32> -> vector<160x160xf32>
    %c0_19 = arith.constant 0 : index
    %c0_20 = arith.constant 0 : index
    %45 = vector.load %arg7[%c0_19, %c0_20] : memref<1x160xf32, #tpu.memory_space<vmem>>, vector<1x160xf32>
    %46 = vector.broadcast %45 : vector<1x160xf32> to vector<160x160xf32>
    %47 = arith.addf %44, %46 : vector<160x160xf32>
    %cst_21 = arith.constant 0.000000e+00 : f32
    %48 = vector.broadcast %cst_21 : f32 to vector<160x160xf32>
    %49 = arith.maximumf %47, %48 : vector<160x160xf32>
    %50 = arith.truncf %49 : vector<160x160xf32> to vector<160x160xbf16>
    %51 = vector.shape_cast %50 : vector<160x160xbf16> to vector<10x16x160xbf16>
    %cst_22 = arith.constant 0.000000e+00 : f32
    %52 = vector.broadcast %cst_22 : f32 to vector<16x128xf32>
    %53 = vector.extract_strided_slice %51 {offsets = [0, 0, 0], sizes = [1, 16, 160], strides = [1, 1, 1]} : vector<10x16x160xbf16> to vector<1x16x160xbf16>
    %54 = vector.shape_cast %53 : vector<1x16x160xbf16> to vector<16x160xbf16>
    %c0_23 = arith.constant 0 : index
    %c0_24 = arith.constant 0 : index
    %c0_25 = arith.constant 0 : index
    %55 = vector.load %arg8[%c0_23, %c0_24, %c0_25] : memref<10x160x128xbf16, #tpu.memory_space<vmem>>, vector<1x160x128xbf16>
    %56 = vector.shape_cast %55 : vector<1x160x128xbf16> to vector<160x128xbf16>
    %cst_26 = arith.constant dense<0.000000e+00> : vector<16x128xf32>
    %57 = tpu.matmul %54, %56, %cst_26 {dimension_numbers = #tpu.dot_dimension_numbers<[1], [0], [0], [1], [0, 0, 1, 1], [], []>} : vector<16x160xbf16>, vector<160x128xbf16>, vector<16x128xf32> -> vector<16x128xf32>
    %58 = arith.addf %52, %57 : vector<16x128xf32>
    %59 = vector.extract_strided_slice %51 {offsets = [1, 0, 0], sizes = [1, 16, 160], strides = [1, 1, 1]} : vector<10x16x160xbf16> to vector<1x16x160xbf16>
    %60 = vector.shape_cast %59 : vector<1x16x160xbf16> to vector<16x160xbf16>
    %c1 = arith.constant 1 : index
    %c0_27 = arith.constant 0 : index
    %c0_28 = arith.constant 0 : index
    %61 = vector.load %arg8[%c1, %c0_27, %c0_28] : memref<10x160x128xbf16, #tpu.memory_space<vmem>>, vector<1x160x128xbf16>
    %62 = vector.shape_cast %61 : vector<1x160x128xbf16> to vector<160x128xbf16>
    %cst_29 = arith.constant dense<0.000000e+00> : vector<16x128xf32>
    %63 = tpu.matmul %60, %62, %cst_29 {dimension_numbers = #tpu.dot_dimension_numbers<[1], [0], [0], [1], [0, 0, 1, 1], [], []>} : vector<16x160xbf16>, vector<160x128xbf16>, vector<16x128xf32> -> vector<16x128xf32>
    %64 = arith.addf %58, %63 : vector<16x128xf32>
    %65 = vector.extract_strided_slice %51 {offsets = [2, 0, 0], sizes = [1, 16, 160], strides = [1, 1, 1]} : vector<10x16x160xbf16> to vector<1x16x160xbf16>
    %66 = vector.shape_cast %65 : vector<1x16x160xbf16> to vector<16x160xbf16>
    %c2 = arith.constant 2 : index
    %c0_30 = arith.constant 0 : index
    %c0_31 = arith.constant 0 : index
    %67 = vector.load %arg8[%c2, %c0_30, %c0_31] : memref<10x160x128xbf16, #tpu.memory_space<vmem>>, vector<1x160x128xbf16>
    %68 = vector.shape_cast %67 : vector<1x160x128xbf16> to vector<160x128xbf16>
    %cst_32 = arith.constant dense<0.000000e+00> : vector<16x128xf32>
    %69 = tpu.matmul %66, %68, %cst_32 {dimension_numbers = #tpu.dot_dimension_numbers<[1], [0], [0], [1], [0, 0, 1, 1], [], []>} : vector<16x160xbf16>, vector<160x128xbf16>, vector<16x128xf32> -> vector<16x128xf32>
    %70 = arith.addf %64, %69 : vector<16x128xf32>
    %71 = vector.extract_strided_slice %51 {offsets = [3, 0, 0], sizes = [1, 16, 160], strides = [1, 1, 1]} : vector<10x16x160xbf16> to vector<1x16x160xbf16>
    %72 = vector.shape_cast %71 : vector<1x16x160xbf16> to vector<16x160xbf16>
    %c3 = arith.constant 3 : index
    %c0_33 = arith.constant 0 : index
    %c0_34 = arith.constant 0 : index
    %73 = vector.load %arg8[%c3, %c0_33, %c0_34] : memref<10x160x128xbf16, #tpu.memory_space<vmem>>, vector<1x160x128xbf16>
    %74 = vector.shape_cast %73 : vector<1x160x128xbf16> to vector<160x128xbf16>
    %cst_35 = arith.constant dense<0.000000e+00> : vector<16x128xf32>
    %75 = tpu.matmul %72, %74, %cst_35 {dimension_numbers = #tpu.dot_dimension_numbers<[1], [0], [0], [1], [0, 0, 1, 1], [], []>} : vector<16x160xbf16>, vector<160x128xbf16>, vector<16x128xf32> -> vector<16x128xf32>
    %76 = arith.addf %70, %75 : vector<16x128xf32>
    %77 = vector.extract_strided_slice %51 {offsets = [4, 0, 0], sizes = [1, 16, 160], strides = [1, 1, 1]} : vector<10x16x160xbf16> to vector<1x16x160xbf16>
    %78 = vector.shape_cast %77 : vector<1x16x160xbf16> to vector<16x160xbf16>
    %c4 = arith.constant 4 : index
    %c0_36 = arith.constant 0 : index
    %c0_37 = arith.constant 0 : index
    %79 = vector.load %arg8[%c4, %c0_36, %c0_37] : memref<10x160x128xbf16, #tpu.memory_space<vmem>>, vector<1x160x128xbf16>
    %80 = vector.shape_cast %79 : vector<1x160x128xbf16> to vector<160x128xbf16>
    %cst_38 = arith.constant dense<0.000000e+00> : vector<16x128xf32>
    %81 = tpu.matmul %78, %80, %cst_38 {dimension_numbers = #tpu.dot_dimension_numbers<[1], [0], [0], [1], [0, 0, 1, 1], [], []>} : vector<16x160xbf16>, vector<160x128xbf16>, vector<16x128xf32> -> vector<16x128xf32>
    %82 = arith.addf %76, %81 : vector<16x128xf32>
    %83 = vector.extract_strided_slice %51 {offsets = [5, 0, 0], sizes = [1, 16, 160], strides = [1, 1, 1]} : vector<10x16x160xbf16> to vector<1x16x160xbf16>
    %84 = vector.shape_cast %83 : vector<1x16x160xbf16> to vector<16x160xbf16>
    %c5 = arith.constant 5 : index
    %c0_39 = arith.constant 0 : index
    %c0_40 = arith.constant 0 : index
    %85 = vector.load %arg8[%c5, %c0_39, %c0_40] : memref<10x160x128xbf16, #tpu.memory_space<vmem>>, vector<1x160x128xbf16>
    %86 = vector.shape_cast %85 : vector<1x160x128xbf16> to vector<160x128xbf16>
    %cst_41 = arith.constant dense<0.000000e+00> : vector<16x128xf32>
    %87 = tpu.matmul %84, %86, %cst_41 {dimension_numbers = #tpu.dot_dimension_numbers<[1], [0], [0], [1], [0, 0, 1, 1], [], []>} : vector<16x160xbf16>, vector<160x128xbf16>, vector<16x128xf32> -> vector<16x128xf32>
    %88 = arith.addf %82, %87 : vector<16x128xf32>
    %89 = vector.extract_strided_slice %51 {offsets = [6, 0, 0], sizes = [1, 16, 160], strides = [1, 1, 1]} : vector<10x16x160xbf16> to vector<1x16x160xbf16>
    %90 = vector.shape_cast %89 : vector<1x16x160xbf16> to vector<16x160xbf16>
    %c6 = arith.constant 6 : index
    %c0_42 = arith.constant 0 : index
    %c0_43 = arith.constant 0 : index
    %91 = vector.load %arg8[%c6, %c0_42, %c0_43] : memref<10x160x128xbf16, #tpu.memory_space<vmem>>, vector<1x160x128xbf16>
    %92 = vector.shape_cast %91 : vector<1x160x128xbf16> to vector<160x128xbf16>
    %cst_44 = arith.constant dense<0.000000e+00> : vector<16x128xf32>
    %93 = tpu.matmul %90, %92, %cst_44 {dimension_numbers = #tpu.dot_dimension_numbers<[1], [0], [0], [1], [0, 0, 1, 1], [], []>} : vector<16x160xbf16>, vector<160x128xbf16>, vector<16x128xf32> -> vector<16x128xf32>
    %94 = arith.addf %88, %93 : vector<16x128xf32>
    %95 = vector.extract_strided_slice %51 {offsets = [7, 0, 0], sizes = [1, 16, 160], strides = [1, 1, 1]} : vector<10x16x160xbf16> to vector<1x16x160xbf16>
    %96 = vector.shape_cast %95 : vector<1x16x160xbf16> to vector<16x160xbf16>
    %c7 = arith.constant 7 : index
    %c0_45 = arith.constant 0 : index
    %c0_46 = arith.constant 0 : index
    %97 = vector.load %arg8[%c7, %c0_45, %c0_46] : memref<10x160x128xbf16, #tpu.memory_space<vmem>>, vector<1x160x128xbf16>
    %98 = vector.shape_cast %97 : vector<1x160x128xbf16> to vector<160x128xbf16>
    %cst_47 = arith.constant dense<0.000000e+00> : vector<16x128xf32>
    %99 = tpu.matmul %96, %98, %cst_47 {dimension_numbers = #tpu.dot_dimension_numbers<[1], [0], [0], [1], [0, 0, 1, 1], [], []>} : vector<16x160xbf16>, vector<160x128xbf16>, vector<16x128xf32> -> vector<16x128xf32>
    %100 = arith.addf %94, %99 : vector<16x128xf32>
    %101 = vector.extract_strided_slice %51 {offsets = [8, 0, 0], sizes = [1, 16, 160], strides = [1, 1, 1]} : vector<10x16x160xbf16> to vector<1x16x160xbf16>
    %102 = vector.shape_cast %101 : vector<1x16x160xbf16> to vector<16x160xbf16>
    %c8 = arith.constant 8 : index
    %c0_48 = arith.constant 0 : index
    %c0_49 = arith.constant 0 : index
    %103 = vector.load %arg8[%c8, %c0_48, %c0_49] : memref<10x160x128xbf16, #tpu.memory_space<vmem>>, vector<1x160x128xbf16>
    %104 = vector.shape_cast %103 : vector<1x160x128xbf16> to vector<160x128xbf16>
    %cst_50 = arith.constant dense<0.000000e+00> : vector<16x128xf32>
    %105 = tpu.matmul %102, %104, %cst_50 {dimension_numbers = #tpu.dot_dimension_numbers<[1], [0], [0], [1], [0, 0, 1, 1], [], []>} : vector<16x160xbf16>, vector<160x128xbf16>, vector<16x128xf32> -> vector<16x128xf32>
    %106 = arith.addf %100, %105 : vector<16x128xf32>
    %107 = vector.extract_strided_slice %51 {offsets = [9, 0, 0], sizes = [1, 16, 160], strides = [1, 1, 1]} : vector<10x16x160xbf16> to vector<1x16x160xbf16>
    %108 = vector.shape_cast %107 : vector<1x16x160xbf16> to vector<16x160xbf16>
    %c9 = arith.constant 9 : index
    %c0_51 = arith.constant 0 : index
    %c0_52 = arith.constant 0 : index
    %109 = vector.load %arg8[%c9, %c0_51, %c0_52] : memref<10x160x128xbf16, #tpu.memory_space<vmem>>, vector<1x160x128xbf16>
    %110 = vector.shape_cast %109 : vector<1x160x128xbf16> to vector<160x128xbf16>
    %cst_53 = arith.constant dense<0.000000e+00> : vector<16x128xf32>
    %111 = tpu.matmul %108, %110, %cst_53 {dimension_numbers = #tpu.dot_dimension_numbers<[1], [0], [0], [1], [0, 0, 1, 1], [], []>} : vector<16x160xbf16>, vector<160x128xbf16>, vector<16x128xf32> -> vector<16x128xf32>
    %112 = arith.addf %106, %111 : vector<16x128xf32>
    %c0_54 = arith.constant 0 : index
    %c0_55 = arith.constant 0 : index
    %113 = vector.load %arg9[%c0_54, %c0_55] : memref<1x128xf32, #tpu.memory_space<vmem>>, vector<1x128xf32>
    %114 = vector.broadcast %113 : vector<1x128xf32> to vector<16x128xf32>
    %115 = arith.addf %112, %114 : vector<16x128xf32>
    %cst_56 = arith.constant 0.000000e+00 : f32
    %116 = vector.broadcast %cst_56 : f32 to vector<16x128xf32>
    %117 = arith.maximumf %115, %116 : vector<16x128xf32>
    %118 = arith.truncf %117 : vector<16x128xf32> to vector<16x128xbf16>
    %c0_57 = arith.constant 0 : index
    %c0_58 = arith.constant 0 : index
    %119 = vector.load %arg10[%c0_57, %c0_58] : memref<128x128xbf16, #tpu.memory_space<vmem>>, vector<128x128xbf16>
    %cst_59 = arith.constant dense<0.000000e+00> : vector<16x128xf32>
    %120 = tpu.matmul %118, %119, %cst_59 {dimension_numbers = #tpu.dot_dimension_numbers<[1], [0], [0], [1], [0, 0, 1, 1], [], []>} : vector<16x128xbf16>, vector<128x128xbf16>, vector<16x128xf32> -> vector<16x128xf32>
    %c0_60 = arith.constant 0 : index
    %c0_61 = arith.constant 0 : index
    %121 = vector.load %arg11[%c0_60, %c0_61] : memref<1x128xf32, #tpu.memory_space<vmem>>, vector<1x128xf32>
    %122 = vector.broadcast %121 : vector<1x128xf32> to vector<16x128xf32>
    %123 = arith.addf %120, %122 : vector<16x128xf32>
    %cst_62 = arith.constant 0.000000e+00 : f32
    %124 = vector.broadcast %cst_62 : f32 to vector<16x128xf32>
    %125 = arith.maximumf %123, %124 : vector<16x128xf32>
    %126 = arith.truncf %125 : vector<16x128xf32> to vector<16x128xbf16>
    %c0_63 = arith.constant 0 : index
    %c0_64 = arith.constant 0 : index
    %127 = vector.load %arg12[%c0_63, %c0_64] : memref<128x128xbf16, #tpu.memory_space<vmem>>, vector<128x128xbf16>
    %cst_65 = arith.constant dense<0.000000e+00> : vector<16x128xf32>
    %128 = tpu.matmul %126, %127, %cst_65 {dimension_numbers = #tpu.dot_dimension_numbers<[1], [0], [0], [1], [0, 0, 1, 1], [], []>} : vector<16x128xbf16>, vector<128x128xbf16>, vector<16x128xf32> -> vector<16x128xf32>
    %c0_66 = arith.constant 0 : index
    %c0_67 = arith.constant 0 : index
    %129 = vector.load %arg13[%c0_66, %c0_67] : memref<1x128xf32, #tpu.memory_space<vmem>>, vector<1x128xf32>
    %130 = vector.broadcast %129 : vector<1x128xf32> to vector<16x128xf32>
    %131 = arith.addf %128, %130 : vector<16x128xf32>
    %c0_68 = arith.constant 0 : index
    %c0_69 = arith.constant 0 : index
    %132 = vector.load %arg14[%c0_68, %c0_69] : memref<16x128xf32, #tpu.memory_space<vmem>>, vector<16x128xf32>
    tpu.vector_store %arg14[%c0_68, %c0_69], %131 {strides = array<i32>} : memref<16x128xf32, #tpu.memory_space<vmem>>, vector<16x128xf32>,
    return
  }
  func.func @transform_0(%arg0: i32) -> (i32, i32, i32) {
    %c0_i32 = arith.constant 0 : i32
    %c0_i32_0 = arith.constant 0 : i32
    %c0_i32_1 = arith.constant 0 : i32
    return %c0_i32, %arg0, %c0_i32_0 : i32, i32, i32
  }
  func.func @transform_1(%arg0: i32) -> (i32, i32, i32) {
    %c0_i32 = arith.constant 0 : i32
    %c0_i32_0 = arith.constant 0 : i32
    %c0_i32_1 = arith.constant 0 : i32
    return %c0_i32, %arg0, %c0_i32_0 : i32, i32, i32
  }
  func.func @transform_2(%arg0: i32) -> (i32, i32) {
    %c0_i32 = arith.constant 0 : i32
    %c0_i32_0 = arith.constant 0 : i32
    %c0_i32_1 = arith.constant 0 : i32
    return %c0_i32, %c0_i32_0 : i32, i32
  }
  func.func @transform_3(%arg0: i32) -> (i32, i32) {
    %c0_i32 = arith.constant 0 : i32
    %c0_i32_0 = arith.constant 0 : i32
    %c0_i32_1 = arith.constant 0 : i32
    return %c0_i32, %c0_i32_0 : i32, i32
  }
  func.func @transform_4(%arg0: i32) -> (i32, i32) {
    %c0_i32 = arith.constant 0 : i32
    %c0_i32_0 = arith.constant 0 : i32
    %c0_i32_1 = arith.constant 0 : i32
    return %c0_i32, %c0_i32_0 : i32, i32
  }
  func.func @transform_5(%arg0: i32) -> (i32, i32) {
    %c0_i32 = arith.constant 0 : i32
    %c0_i32_0 = arith.constant 0 : i32
    %c0_i32_1 = arith.constant 0 : i32
    return %c0_i32, %c0_i32_0 : i32, i32
  }
  func.func @transform_6(%arg0: i32) -> (i32, i32) {
    %c0_i32 = arith.constant 0 : i32
    %c0_i32_0 = arith.constant 0 : i32
    %c0_i32_1 = arith.constant 0 : i32
    return %c0_i32, %c0_i32_0 : i32, i32
  }
  func.func @transform_7(%arg0: i32) -> (i32, i32, i32) {
    %c0_i32 = arith.constant 0 : i32
    %c0_i32_0 = arith.constant 0 : i32
    %c0_i32_1 = arith.constant 0 : i32
    %c0_i32_2 = arith.constant 0 : i32
    return %c0_i32, %c0_i32_0, %c0_i32_1 : i32, i32, i32
  }
  func.func @transform_8(%arg0: i32) -> (i32, i32) {
    %c0_i32 = arith.constant 0 : i32
    %c0_i32_0 = arith.constant 0 : i32
    %c0_i32_1 = arith.constant 0 : i32
    return %c0_i32, %c0_i32_0 : i32, i32
  }
  func.func @transform_9(%arg0: i32) -> (i32, i32) {
    %c0_i32 = arith.constant 0 : i32
    %c0_i32_0 = arith.constant 0 : i32
    %c0_i32_1 = arith.constant 0 : i32
    return %c0_i32, %c0_i32_0 : i32, i32
  }
  func.func @transform_10(%arg0: i32) -> (i32, i32) {
    %c0_i32 = arith.constant 0 : i32
    %c0_i32_0 = arith.constant 0 : i32
    %c0_i32_1 = arith.constant 0 : i32
    return %c0_i32, %c0_i32_0 : i32, i32
  }
  func.func @transform_11(%arg0: i32) -> (i32, i32) {
    %c0_i32 = arith.constant 0 : i32
    %c0_i32_0 = arith.constant 0 : i32
    %c0_i32_1 = arith.constant 0 : i32
    return %c0_i32, %c0_i32_0 : i32, i32
  }
  func.func @transform_12(%arg0: i32) -> (i32, i32) {
    %c0_i32 = arith.constant 0 : i32
    %c0_i32_0 = arith.constant 0 : i32
    %c0_i32_1 = arith.constant 0 : i32
    return %c0_i32, %c0_i32_0 : i32, i32
  }
  func.func @transform_13(%arg0: i32) -> (i32, i32) {
    %c0_i32 = arith.constant 0 : i32
    %c0_i32_0 = arith.constant 0 : i32
    return %arg0, %c0_i32 : i32, i32
  }
}

</mosaic_0001>

<bundles_post_ra>
// kernel: lenet_forward.1
= control target key start
LH: loop header
LB: loop body
LE: loop exit
PB: predicated region body
PF: predicated region fallthrough
CT: control target
= control target key end

     0   :  { %s5017_s29 = smov 32   ;;  %s5018_s15 = smov 64   ;;  %vm349_vm0 = vcmask 261120   ;;  %vm392_vm1 = vcmask 523264   ;;  %vm421_vm2 = vcmask 785408   ;;  %s6853_s0 = inlined_call_operand.vmem [shape: bf16[16,16,32], index: 0, kind: input, shape index: {}]   ;;  %s6854_s1 = inlined_call_operand.vmem [shape: bf16[16,16,32], index: 1, kind: input, shape index: {}]   ;;  %s6855_s2 = inlined_call_operand.vmem [shape: bf16[160,168], index: 2, kind: input, shape index: {}]   ;;  %s6856_s3 = inlined_call_operand.vmem [shape: f32[1,168], index: 3, kind: input, shape index: {}]   ;;  %s6857_s4 = inlined_call_operand.vmem [shape: bf16[168,84], index: 4, kind: input, shape index: {}]   ;;  %s6858_s5 = inlined_call_operand.vmem [shape: bf16[420,160], index: 5, kind: input, shape index: {}]   ;;  %s6859_s6 = inlined_call_operand.vmem [shape: f32[1,160], index: 6, kind: input, shape index: {}]   ;;  %s6860_s7 = inlined_call_operand.vmem [shape: bf16[10,160,128], index: 7, kind: input, shape index: {}]   ;;  %s6861_s8 = inlined_call_operand.vmem [shape: f32[1,128], index: 8, kind: input, shape index: {}]   ;;  %s6862_s9 = inlined_call_operand.vmem [shape: bf16[128,128], index: 9, kind: input, shape index: {}]   ;;  %s6863_s10 = inlined_call_operand.vmem [shape: f32[1,128], index: 10, kind: input, shape index: {}]   ;;  %s6864_s11 = inlined_call_operand.vmem [shape: bf16[128,128], index: 11, kind: input, shape index: {}]   ;;  %s6865_s12 = inlined_call_operand.vmem [shape: f32[1,128], index: 12, kind: input, shape index: {}]   ;;  %s6866_s13 = inlined_call_operand.hbm [shape: f32[16,128], index: 13, kind: output, shape index: {}]  }
   0x1   :  { %v5103_v0 = vld [vmem:[%s6854_s1] sm:$0xff]   ;;  %v4718_v1 = vld [vmem:[%s6853_s0 + $0x8] sm:$0xff]   ;;  %v4720_v3 = vld [vmem:[%s6853_s0 + $0x10] sm:$0xff]   ;;  %s5019_s20 = smov 96  }
   0x2   :  { %250 = vrot.lane.b32.xlu0 %v5103_v0, %s5017_s29  ;;  %v4719_v2 = vld [vmem:[%s6854_s1 + $0x8] sm:$0xff]   ;;  %283 = vrot.lane.b32.xlu1 %v4718_v1, %s5018_s15  ;;  %v4721_v4 = vld [vmem:[%s6854_s1 + $0x10] sm:$0xff]  }
   0x3   :  { %4219 = vmatprep.mubr.msk.bf16.mxu0 %vm349_vm0, %v4720_v3  ;;  %4233 = vmatprep.mubr.msk.bf16.mxu1 %vm349_vm0, %v4721_v4  ;;  %v4733_v5 = vld [vmem:[%s6855_s2 + $0x74] ss:$8 sps:$4 sm:$0xff]   ;;  %v4735_v6 = vld [vmem:[%s6855_s2 + $0x70] ss:$8 sps:$4 sm:$0xff]   ;;  %v4736_v7 = vld [vmem:[%s6855_s2 + $0x64] ss:$8 sps:$4 sm:$0xff]  }
   0x4   :  { %827 = vmatprep.subr.bf16.mxu0 %v4733_v5  ;;  %v5142_v8 = vld [vmem:[%s6853_s0 + $0x18] sm:$0xff]   ;;  %1086 = vmatprep.subr.bf16.mxu1 %v4733_v5  ;;  %v4739_v9 = vld [vmem:[%s6855_s2 + $0x60] ss:$8 sps:$4 sm:$0xff]   ;;  %v4744_v12 = vld [vmem:[%s6855_s2 + $0x44] ss:$8 sps:$4 sm:$0xff]  }
   0x5   :  { %828 = vmatpush1.bf16.msra.mxu0 %v4735_v6  ;;  %1087 = vmatpush1.bf16.msra.mxu1 %v4735_v6  ;;  %v4740_v10 = vld [vmem:[%s6855_s2 + $0x54] ss:$8 sps:$4 sm:$0xff]   ;;  %v4743_v11 = vld [vmem:[%s6855_s2 + $0x50] ss:$8 sps:$4 sm:$0xff]   ;;  %v4746_v14 = vld [vmem:[%s6855_s2 + $0x40] ss:$8 sps:$4 sm:$0xff]  }
   0x6   :  { %464 = vrot.lane.b32.xlu0 %v4718_v1, %s5017_s29  ;;  %492 = vrot.lane.b32.xlu1 %v4719_v2, %s5018_s15  ;;  %v5165_v13 = vld [vmem:[%s6854_s1 + $0x18] sm:$0xff]   ;;  %v5180_v16 = vld [vmem:[%s6853_s0 + $0x20] sm:$0xff]  }
   0x7   :  { %829 = vmatprep.subr.bf16.mxu0 %v4736_v7  ;;  %1088 = vmatprep.subr.bf16.mxu1 %v4736_v7  ;;  %v4747_v15 = vld [vmem:[%s6855_s2 + $0x34] ss:$8 sps:$4 sm:$0xff]   ;;  %v4750_v17 = vld [vmem:[%s6855_s2 + $0x30] ss:$8 sps:$4 sm:$0xff]   ;;  %v4751_v18 = vld [vmem:[%s6855_s2 + $0x24] ss:$8 sps:$4 sm:$0xff]  }
   0x8   :  { %v4754_v19 = vld [vmem:[%s6855_s2 + $0x20] ss:$8 sps:$4 sm:$0xff]   ;;  %v4755_v20 = vld [vmem:[%s6855_s2 + $0x14] ss:$8 sps:$4 sm:$0xff]   ;;  %v4757_v22 = vld [vmem:[%s6855_s2 + $0x10] ss:$8 sps:$4 sm:$0xff]  }
   0x9   :  { %830 = vmatpush1.bf16.msra.mxu0 %v4739_v9  ;;  %1089 = vmatpush1.bf16.msra.mxu1 %v4739_v9  ;;  %v5205_v21 = vld [vmem:[%s6854_s1 + $0x20] sm:$0xff]   ;;  %v5218_v24 = vld [vmem:[%s6853_s0 + $0x28] sm:$0xff]   ;;  %v4763_v26 = vld [vmem:[%s6855_s2 + $0x94] ss:$8 sps:$4 sm:$0xff]  }
   0xa   :  { %316 = vrot.lane.b32.xlu0 %v4719_v2, %s5019_s20  ;;  %520 = vrot.lane.b32.xlu1 %v4720_v3, %s5019_s20  ;;  %v4758_v23 = vld [vmem:[%s6855_s2 + $0x4] ss:$8 sps:$4 sm:$0xff]   ;;  %v4761_v25 = vld [vmem:[%s6855_s2] ss:$8 sps:$4 sm:$0xff]  }
   0xb   :  { %831 = vmatprep.subr.bf16.mxu0 %v4740_v10  ;;  %1090 = vmatprep.subr.bf16.mxu1 %v4740_v10  ;;  %v4766_v27 = vld [vmem:[%s6855_s2 + $0x90] ss:$8 sps:$4 sm:$0xff]   ;;  %v4767_v28 = vld [vmem:[%s6855_s2 + $0x84] ss:$8 sps:$4 sm:$0xff]   ;;  %v4769_v30 = vld [vmem:[%s6855_s2 + $0x80] ss:$8 sps:$4 sm:$0xff]  }
   0xc   :  { %v5241_v29 = vld [vmem:[%s6854_s1 + $0x28] sm:$0xff]   ;;  %v5253_v31 = vld [vmem:[%s6853_s0 + $0x30] sm:$0xff]   ;;  %v5275_v33 = vld [vmem:[%s6853_s0 + $0x38] sm:$0xff]  }
   0xd   :  { %832 = vmatpush1.bf16.msra.mxu0 %v4743_v11  ;;  %1091 = vmatpush1.bf16.msra.mxu1 %v4743_v11  ;;  %v5266_v32 = vld [vmem:[%s6854_s1 + $0x30] sm:$0xff]   ;;  %v5288_v34 = vld [vmem:[%s6854_s1 + $0x38] sm:$0xff]   ;;  %v5297_v35 = vld [vmem:[%s6853_s0 + $0x40] sm:$0xff]  }
   0xe   :  { %252 = vrot.lane.b32.xlu0 %v4719_v2, %s5017_s29  ;;  %466 = vrot.lane.b32.xlu1 %v4720_v3, %s5017_s29  ;;  %v5310_v36 = vld [vmem:[%s6854_s1 + $0x40] sm:$0xff]   ;;  %v5319_v37 = vld [vmem:[%s6853_s0 + $0x48] sm:$0xff]  }
   0xf   :  { %833 = vmatprep.subr.bf16.mxu0 %v4744_v12  ;;  %1092 = vmatprep.subr.bf16.mxu1 %v4744_v12  ;;  %v5332_v38 = vld [vmem:[%s6854_s1 + $0x48] sm:$0xff]   ;;  %v5341_v39 = vld [vmem:[%s6853_s0 + $0x50] sm:$0xff]   ;;  %v5363_v41 = vld [vmem:[%s6853_s0 + $0x58] sm:$0xff]  }
  0x10   :  { %v5354_v40 = vld [vmem:[%s6854_s1 + $0x50] sm:$0xff]   ;;  %v4762_v42 = vld [vmem:[%s6853_s0] sm:$0xff]   ;;  %v5380_v48 = vld [vmem:[%s6854_s1 + $0x58] sm:$0xff]  }
  0x11   :  { %834 = vmatpush1.bf16.msra.mxu0 %v4746_v14  ;;  %1093 = vmatpush1.bf16.msra.mxu1 %v4746_v14  ;;  %v5394_v55 = vld [vmem:[%s6853_s0 + $0x60] sm:$0xff]   ;;  %v4986_v62 = vld [vmem:[%s6853_s0 + $0x8] sm:$0xff]   ;;  %v4778_v11 = vld [vmem:[%s6857_s4 + $0x38] sm:$0xff]  }
  0x12   :  { %285 = vrot.lane.b32.xlu0 %v4720_v3, %s5018_s15  ;;  %494 = vrot.lane.b32.xlu1 %v4721_v4, %s5018_s15  ;;  %v5412_v61 = vld [vmem:[%s6854_s1 + $0x60] sm:$0xff]   ;;  %v5432_v7 = vld [vmem:[%s6853_s0 + $0x68] sm:$0xff]  }
  0x13   :  { %835 = vmatprep.subr.bf16.mxu0 %v4747_v15  ;;  %1094 = vmatprep.subr.bf16.mxu1 %v4747_v15  ;;  %v4988_v15 = vld [vmem:[%s6853_s0 + $0x10] sm:$0xff]  }
  0x15   :  { %836 = vmatpush1.bf16.msra.mxu0 %v4750_v17  ;;  %1095 = vmatpush1.bf16.msra.mxu1 %v4750_v17  ;;  %v5463_v17 = vld [vmem:[%s6854_s1 + $0x68] sm:$0xff]  }
  0x16   :  { %318 = vrot.lane.b32.xlu0 %v4721_v4, %s5019_s20  ;;  %522 = vrot.lane.b32.xlu1 %v5142_v8, %s5019_s20 }
  0x17   :  { %837 = vmatprep.subr.bf16.mxu0 %v4751_v18  ;;  %1096 = vmatprep.subr.bf16.mxu1 %v4751_v18 }
  0x19   :  { %838 = vmatpush1.bf16.msra.mxu0 %v4754_v19  ;;  %1097 = vmatpush1.bf16.msra.mxu1 %v4754_v19 }
  0x1a   :  { %254 = vrot.lane.b32.xlu0 %v4721_v4, %s5017_s29  ;;  %468 = vrot.lane.b32.xlu1 %v5142_v8, %s5017_s29 }
  0x1b   :  { %839 = vmatprep.subr.bf16.mxu0 %v4755_v20  ;;  %1098 = vmatprep.subr.bf16.mxu1 %v4755_v20 }
  0x1d   :  { %840 = vmatpush1.bf16.msra.mxu0 %v4757_v22  ;;  %1099 = vmatpush1.bf16.msra.mxu1 %v4757_v22 }
  0x1e   :  { %287 = vrot.lane.b32.xlu0 %v5142_v8, %s5018_s15  ;;  %496 = vrot.lane.b32.xlu1 %v5165_v13, %s5018_s15 }
  0x1f   :  { %841 = vmatprep.subr.bf16.mxu0 %v4758_v23  ;;  %1100 = vmatprep.subr.bf16.mxu1 %v4758_v23 }
  0x21   :  { %842 = vmatpush1.bf16.msra.mxu0 %v4761_v25  ;;  %1101 = vmatpush1.bf16.msra.mxu1 %v4761_v25 }
  0x22   :  { %320 = vrot.lane.b32.xlu0 %v5165_v13, %s5019_s20  ;;  %524 = vrot.lane.b32.xlu1 %v5180_v16, %s5019_s20 }
  0x23   :  { %855 = vmatprep.subr.bf16.mxu0 %v4763_v26  ;;  %1114 = vmatprep.subr.bf16.mxu1 %v4763_v26 }
  0x25   :  { %856 = vmatpush2.bf16.msra.mxu0 %v4766_v27  ;;  %1115 = vmatpush2.bf16.msra.mxu1 %v4766_v27 }
  0x26   :  { %256 = vrot.lane.b32.xlu0 %v5165_v13, %s5017_s29  ;;  %470 = vrot.lane.b32.xlu1 %v5180_v16, %s5017_s29 }
  0x27   :  { %857 = vmatprep.subr.bf16.mxu0 %v4767_v28  ;;  %1116 = vmatprep.subr.bf16.mxu1 %v4767_v28 }
  0x29   :  { %858 = vmatpush2.bf16.msra.mxu0 %v4769_v30  ;;  %1117 = vmatpush2.bf16.msra.mxu1 %v4769_v30 }
  0x2a   :  { %289 = vrot.lane.b32.xlu0 %v5180_v16, %s5018_s15  ;;  %498 = vrot.lane.b32.xlu1 %v5205_v21, %s5018_s15 }
  0x2e   :  { %322 = vrot.lane.b32.xlu0 %v5205_v21, %s5019_s20  ;;  %526 = vrot.lane.b32.xlu1 %v5218_v24, %s5019_s20 }
  0x32   :  { %258 = vrot.lane.b32.xlu0 %v5205_v21, %s5017_s29  ;;  %472 = vrot.lane.b32.xlu1 %v5218_v24, %s5017_s29 }
  0x36   :  { %291 = vrot.lane.b32.xlu0 %v5218_v24, %s5018_s15  ;;  %500 = vrot.lane.b32.xlu1 %v5241_v29, %s5018_s15 }
  0x3a   :  { %324 = vrot.lane.b32.xlu0 %v5241_v29, %s5019_s20  ;;  %528 = vrot.lane.b32.xlu1 %v5253_v31, %s5019_s20 }
  0x3e   :  { %260 = vrot.lane.b32.xlu0 %v5241_v29, %s5017_s29  ;;  %474 = vrot.lane.b32.xlu1 %v5253_v31, %s5017_s29 }
  0x42   :  { %293 = vrot.lane.b32.xlu0 %v5253_v31, %s5018_s15  ;;  %502 = vrot.lane.b32.xlu1 %v5266_v32, %s5018_s15 }
  0x46   :  { %326 = vrot.lane.b32.xlu0 %v5266_v32, %s5019_s20  ;;  %530 = vrot.lane.b32.xlu1 %v5275_v33, %s5019_s20 }
  0x4a   :  { %262 = vrot.lane.b32.xlu0 %v5266_v32, %s5017_s29  ;;  %476 = vrot.lane.b32.xlu1 %v5275_v33, %s5017_s29 }
  0x4e   :  { %295 = vrot.lane.b32.xlu0 %v5275_v33, %s5018_s15  ;;  %504 = vrot.lane.b32.xlu1 %v5288_v34, %s5018_s15 }
  0x52   :  { %328 = vrot.lane.b32.xlu0 %v5288_v34, %s5019_s20  ;;  %532 = vrot.lane.b32.xlu1 %v5297_v35, %s5019_s20 }
  0x56   :  { %264 = vrot.lane.b32.xlu0 %v5288_v34, %s5017_s29  ;;  %478 = vrot.lane.b32.xlu1 %v5297_v35, %s5017_s29 }
  0x5a   :  { %297 = vrot.lane.b32.xlu0 %v5297_v35, %s5018_s15  ;;  %506 = vrot.lane.b32.xlu1 %v5310_v36, %s5018_s15 }
  0x5e   :  { %330 = vrot.lane.b32.xlu0 %v5310_v36, %s5019_s20  ;;  %534 = vrot.lane.b32.xlu1 %v5319_v37, %s5019_s20 }
  0x62   :  { %266 = vrot.lane.b32.xlu0 %v5310_v36, %s5017_s29  ;;  %480 = vrot.lane.b32.xlu1 %v5319_v37, %s5017_s29 }
  0x66   :  { %299 = vrot.lane.b32.xlu0 %v5319_v37, %s5018_s15  ;;  %508 = vrot.lane.b32.xlu1 %v5332_v38, %s5018_s15 }
  0x6a   :  { %332 = vrot.lane.b32.xlu0 %v5332_v38, %s5019_s20  ;;  %536 = vrot.lane.b32.xlu1 %v5341_v39, %s5019_s20 }
  0x6e   :  { %268 = vrot.lane.b32.xlu0 %v5332_v38, %s5017_s29  ;;  %482 = vrot.lane.b32.xlu1 %v5341_v39, %s5017_s29 }
  0x72   :  { %301 = vrot.lane.b32.xlu0 %v5341_v39, %s5018_s15  ;;  %510 = vrot.lane.b32.xlu1 %v5354_v40, %s5018_s15 }
  0x74   :  { %v251_v43 = vpop.permute.xlu0 %250  ;;  %v284_v44 = vpop.permute.xlu1 %283 }
  0x75   :  { %v352_v46 = vsel %vm349_vm0, %v4762_v42, %v251_v43 }
  0x76   :  { %334 = vrot.lane.b32.xlu0 %v5354_v40, %s5019_s20  ;;  %538 = vrot.lane.b32.xlu1 %v5363_v41, %s5019_s20  ;;  %v394_v50 = vsel %vm392_vm1, %v352_v46, %v284_v44 }
  0x78   :  { %v465_v45 = vpop.permute.xlu0 %464  ;;  %v493_v47 = vpop.permute.xlu1 %492 }
  0x79   :  { %v555_v49 = vsel %vm349_vm0, %v5103_v0, %v465_v45  ;;  %v4987_v0 = vld [vmem:[%s6854_s1 + $0x8] sm:$0xff]  }
  0x7a   :  { %270 = vrot.lane.b32.xlu0 %v5354_v40, %s5017_s29  ;;  %484 = vrot.lane.b32.xlu1 %v5363_v41, %s5017_s29  ;;  %v596_v54 = vsel %vm392_vm1, %v555_v49, %v493_v47 }
  0x7c   :  { %v317_v51 = vpop.permute.xlu0 %316  ;;  %v521_v52 = vpop.permute.xlu1 %520 }
  0x7d   :  { %v423_v53 = vsel %vm421_vm2, %v394_v50, %v317_v51  ;;  %v624_v56 = vsel %vm421_vm2, %v596_v54, %v521_v52 }
  0x7e   :  { %303 = vrot.lane.b32.xlu0 %v5363_v41, %s5018_s15  ;;  %860 = vmatmul.mubr.bf16.vlgmr.msra.gmra.mxu0 %v423_v53 }
  0x7f   :  { %512 = vrot.lane.b32.xlu1 %v5380_v48, %s5018_s15  ;;  %1119 = vmatmul.mubr.bf16.vlgmr.msra.gmra.mxu1 %v624_v56 }
  0x80   :  { %v253_v57 = vpop.permute.xlu0 %252  ;;  %4220 = vmatprep.mubr.msk.bf16.mxu0 %vm349_vm0, %v5142_v8  ;;  %4234 = vmatprep.mubr.msk.bf16.mxu1 %vm349_vm0, %v5165_v13  ;;  %v467_v58 = vpop.permute.xlu1 %466  ;;  %v5020_v13 = vmov 0  }
  0x81   :  { %v355_v63 = vsel %vm349_vm0, %v4986_v62, %v253_v57  ;;  %v558_v1 = vsel %vm349_vm0, %v4987_v0, %v467_v58  ;;  %1586 = vmatprep.subr.bf16.mxu0 %v5020_v13 }
  0x82   :  { %336 = vrot.lane.b32.xlu0 %v5380_v48, %s5019_s20  ;;  %1587 = vmatpush1.bf16.msra.mxu0 %v4778_v11 }
  0x83   :  { %540 = vrot.lane.b32.xlu1 %v5394_v55, %s5019_s20  ;;  %1588 = vmatprep.subr.bf16.mxu0 %v5020_v13 }
  0x84   :  { %v286_v59 = vpop.permute.xlu0 %285  ;;  %v495_v60 = vpop.permute.xlu1 %494 }
  0x85   :  { %v396_v2 = vsel %vm392_vm1, %v355_v63, %v286_v59  ;;  %v598_v4 = vsel %vm392_vm1, %v558_v1, %v495_v60 }
  0x86   :  { %272 = vrot.lane.b32.xlu0 %v5380_v48, %s5017_s29 }
  0x87   :  { %486 = vrot.lane.b32.xlu1 %v5394_v55, %s5017_s29 }
  0x88   :  { %v319_v3 = vpop.permute.xlu0 %318  ;;  %v523_v5 = vpop.permute.xlu1 %522 }
  0x89   :  { %v426_v6 = vsel %vm421_vm2, %v396_v2, %v319_v3  ;;  %v627_v8 = vsel %vm421_vm2, %v598_v4, %v523_v5 }
  0x8a   :  { %305 = vrot.lane.b32.xlu0 %v5394_v55, %s5018_s15  ;;  %870 = vmatmul.mubr.bf16.gmra.mxu0 %v426_v6 }
  0x8b   :  { %514 = vrot.lane.b32.xlu1 %v5412_v61, %s5018_s15  ;;  %1129 = vmatmul.mubr.bf16.gmra.mxu1 %v627_v8 }
  0x8c   :  { %v255_v9 = vpop.permute.xlu0 %254  ;;  %4221 = vmatprep.mubr.msk.bf16.mxu0 %vm349_vm0, %v5180_v16  ;;  %4235 = vmatprep.mubr.msk.bf16.mxu1 %vm349_vm0, %v5205_v21  ;;  %v469_v10 = vpop.permute.xlu1 %468 }
  0x8d   :  { %v358_v16 = vsel %vm349_vm0, %v4988_v15, %v255_v9 }
  0x8e   :  { %338 = vrot.lane.b32.xlu0 %v5412_v61, %s5019_s20 }
  0x8f   :  { %542 = vrot.lane.b32.xlu1 %v5432_v7, %s5019_s20 }
  0x90   :  { %v288_v12 = vpop.permute.xlu0 %287  ;;  %v497_v14 = vpop.permute.xlu1 %496 }
  0x92   :  { %274 = vrot.lane.b32.xlu0 %v5412_v61, %s5017_s29 }
  0x93   :  { %488 = vrot.lane.b32.xlu1 %v5432_v7, %s5017_s29 }
  0x94   :  { %18 = vsyncpa [#allocation3], 0  ;;  %v4989_v18 = vld [vmem:[%s6854_s1 + $0x10] sm:$0xff]   ;;  %v398_v20 = vsel %vm392_vm1, %v358_v16, %v288_v12  ;;  %v321_v21 = vpop.permute.xlu0 %320  ;;  %v525_v23 = vpop.permute.xlu1 %524  ;;  %v4781_v43 = vld [vmem:[%s6857_s4 + $0x28] sm:$0xff]   ;;  %vm1582_vm3 = vcmask 1043456   ;;  %vm1539_vm4 = vcmask 326656  }
  0x95   :  { %v561_v19 = vsel %vm349_vm0, %v4989_v18, %v469_v10  ;;  %v429_v25 = vsel %vm421_vm2, %v398_v20, %v321_v21  ;;  %v4779_v26 = vld [vmem:[%s6857_s4 + $0x30] sm:$0xff]   ;;  %v4990_v47 = vld [vmem:[%s6853_s0 + $0x18] sm:$0xff]   ;;  %v4992_v3 = vld [vmem:[%s6853_s0 + $0x20] sm:$0xff]   ;;  %s5024_s19 = smov 80   ;;  %vm1899_vm5 = vcmask 1014784   ;;  %vm1838_vm6 = vcmask 687104  }
  0x96   :  { %v600_v22 = vsel %vm392_vm1, %v561_v19, %v497_v14  ;;  %307 = vrot.lane.b32.xlu0 %v5432_v7, %s5018_s15  ;;  %880 = vmatmul.mubr.bf16.gmra.mxu0 %v429_v25  ;;  %v5483_v28 = vld [vmem:[%s6853_s0 + $0x70] sm:$0xff]   ;;  %v4991_v50 = vld [vmem:[%s6854_s1 + $0x18] sm:$0xff]   ;;  %v4993_v5 = vld [vmem:[%s6854_s1 + $0x20] sm:$0xff]   ;;  %vm2312_vm7 = vcmask 1041408   ;;  %vm2291_vm8 = vcmask 293888   ;;  %vm1930_vm9 = vcmask 654336  }
  0x97   :  { %v630_v27 = vsel %vm421_vm2, %v600_v22, %v525_v23  ;;  %516 = vrot.lane.b32.xlu1 %v5463_v17, %s5018_s15  ;;  %4222 = vmatprep.mubr.msk.bf16.mxu0 %vm349_vm0, %v5218_v24  ;;  %v4782_v24 = vld [vmem:[%s6857_s4 + $0x20] sm:$0xff]   ;;  %v5505_v46 = vld [vmem:[%s6854_s1 + $0x70] sm:$0xff]   ;;  %v4783_v59 = vld [vmem:[%s6857_s4 + $0x18] sm:$0xff]   ;;  %vm5026_vm10 = vmmov 0  }
  0x98   :  { %1139 = vmatmul.mubr.bf16.gmra.mxu1 %v630_v27  ;;  %v257_v30 = vpop.permute.xlu0 %256  ;;  %v471_v42 = vpop.permute.xlu1 %470  ;;  %1589 = vmatpush1.bf16.msra.mxu0 %v4779_v26  ;;  %v5532_v60 = vld [vmem:[%s6853_s0 + $0x78] sm:$0xff]   ;;  %v4784_v0 = vld [vmem:[%s6857_s4 + $0x10] sm:$0xff]   ;;  %v4785_v10 = vld [vmem:[%s6857_s4 + $0x8] sm:$0xff]  }
  0x99   :  { %4236 = vmatprep.mubr.msk.bf16.mxu1 %vm349_vm0, %v5241_v29  ;;  %1590 = vmatprep.subr.bf16.mxu0 %v5020_v13  ;;  %v361_v49 = vsel %vm349_vm0, %v4990_v47, %v257_v30  ;;  %v564_v51 = vsel %vm349_vm0, %v4991_v50, %v471_v42  ;;  %v4994_v21 = vld [vmem:[%s6853_s0 + $0x28] sm:$0xff]   ;;  %v4787_v50 = vld [vmem:[%s6857_s4 + $0x50] ss:$0 sps:$4 sm:$0xff]   ;;  %s5021_s0 = smov 84  }
  0x9a   :  { %340 = vrot.lane.b32.xlu0 %v5463_v17, %s5019_s20 }
  0x9b   :  { %544 = vrot.lane.b32.xlu1 %v5483_v28, %s5019_s20 }
  0x9c   :  { %v290_v44 = vpop.permute.xlu0 %289  ;;  %v499_v45 = vpop.permute.xlu1 %498  ;;  %1591 = vmatpush1.bf16.msra.mxu0 %v4781_v43 }
  0x9d   :  { %1592 = vmatprep.subr.bf16.mxu0 %v5020_v13  ;;  %v400_v52 = vsel %vm392_vm1, %v361_v49, %v290_v44  ;;  %v602_v54 = vsel %vm392_vm1, %v564_v51, %v499_v45 }
  0x9e   :  { %276 = vrot.lane.b32.xlu0 %v5463_v17, %s5017_s29 }
  0x9f   :  { %309 = vrot.lane.b32.xlu1 %v5483_v28, %s5018_s15 }
  0xa0   :  { %v323_v53 = vpop.permute.xlu0 %322  ;;  %v527_v56 = vpop.permute.xlu1 %526  ;;  %1593 = vmatpush1.bf16.msra.mxu0 %v4782_v24  ;;  %v4786_v24 = vld [vmem:[%s6857_s4] sm:$0xff]  }
  0xa1   :  { %v432_v57 = vsel %vm421_vm2, %v400_v52, %v323_v53  ;;  %v633_v58 = vsel %vm421_vm2, %v602_v54, %v527_v56  ;;  %1594 = vmatprep.subr.bf16.mxu0 %v5020_v13 }
  0xa2   :  { %890 = vmatmul.mubr.bf16.gmra.mxu0 %v432_v57  ;;  %342 = vrot.lane.b32.xlu0 %v5505_v46, %s5019_s20 }
  0xa3   :  { %1149 = vmatmul.mubr.bf16.gmra.mxu1 %v633_v58  ;;  %490 = vrot.lane.b32.xlu1 %v5483_v28, %s5017_s29  ;;  %v1584_v58 = vsel %vm1582_vm3, %v4787_v50, 0  ;;  %s5022_s29 = smov 40  }
  0xa4   :  { %v259_v62 = vpop.permute.xlu0 %258  ;;  %4223 = vmatprep.mubr.msk.bf16.mxu0 %vm349_vm0, %v5253_v31  ;;  %4237 = vmatprep.mubr.msk.bf16.mxu1 %vm349_vm0, %v5266_v32  ;;  %v473_v63 = vpop.permute.xlu1 %472 }
  0xa5   :  { %1595 = vmatpush1.bf16.msra.mxu0 %v4783_v59  ;;  %v364_v4 = vsel %vm349_vm0, %v4992_v3, %v259_v62  ;;  %v567_v6 = vsel %vm349_vm0, %v4993_v5, %v473_v63 }
  0xa6   :  { %518 = vrot.lane.b32.xlu0 %v5505_v46, %s5018_s15  ;;  %1596 = vmatprep.subr.bf16.mxu0 %v5020_v13 }
  0xa7   :  { %546 = vrot.lane.b32.xlu1 %v5532_v60, %s5019_s20 }
  0xa8   :  { %v292_v1 = vpop.permute.xlu0 %291  ;;  %v501_v2 = vpop.permute.xlu1 %500 }
  0xa9   :  { %1597 = vmatpush1.bf16.msra.mxu0 %v4784_v0  ;;  %v402_v8 = vsel %vm392_vm1, %v364_v4, %v292_v1  ;;  %v604_v11 = vsel %vm392_vm1, %v567_v6, %v501_v2  ;;  %v4789_v0 = vld [vmem:[%s6857_s4 + $0x40] sm:$0xff]  }
  0xaa   :  { %1598 = vmatprep.subr.bf16.mxu0 %v5020_v13 }
  0xac   :  { %v325_v9 = vpop.permute.xlu0 %324  ;;  %v529_v12 = vpop.permute.xlu1 %528 }
  0xad   :  { %v435_v14 = vsel %vm421_vm2, %v402_v8, %v325_v9  ;;  %v636_v15 = vsel %vm421_vm2, %v604_v11, %v529_v12  ;;  %1599 = vmatpush1.bf16.msra.mxu0 %v4785_v10 }
  0xae   :  { %900 = vmatmul.mubr.bf16.gmra.mxu0 %v435_v14  ;;  %1159 = vmatmul.mubr.bf16.gmra.mxu1 %v636_v15 }
  0xaf   :  { %4224 = vmatprep.mubr.msk.bf16.mxu0 %vm349_vm0, %v5275_v33  ;;  %4238 = vmatprep.mubr.msk.bf16.mxu1 %vm349_vm0, %v5288_v34 }
  0xb0   :  { %v261_v16 = vpop.permute.xlu0 %260  ;;  %v475_v18 = vpop.permute.xlu1 %474  ;;  %1600 = vmatprep.subr.bf16.mxu0 %v5020_v13 }
  0xb1   :  { %v367_v22 = vsel %vm349_vm0, %v4994_v21, %v261_v16  ;;  %v570_v23 = vsel %vm349_vm0, %v5241_v29, %v475_v18  ;;  %1601 = vmatpush1.bf16.msra.mxu0 %v4786_v24 }
  0xb2   :  { %1612 = vmatprep.subr.bf16.mxu0 %v5020_v13 }
  0xb4   :  { %v294_v19 = vpop.permute.xlu0 %293  ;;  %v503_v20 = vpop.permute.xlu1 %502 }
  0xb5   :  { %v404_v25 = vsel %vm392_vm1, %v367_v22, %v294_v19  ;;  %v606_v27 = vsel %vm392_vm1, %v570_v23, %v503_v20  ;;  %1613 = vmatpush2.bf16.msra.mxu0 %v1584_v58 }
  0xb6   :  { %1614 = vmatprep.subr.bf16.mxu0 %v5020_v13 }
  0xb8   :  { %v327_v26 = vpop.permute.xlu0 %326  ;;  %v531_v30 = vpop.permute.xlu1 %530 }
  0xb9   :  { %v438_v42 = vsel %vm421_vm2, %v404_v25, %v327_v26  ;;  %v639_v43 = vsel %vm421_vm2, %v606_v27, %v531_v30 }
  0xba   :  { %910 = vmatmul.mubr.bf16.gmra.mxu0 %v438_v42  ;;  %1169 = vmatmul.mubr.bf16.gmra.mxu1 %v639_v43 }
  0xbb   :  { %4225 = vmatprep.mubr.msk.bf16.mxu0 %vm349_vm0, %v5297_v35  ;;  %4239 = vmatprep.mubr.msk.bf16.mxu1 %vm349_vm0, %v5310_v36 }
  0xbc   :  { %v263_v44 = vpop.permute.xlu0 %262  ;;  %v477_v29 = vpop.permute.xlu1 %476 }
  0xbd   :  { %v370_v49 = vsel %vm349_vm0, %v5253_v31, %v263_v44  ;;  %v573_v51 = vsel %vm349_vm0, %v5266_v32, %v477_v29  ;;  %v4788_v32 = vld [vmem:[%s6857_s4 + $0x48] sm:$0xff]  }
  0xbe   :  { %1615 = vmatpush2.bf16.msra.mxu0 %v4788_v32 }
  0xbf   :  { %1616 = vmatprep.subr.bf16.mxu0 %v5020_v13 }
  0xc0   :  { %v296_v45 = vpop.permute.xlu0 %295  ;;  %v505_v47 = vpop.permute.xlu1 %504 }
  0xc1   :  { %v406_v52 = vsel %vm392_vm1, %v370_v49, %v296_v45  ;;  %v608_v54 = vsel %vm392_vm1, %v573_v51, %v505_v47 }
  0xc2   :  { %1617 = vmatpush2.bf16.msra.mxu0 %v4789_v0 }
  0xc3   :  { %2749 = vmatprep.subr.bf16.mxu0 %v5020_v13 }
  0xc4   :  { %v329_v53 = vpop.permute.xlu0 %328  ;;  %v533_v56 = vpop.permute.xlu1 %532 }
  0xc5   :  { %v441_v57 = vsel %vm421_vm2, %v406_v52, %v329_v53  ;;  %v642_v31 = vsel %vm421_vm2, %v608_v54, %v533_v56 }
  0xc6   :  { %920 = vmatmul.mubr.bf16.gmra.mxu0 %v441_v57  ;;  %1179 = vmatmul.mubr.bf16.gmra.mxu1 %v642_v31 }
  0xc7   :  { %4226 = vmatprep.mubr.msk.bf16.mxu0 %vm349_vm0, %v5319_v37  ;;  %4240 = vmatprep.mubr.msk.bf16.mxu1 %vm349_vm0, %v5332_v38 }
  0xc8   :  { %v265_v59 = vpop.permute.xlu0 %264  ;;  %v479_v62 = vpop.permute.xlu1 %478 }
  0xc9   :  { %v373_v2 = vsel %vm349_vm0, %v5275_v33, %v265_v59  ;;  %v576_v3 = vsel %vm349_vm0, %v5288_v34, %v479_v62 }
  0xcc   :  { %v298_v63 = vpop.permute.xlu0 %297  ;;  %v507_v1 = vpop.permute.xlu1 %506 }
  0xcd   :  { %v408_v4 = vsel %vm392_vm1, %v373_v2, %v298_v63  ;;  %v610_v6 = vsel %vm392_vm1, %v576_v3, %v507_v1 }
  0xd0   :  { %v331_v5 = vpop.permute.xlu0 %330  ;;  %v535_v8 = vpop.permute.xlu1 %534 }
  0xd1   :  { %v444_v9 = vsel %vm421_vm2, %v408_v4, %v331_v5  ;;  %v645_v10 = vsel %vm421_vm2, %v610_v6, %v535_v8 }
  0xd2   :  { %930 = vmatmul.mubr.bf16.gmra.mxu0 %v444_v9  ;;  %1189 = vmatmul.mubr.bf16.gmra.mxu1 %v645_v10 }
  0xd3   :  { %4227 = vmatprep.mubr.msk.bf16.mxu0 %vm349_vm0, %v5341_v39  ;;  %4241 = vmatprep.mubr.msk.bf16.mxu1 %vm349_vm0, %v5354_v40 }
  0xd4   :  { %v267_v33 = vpop.permute.xlu0 %266  ;;  %v481_v34 = vpop.permute.xlu1 %480 }
  0xd5   :  { %v376_v14 = vsel %vm349_vm0, %v5297_v35, %v267_v33  ;;  %v579_v15 = vsel %vm349_vm0, %v5310_v36, %v481_v34 }
  0xd8   :  { %v300_v11 = vpop.permute.xlu0 %299  ;;  %v509_v12 = vpop.permute.xlu1 %508 }
  0xd9   :  { %v410_v16 = vsel %vm392_vm1, %v376_v14, %v300_v11  ;;  %v612_v19 = vsel %vm392_vm1, %v579_v15, %v509_v12 }
  0xdc   :  { %v333_v18 = vpop.permute.xlu0 %332  ;;  %v537_v20 = vpop.permute.xlu1 %536 }
  0xdd   :  { %v447_v21 = vsel %vm421_vm2, %v410_v16, %v333_v18  ;;  %v648_v22 = vsel %vm421_vm2, %v612_v19, %v537_v20 }
  0xde   :  { %940 = vmatmul.mubr.bf16.gmra.mxu0 %v447_v21  ;;  %1199 = vmatmul.mubr.bf16.gmra.mxu1 %v648_v22 }
  0xdf   :  { %4228 = vmatprep.mubr.msk.bf16.mxu0 %vm349_vm0, %v5363_v41  ;;  %4242 = vmatprep.mubr.msk.bf16.mxu1 %vm349_vm0, %v5380_v48 }
  0xe0   :  { %v269_v23 = vpop.permute.xlu0 %268  ;;  %v483_v35 = vpop.permute.xlu1 %482 }
  0xe1   :  { %v379_v26 = vsel %vm349_vm0, %v5319_v37, %v269_v23  ;;  %v582_v27 = vsel %vm349_vm0, %v5332_v38, %v483_v35  ;;  %v687_v23 = vlaneseq }
  0xe4   :  { %v302_v36 = vpop.permute.xlu0 %301  ;;  %v511_v25 = vpop.permute.xlu1 %510 }
  0xe5   :  { %v412_v30 = vsel %vm392_vm1, %v379_v26, %v302_v36  ;;  %v614_v43 = vsel %vm392_vm1, %v582_v27, %v511_v25  ;;  %v685_v25 = vld [vmem:[%s6856_s3] sm:$0x3]  ;;  %s5023_s3 = smov 124  }
  0xe8   :  { %v335_v42 = vpop.permute.xlu0 %334  ;;  %v539_v44 = vpop.permute.xlu1 %538 }
  0xe9   :  { %v450_v29 = vsel %vm421_vm2, %v412_v30, %v335_v42  ;;  %v651_v45 = vsel %vm421_vm2, %v614_v43, %v539_v44 }
  0xea   :  { %950 = vmatmul.mubr.bf16.gmra.mxu0 %v450_v29  ;;  %1209 = vmatmul.mubr.bf16.gmra.mxu1 %v651_v45 }
  0xeb   :  { %4229 = vmatprep.mubr.msk.bf16.mxu0 %vm349_vm0, %v5394_v55  ;;  %4243 = vmatprep.mubr.msk.bf16.mxu1 %vm349_vm0, %v5412_v61 }
  0xec   :  { %v271_v24 = vpop.permute.xlu0 %270  ;;  %v485_v37 = vpop.permute.xlu1 %484 }
  0xed   :  { %v382_v49 = vsel %vm349_vm0, %v5341_v39, %v271_v24  ;;  %v585_v50 = vsel %vm349_vm0, %v5354_v40, %v485_v37 }
  0xf0   :  { %v304_v38 = vpop.permute.xlu0 %303 }
  0xf1   :  { %v513_v47 = vpop.permute.xlu1 %512  ;;  %v414_v51 = vsel %vm392_vm1, %v382_v49, %v304_v38 }
  0xf2   :  { %v616_v53 = vsel %vm392_vm1, %v585_v50, %v513_v47 }
  0xf4   :  { %v337_v52 = vpop.permute.xlu0 %336 }
  0xf5   :  { %v541_v54 = vpop.permute.xlu1 %540  ;;  %v453_v56 = vsel %vm421_vm2, %v414_v51, %v337_v52 }
  0xf6   :  { %960 = vmatmul.mubr.bf16.gmra.mxu0 %v453_v56  ;;  %v654_v57 = vsel %vm421_vm2, %v616_v53, %v541_v54 }
  0xf7   :  { %1219 = vmatmul.mubr.bf16.gmra.mxu1 %v654_v57  ;;  %4230 = vmatprep.mubr.msk.bf16.mxu0 %vm349_vm0, %v5432_v7 }
  0xf8   :  { %v273_v58 = vpop.permute.xlu0 %272  ;;  %4244 = vmatprep.mubr.msk.bf16.mxu1 %vm349_vm0, %v5463_v17 }
  0xf9   :  { %v487_v39 = vpop.permute.xlu1 %486  ;;  %v385_v59 = vsel %vm349_vm0, %v5363_v41, %v273_v58 }
  0xfa   :  { %v588_v32 = vsel %vm349_vm0, %v5380_v48, %v487_v39 }
  0xfc   :  { %v306_v40 = vpop.permute.xlu0 %305 }
  0xfd   :  { %v515_v31 = vpop.permute.xlu1 %514  ;;  %v416_v62 = vsel %vm392_vm1, %v385_v59, %v306_v40 }
  0xfe   :  { %v618_v0 = vsel %vm392_vm1, %v588_v32, %v515_v31 }
 0x100   :  { %v339_v63 = vpop.permute.xlu0 %338 }
 0x101   :  { %v543_v1 = vpop.permute.xlu1 %542  ;;  %v456_v2 = vsel %vm421_vm2, %v416_v62, %v339_v63 }
 0x102   :  { %970 = vmatmul.mubr.bf16.gmra.mxu0 %v456_v2  ;;  %v657_v3 = vsel %vm421_vm2, %v618_v0, %v543_v1 }
 0x103   :  { %1229 = vmatmul.mubr.bf16.gmra.mxu1 %v657_v3  ;;  %4231 = vmatprep.mubr.msk.bf16.mxu0 %vm349_vm0, %v5483_v28  ;;  %v4780_v28 = vld [vmem:[%s6854_s1 + $0x78] sm:$0xff]  }
 0x104   :  { %v275_v4 = vpop.permute.xlu0 %274  ;;  %4245 = vmatprep.mubr.msk.bf16.mxu1 %vm349_vm0, %v5505_v46 }
 0x105   :  { %v489_v41 = vpop.permute.xlu1 %488  ;;  %v388_v6 = vsel %vm349_vm0, %v5394_v55, %v275_v4 }
 0x106   :  { %v591_v8 = vsel %vm349_vm0, %v5412_v61, %v489_v41 }
 0x108   :  { %v308_v48 = vpop.permute.xlu0 %307 }
 0x109   :  { %v517_v5 = vpop.permute.xlu1 %516  ;;  %v418_v9 = vsel %vm392_vm1, %v388_v6, %v308_v48 }
 0x10a   :  { %v620_v33 = vsel %vm392_vm1, %v591_v8, %v517_v5 }
 0x10c   :  { %v341_v10 = vpop.permute.xlu0 %340 }
 0x10d   :  { %v545_v34 = vpop.permute.xlu1 %544  ;;  %v459_v46 = vsel %vm421_vm2, %v418_v9, %v341_v10 }
 0x10e   :  { %980 = vmatmul.mubr.bf16.gmra.mxu0 %v459_v46  ;;  %v660_v11 = vsel %vm421_vm2, %v620_v33, %v545_v34 }
 0x10f   :  { %1239 = vmatmul.mubr.bf16.gmra.mxu1 %v660_v11  ;;  %4232 = vmatprep.mubr.msk.bf16.mxu0 %vm349_vm0, %v5532_v60 }
 0x110   :  { %v277_v55 = vpop.permute.xlu0 %276  ;;  %4246 = vmatprep.mubr.msk.bf16.mxu1 %vm349_vm0, %v4780_v28 }
 0x111   :  { %v391_v61 = vsel %vm349_vm0, %v5432_v7, %v277_v55  ;;  %v310_v12 = vpop.permute.xlu1 %309  ;;  %v5692_v7 = vshrl.u32 %v687_v23, 7 }
 0x112   :  { %v420_v14 = vsel %vm392_vm1, %v391_v61, %v310_v12 }
 0x113   :  { %v689_v35 = vsub.s32 0, %v5692_v7  ;;  %v693_v36 = vsub.s32 1, %v5692_v7 }
 0x114   :  { %v343_v15 = vpop.permute.xlu0 %342 }
 0x115   :  { %v491_v16 = vpop.permute.xlu1 %490  ;;  %v462_v18 = vsel %vm421_vm2, %v420_v14, %v343_v15  ;;  %v5705_v26 = vrot.slane %v685_v25, %v693_v36 }
 0x116   :  { %v594_v19 = vsel %vm349_vm0, %v5463_v17, %v491_v16  ;;  %990 = vmatmul.mubr.bf16.gmra.mxu0 %v462_v18  ;;  %v5701_v17 = vrot.slane %v685_v25, %v689_v35 }
 0x118   :  { %v519_v20 = vpop.permute.xlu0 %518 }
 0x119   :  { %v622_v60 = vsel %vm392_vm1, %v594_v19, %v519_v20  ;;  %v547_v21 = vpop.permute.xlu1 %546 }
 0x11a   :  { %v663_v22 = vsel %vm421_vm2, %v622_v60, %v547_v21 }
 0x11b   :  { %1249 = vmatmul.mubr.bf16.gmra.mxu1 %v663_v22 }
 0x13e   :  { %v861_v27 = vpop.f32.mrf.mxu0 }
 0x13f   :  { %v1120_v30 = vpop.f32.mrf.mxu1  ;;  %v862_v43 = vadd.f32 %v861_v27, %v5701_v17 }
 0x140   :  { %v863_v42 = vpop.f32.mrf.mxu0  ;;  %v1121_v44 = vadd.f32 %v1120_v30, %v5701_v17 }
 0x141   :  { %v864_v29 = vadd.f32 %v863_v42, %v5705_v26  ;;  %v1122_v45 = vpop.f32.mrf.mxu1  ;;  %v1000_v53 = vmax.f32 %v862_v43, 0.0 }
 0x142   :  { %v1123_v24 = vadd.f32 %v1122_v45, %v5705_v26  ;;  %v865_v37 = vpop.f32.mrf.mxu0  ;;  %v1259_v54 = vmax.f32 %v1121_v44, 0.0 }
 0x143   :  { %v866_v38 = vadd.f32 %v865_v37, %v5701_v17  ;;  %v1124_v47 = vpop.f32.mrf.mxu1  ;;  %v1001_v49 = vmax.f32 %v864_v29, 0.0 }
 0x144   :  { %v1260_v50 = vmax.f32 %v1123_v24, 0.0  ;;  %v1125_v51 = vadd.f32 %v1124_v47, %v5701_v17  ;;  %v867_v52 = vpop.f32.mrf.mxu0  ;;  %v1315_v63 = vadd.f32 %v1259_v54, %v1000_v53 }
 0x145   :  { %v1002_v56 = vmax.f32 %v866_v38, 0.0  ;;  %v868_v57 = vadd.f32 %v867_v52, %v5705_v26  ;;  %v1126_v58 = vpop.f32.mrf.mxu1 }
 0x146   :  { %v1261_v39 = vmax.f32 %v1125_v51, 0.0  ;;  %v1127_v40 = vadd.f32 %v1126_v58, %v5705_v26  ;;  %v1316_v59 = vadd.f32 %v1260_v50, %v1001_v49  ;;  %v1371_v5 = vmul.f32 0.5, %v1315_v63 }
 0x147   :  { %v1003_v31 = vmax.f32 %v868_v57, 0.0 }
 0x148   :  { %v1317_v32 = vadd.f32 %v1261_v39, %v1002_v56  ;;  %v1262_v62 = vmax.f32 %v1127_v40, 0.0  ;;  %v1372_v4 = vmul.f32 0.5, %v1316_v59 }
 0x14a   :  { %v1318_v0 = vadd.f32 %v1262_v62, %v1003_v31  ;;  %v871_v1 = vpop.f32.mrf.mxu0  ;;  %v1373_v2 = vmul.f32 0.5, %v1317_v32 }
 0x14b   :  { %v1130_v3 = vpop.f32.mrf.mxu1  ;;  %v872_v6 = vadd.f32 %v871_v1, %v5701_v17 }
 0x14c   :  { %v1374_v41 = vmul.f32 0.5, %v1318_v0  ;;  %v873_v48 = vpop.f32.mrf.mxu0  ;;  %v1131_v8 = vadd.f32 %v1130_v3, %v5701_v17  ;;  %v1427_v46 = vpack.c.bf16 %v1373_v2, %v1371_v5 }
 0x14d   :  { %v874_v9 = vadd.f32 %v873_v48, %v5705_v26  ;;  %v1132_v10 = vpop.f32.mrf.mxu1  ;;  %v1004_v16 = vmax.f32 %v872_v6, 0.0 }
 0x14e   :  { %v1428_v28 = vpack.c.bf16 %v1374_v41, %v1372_v4  ;;  %v1133_v33 = vadd.f32 %v1132_v10, %v5705_v26  ;;  %v875_v34 = vpop.f32.mrf.mxu0  ;;  %v1263_v18 = vmax.f32 %v1131_v8, 0.0 }
 0x14f   :  { %v876_v11 = vadd.f32 %v875_v34, %v5701_v17  ;;  %v1134_v55 = vpop.f32.mrf.mxu1  ;;  %v1005_v61 = vmax.f32 %v874_v9, 0.0 }
 0x150   :  { %v1264_v12 = vmax.f32 %v1133_v33, 0.0  ;;  %v1135_v14 = vadd.f32 %v1134_v55, %v5701_v17  ;;  %4258 = vmatprep.mubr.msk.bf16.mxu0 %vm1539_vm4, %v1428_v28  ;;  %v877_v15 = vpop.f32.mrf.mxu0  ;;  %v1319_v42 = vadd.f32 %v1263_v18, %v1004_v16 }
 0x151   :  { %v1006_v19 = vmax.f32 %v876_v11, 0.0  ;;  %v878_v20 = vadd.f32 %v877_v15, %v5705_v26  ;;  %v1136_v60 = vpop.f32.mrf.mxu1  ;;  %1619 = vmatmul.mubr.bf16.vlgmr.msra.gmra.mxu0 %v1427_v46 }
 0x152   :  { %v1265_v21 = vmax.f32 %v1135_v14, 0.0  ;;  %v1137_v22 = vadd.f32 %v1136_v60, %v5705_v26  ;;  %v1320_v25 = vadd.f32 %v1264_v12, %v1005_v61  ;;  %v1375_v47 = vmul.f32 0.5, %v1319_v42 }
 0x153   :  { %v1007_v23 = vmax.f32 %v878_v20, 0.0 }
 0x154   :  { %v1321_v27 = vadd.f32 %v1265_v21, %v1006_v19  ;;  %v1266_v30 = vmax.f32 %v1137_v22, 0.0  ;;  %v1376_v24 = vmul.f32 0.5, %v1320_v25 }
 0x156   :  { %v1322_v43 = vadd.f32 %v1266_v30, %v1007_v23  ;;  %v881_v44 = vpop.f32.mrf.mxu0  ;;  %v1377_v29 = vmul.f32 0.5, %v1321_v27 }
 0x157   :  { %v882_v49 = vadd.f32 %v881_v44, %v5701_v17 }
 0x158   :  { %v1140_v45 = vpop.f32.mrf.mxu1  ;;  %v1378_v37 = vmul.f32 0.5, %v1322_v43  ;;  %v883_v38 = vpop.f32.mrf.mxu0  ;;  %v1429_v39 = vpack.c.bf16 %v1377_v29, %v1375_v47 }
 0x159   :  { %v1141_v50 = vadd.f32 %v1140_v45, %v5701_v17  ;;  %v884_v51 = vadd.f32 %v883_v38, %v5705_v26  ;;  %v1008_v62 = vmax.f32 %v882_v49, 0.0 }
 0x15a   :  { %v1142_v52 = vpop.f32.mrf.mxu1  ;;  %v1430_v53 = vpack.c.bf16 %v1378_v37, %v1376_v24  ;;  %v885_v56 = vpop.f32.mrf.mxu0 }
 0x15b   :  { %v1143_v54 = vadd.f32 %v1142_v52, %v5705_v26  ;;  %v886_v57 = vadd.f32 %v885_v56, %v5701_v17  ;;  %v1009_v40 = vmax.f32 %v884_v51, 0.0  ;;  %v1267_v63 = vmax.f32 %v1141_v50, 0.0 }
 0x15c   :  { %v1144_v58 = vpop.f32.mrf.mxu1  ;;  %4259 = vmatprep.mubr.msk.bf16.mxu0 %vm1539_vm4, %v1430_v53  ;;  %v887_v32 = vpop.f32.mrf.mxu0 }
 0x15d   :  { %v1268_v31 = vmax.f32 %v1143_v54, 0.0  ;;  %v1145_v59 = vadd.f32 %v1144_v58, %v5701_v17  ;;  %v1010_v0 = vmax.f32 %v886_v57, 0.0  ;;  %v888_v1 = vadd.f32 %v887_v32, %v5705_v26  ;;  %1627 = vmatmul.mubr.bf16.gmra.mxu0 %v1429_v39 }
 0x15e   :  { %v1146_v2 = vpop.f32.mrf.mxu1  ;;  %v1323_v8 = vadd.f32 %v1267_v63, %v1008_v62 }
 0x15f   :  { %v1269_v3 = vmax.f32 %v1145_v59, 0.0  ;;  %v1147_v4 = vadd.f32 %v1146_v2, %v5705_v26  ;;  %v1011_v41 = vmax.f32 %v888_v1, 0.0  ;;  %v1324_v48 = vadd.f32 %v1268_v31, %v1009_v40 }
 0x160   :  { %v1379_v55 = vmul.f32 0.5, %v1323_v8 }
 0x161   :  { %v1325_v5 = vadd.f32 %v1269_v3, %v1010_v0  ;;  %v1270_v6 = vmax.f32 %v1147_v4, 0.0  ;;  %v1380_v34 = vmul.f32 0.5, %v1324_v48 }
 0x162   :  { %v891_v10 = vpop.f32.mrf.mxu0 }
 0x163   :  { %v1326_v9 = vadd.f32 %v1270_v6, %v1011_v41  ;;  %v1381_v28 = vmul.f32 0.5, %v1325_v5  ;;  %v1150_v33 = vpop.f32.mrf.mxu1  ;;  %v892_v61 = vadd.f32 %v891_v10, %v5701_v17 }
 0x164   :  { %v893_v11 = vpop.f32.mrf.mxu0  ;;  %v1151_v12 = vadd.f32 %v1150_v33, %v5701_v17 }
 0x165   :  { %v1382_v46 = vmul.f32 0.5, %v1326_v9  ;;  %v894_v14 = vadd.f32 %v893_v11, %v5705_v26  ;;  %v1152_v15 = vpop.f32.mrf.mxu1  ;;  %v1431_v21 = vpack.c.bf16 %v1381_v28, %v1379_v55  ;;  %v1012_v30 = vmax.f32 %v892_v61, 0.0 }
 0x166   :  { %v1153_v18 = vadd.f32 %v1152_v15, %v5705_v26  ;;  %v895_v19 = vpop.f32.mrf.mxu0  ;;  %v1271_v42 = vmax.f32 %v1151_v12, 0.0 }
 0x167   :  { %v1432_v16 = vpack.c.bf16 %v1382_v46, %v1380_v34  ;;  %v896_v20 = vadd.f32 %v895_v19, %v5701_v17  ;;  %v1154_v60 = vpop.f32.mrf.mxu1  ;;  %v1013_v22 = vmax.f32 %v894_v14, 0.0 }
 0x168   :  { %v1272_v23 = vmax.f32 %v1153_v18, 0.0  ;;  %v1155_v25 = vadd.f32 %v1154_v60, %v5701_v17  ;;  %v897_v27 = vpop.f32.mrf.mxu0  ;;  %v1327_v50 = vadd.f32 %v1271_v42, %v1012_v30 }
 0x169   :  { %4260 = vmatprep.mubr.msk.bf16.mxu0 %vm1539_vm4, %v1432_v16  ;;  %v1014_v43 = vmax.f32 %v896_v20, 0.0  ;;  %v898_v44 = vadd.f32 %v897_v27, %v5705_v26  ;;  %v1156_v29 = vpop.f32.mrf.mxu1 }
 0x16a   :  { %1635 = vmatmul.mubr.bf16.gmra.mxu0 %v1431_v21  ;;  %v1273_v45 = vmax.f32 %v1155_v25, 0.0  ;;  %v1157_v24 = vadd.f32 %v1156_v29, %v5705_v26  ;;  %v1328_v38 = vadd.f32 %v1272_v23, %v1013_v22  ;;  %v1383_v39 = vmul.f32 0.5, %v1327_v50 }
 0x16b   :  { %v1015_v37 = vmax.f32 %v898_v44, 0.0 }
 0x16c   :  { %v1329_v47 = vadd.f32 %v1273_v45, %v1014_v43  ;;  %v1274_v49 = vmax.f32 %v1157_v24, 0.0  ;;  %v1384_v56 = vmul.f32 0.5, %v1328_v38 }
 0x16e   :  { %v1330_v51 = vadd.f32 %v1274_v49, %v1015_v37  ;;  %v901_v52 = vpop.f32.mrf.mxu0  ;;  %v1385_v53 = vmul.f32 0.5, %v1329_v47  ;;  %v1160_v54 = vpop.f32.mrf.mxu1 }
 0x16f   :  { %v902_v40 = vadd.f32 %v901_v52, %v5701_v17  ;;  %v1161_v31 = vadd.f32 %v1160_v54, %v5701_v17 }
 0x170   :  { %v1386_v57 = vmul.f32 0.5, %v1330_v51  ;;  %v903_v58 = vpop.f32.mrf.mxu0  ;;  %v1162_v32 = vpop.f32.mrf.mxu1  ;;  %v1433_v3 = vpack.c.bf16 %v1385_v53, %v1383_v39 }
 0x171   :  { %v904_v59 = vadd.f32 %v903_v58, %v5705_v26  ;;  %v1163_v63 = vadd.f32 %v1162_v32, %v5705_v26  ;;  %v1016_v6 = vmax.f32 %v902_v40, 0.0  ;;  %v1275_v8 = vmax.f32 %v1161_v31, 0.0 }
 0x172   :  { %v1434_v62 = vpack.c.bf16 %v1386_v57, %v1384_v56  ;;  %v905_v0 = vpop.f32.mrf.mxu0  ;;  %v1164_v2 = vpop.f32.mrf.mxu1 }
 0x173   :  { %v906_v1 = vadd.f32 %v905_v0, %v5701_v17  ;;  %v1017_v4 = vmax.f32 %v904_v59, 0.0  ;;  %v1276_v41 = vmax.f32 %v1163_v63, 0.0  ;;  %v1165_v48 = vadd.f32 %v1164_v2, %v5701_v17 }
 0x174   :  { %4261 = vmatprep.mubr.msk.bf16.mxu0 %vm1539_vm4, %v1434_v62  ;;  %v907_v5 = vpop.f32.mrf.mxu0  ;;  %v1166_v28 = vpop.f32.mrf.mxu1  ;;  %v1331_v12 = vadd.f32 %v1275_v8, %v1016_v6 }
 0x175   :  { %v1018_v9 = vmax.f32 %v906_v1, 0.0  ;;  %v908_v10 = vadd.f32 %v907_v5, %v5705_v26  ;;  %1643 = vmatmul.mubr.bf16.gmra.mxu0 %v1433_v3  ;;  %v1277_v33 = vmax.f32 %v1165_v48, 0.0  ;;  %v1167_v34 = vadd.f32 %v1166_v28, %v5705_v26 }
 0x176   :  { %v1332_v11 = vadd.f32 %v1276_v41, %v1017_v4  ;;  %v1387_v21 = vmul.f32 0.5, %v1331_v12 }
 0x177   :  { %v1019_v46 = vmax.f32 %v908_v10, 0.0  ;;  %v1333_v55 = vadd.f32 %v1277_v33, %v1018_v9  ;;  %v1278_v61 = vmax.f32 %v1167_v34, 0.0 }
 0x178   :  { %v1388_v19 = vmul.f32 0.5, %v1332_v11 }
 0x179   :  { %v1334_v14 = vadd.f32 %v1278_v61, %v1019_v46  ;;  %v1389_v16 = vmul.f32 0.5, %v1333_v55 }
 0x17a   :  { %v911_v15 = vpop.f32.mrf.mxu0  ;;  %v1170_v18 = vpop.f32.mrf.mxu1 }
 0x17b   :  { %v1390_v20 = vmul.f32 0.5, %v1334_v14  ;;  %v912_v22 = vadd.f32 %v911_v15, %v5701_v17  ;;  %v1171_v23 = vadd.f32 %v1170_v18, %v5701_v17  ;;  %v1435_v45 = vpack.c.bf16 %v1389_v16, %v1387_v21 }
 0x17c   :  { %v913_v60 = vpop.f32.mrf.mxu0  ;;  %v1172_v27 = vpop.f32.mrf.mxu1 }
 0x17d   :  { %v914_v25 = vadd.f32 %v913_v60, %v5705_v26  ;;  %v1436_v30 = vpack.c.bf16 %v1390_v20, %v1388_v19  ;;  %v1173_v42 = vadd.f32 %v1172_v27, %v5705_v26  ;;  %v1020_v49 = vmax.f32 %v912_v22, 0.0 }
 0x17e   :  { %v915_v43 = vpop.f32.mrf.mxu0  ;;  %v1174_v29 = vpop.f32.mrf.mxu1  ;;  %v1279_v50 = vmax.f32 %v1171_v23, 0.0 }
 0x17f   :  { %v916_v44 = vadd.f32 %v915_v43, %v5701_v17  ;;  %v1021_v24 = vmax.f32 %v914_v25, 0.0  ;;  %v1280_v37 = vmax.f32 %v1173_v42, 0.0  ;;  %v1175_v38 = vadd.f32 %v1174_v29, %v5701_v17  ;;  %4262 = vmatprep.mubr.msk.bf16.mxu0 %vm1539_vm4, %v1436_v30 }
 0x180   :  { %v917_v47 = vpop.f32.mrf.mxu0  ;;  %v1176_v53 = vpop.f32.mrf.mxu1  ;;  %1651 = vmatmul.mubr.bf16.gmra.mxu0 %v1435_v45  ;;  %v1335_v31 = vadd.f32 %v1279_v50, %v1020_v49 }
 0x181   :  { %v1022_v51 = vmax.f32 %v916_v44, 0.0  ;;  %v918_v52 = vadd.f32 %v917_v47, %v5705_v26  ;;  %v1281_v54 = vmax.f32 %v1175_v38, 0.0  ;;  %v1177_v56 = vadd.f32 %v1176_v53, %v5705_v26 }
 0x182   :  { %v1336_v58 = vadd.f32 %v1280_v37, %v1021_v24  ;;  %v1391_v3 = vmul.f32 0.5, %v1335_v31 }
 0x183   :  { %v1023_v57 = vmax.f32 %v918_v52, 0.0  ;;  %v1337_v39 = vadd.f32 %v1281_v54, %v1022_v51  ;;  %v1282_v40 = vmax.f32 %v1177_v56, 0.0 }
 0x184   :  { %v1392_v0 = vmul.f32 0.5, %v1336_v58 }
 0x185   :  { %v1338_v59 = vadd.f32 %v1282_v40, %v1023_v57  ;;  %v1393_v62 = vmul.f32 0.5, %v1337_v39 }
 0x186   :  { %v921_v32 = vpop.f32.mrf.mxu0  ;;  %v1180_v63 = vpop.f32.mrf.mxu1 }
 0x187   :  { %v1394_v1 = vmul.f32 0.5, %v1338_v59  ;;  %v922_v4 = vadd.f32 %v921_v32, %v5701_v17  ;;  %v1181_v41 = vadd.f32 %v1180_v63, %v5701_v17  ;;  %v1437_v33 = vpack.c.bf16 %v1393_v62, %v1391_v3 }
 0x188   :  { %v923_v2 = vpop.f32.mrf.mxu0  ;;  %v1182_v5 = vpop.f32.mrf.mxu1 }
 0x189   :  { %v924_v48 = vadd.f32 %v923_v2, %v5705_v26  ;;  %v1438_v6 = vpack.c.bf16 %v1394_v1, %v1392_v0  ;;  %v1183_v8 = vadd.f32 %v1182_v5, %v5705_v26  ;;  %v1024_v61 = vmax.f32 %v922_v4, 0.0 }
 0x18a   :  { %v925_v9 = vpop.f32.mrf.mxu0  ;;  %v1184_v28 = vpop.f32.mrf.mxu1  ;;  %v1283_v12 = vmax.f32 %v1181_v41, 0.0 }
 0x18b   :  { %v926_v10 = vadd.f32 %v925_v9, %v5701_v17  ;;  %v1025_v34 = vmax.f32 %v924_v48, 0.0  ;;  %v1284_v46 = vmax.f32 %v1183_v8, 0.0  ;;  %v1185_v11 = vadd.f32 %v1184_v28, %v5701_v17  ;;  %4263 = vmatprep.mubr.msk.bf16.mxu0 %vm1539_vm4, %v1438_v6 }
 0x18c   :  { %v927_v55 = vpop.f32.mrf.mxu0  ;;  %v1186_v16 = vpop.f32.mrf.mxu1  ;;  %1659 = vmatmul.mubr.bf16.gmra.mxu0 %v1437_v33  ;;  %v1339_v23 = vadd.f32 %v1283_v12, %v1024_v61 }
 0x18d   :  { %v1026_v14 = vmax.f32 %v926_v10, 0.0  ;;  %v928_v15 = vadd.f32 %v927_v55, %v5705_v26  ;;  %v1285_v18 = vmax.f32 %v1185_v11, 0.0  ;;  %v1187_v19 = vadd.f32 %v1186_v16, %v5705_v26 }
 0x18e   :  { %v1340_v60 = vadd.f32 %v1284_v46, %v1025_v34  ;;  %v1395_v45 = vmul.f32 0.5, %v1339_v23 }
 0x18f   :  { %v1027_v20 = vmax.f32 %v928_v15, 0.0  ;;  %v1341_v21 = vadd.f32 %v1285_v18, %v1026_v14  ;;  %v1286_v22 = vmax.f32 %v1187_v19, 0.0 }
 0x190   :  { %v1396_v43 = vmul.f32 0.5, %v1340_v60 }
 0x191   :  { %v1342_v25 = vadd.f32 %v1286_v22, %v1027_v20  ;;  %v1397_v30 = vmul.f32 0.5, %v1341_v21 }
 0x192   :  { %v931_v27 = vpop.f32.mrf.mxu0  ;;  %v1190_v42 = vpop.f32.mrf.mxu1 }
 0x193   :  { %v1398_v44 = vmul.f32 0.5, %v1342_v25  ;;  %v932_v24 = vadd.f32 %v931_v27, %v5701_v17  ;;  %v1191_v37 = vadd.f32 %v1190_v42, %v5701_v17  ;;  %v1439_v54 = vpack.c.bf16 %v1397_v30, %v1395_v45 }
 0x194   :  { %v933_v29 = vpop.f32.mrf.mxu0  ;;  %v1192_v47 = vpop.f32.mrf.mxu1 }
 0x195   :  { %v934_v38 = vadd.f32 %v933_v29, %v5705_v26  ;;  %v1440_v49 = vpack.c.bf16 %v1398_v44, %v1396_v43  ;;  %v1193_v50 = vadd.f32 %v1192_v47, %v5705_v26  ;;  %v1028_v40 = vmax.f32 %v932_v24, 0.0 }
 0x196   :  { %v935_v51 = vpop.f32.mrf.mxu0  ;;  %v1194_v53 = vpop.f32.mrf.mxu1  ;;  %v1287_v31 = vmax.f32 %v1191_v37, 0.0 }
 0x197   :  { %v936_v52 = vadd.f32 %v935_v51, %v5701_v17  ;;  %v1029_v56 = vmax.f32 %v934_v38, 0.0  ;;  %v1288_v57 = vmax.f32 %v1193_v50, 0.0  ;;  %v1195_v58 = vadd.f32 %v1194_v53, %v5701_v17  ;;  %4264 = vmatprep.mubr.msk.bf16.mxu0 %vm1539_vm4, %v1440_v49 }
 0x198   :  { %v937_v39 = vpop.f32.mrf.mxu0  ;;  %v1196_v62 = vpop.f32.mrf.mxu1  ;;  %1667 = vmatmul.mubr.bf16.gmra.mxu0 %v1439_v54  ;;  %v1343_v41 = vadd.f32 %v1287_v31, %v1028_v40 }
 0x199   :  { %v1030_v59 = vmax.f32 %v936_v52, 0.0  ;;  %v938_v32 = vadd.f32 %v937_v39, %v5705_v26  ;;  %v1289_v63 = vmax.f32 %v1195_v58, 0.0  ;;  %v1197_v0 = vadd.f32 %v1196_v62, %v5705_v26 }
 0x19a   :  { %v1344_v2 = vadd.f32 %v1288_v57, %v1029_v56  ;;  %v1399_v33 = vmul.f32 0.5, %v1343_v41 }
 0x19b   :  { %v1031_v1 = vmax.f32 %v938_v32, 0.0  ;;  %v1345_v3 = vadd.f32 %v1289_v63, %v1030_v59  ;;  %v1290_v4 = vmax.f32 %v1197_v0, 0.0 }
 0x19c   :  { %v1400_v9 = vmul.f32 0.5, %v1344_v2 }
 0x19d   :  { %v1346_v48 = vadd.f32 %v1290_v4, %v1031_v1  ;;  %v1401_v6 = vmul.f32 0.5, %v1345_v3 }
 0x19e   :  { %v941_v5 = vpop.f32.mrf.mxu0  ;;  %v1200_v8 = vpop.f32.mrf.mxu1 }
 0x19f   :  { %v1402_v10 = vmul.f32 0.5, %v1346_v48  ;;  %v942_v34 = vadd.f32 %v941_v5, %v5701_v17  ;;  %v1201_v46 = vadd.f32 %v1200_v8, %v5701_v17  ;;  %v1441_v18 = vpack.c.bf16 %v1401_v6, %v1399_v33 }
 0x1a0   :  { %v943_v28 = vpop.f32.mrf.mxu0  ;;  %v1202_v55 = vpop.f32.mrf.mxu1 }
 0x1a1   :  { %v944_v11 = vadd.f32 %v943_v28, %v5705_v26  ;;  %v1442_v61 = vpack.c.bf16 %v1402_v10, %v1400_v9  ;;  %v1203_v12 = vadd.f32 %v1202_v55, %v5705_v26  ;;  %v1032_v22 = vmax.f32 %v942_v34, 0.0 }
 0x1a2   :  { %v945_v14 = vpop.f32.mrf.mxu0  ;;  %v1204_v16 = vpop.f32.mrf.mxu1  ;;  %v1291_v23 = vmax.f32 %v1201_v46, 0.0 }
 0x1a3   :  { %v946_v15 = vadd.f32 %v945_v14, %v5701_v17  ;;  %v1033_v19 = vmax.f32 %v944_v11, 0.0  ;;  %v1292_v20 = vmax.f32 %v1203_v12, 0.0  ;;  %v1205_v60 = vadd.f32 %v1204_v16, %v5701_v17  ;;  %4265 = vmatprep.mubr.msk.bf16.mxu0 %vm1539_vm4, %v1442_v61 }
 0x1a4   :  { %v947_v21 = vpop.f32.mrf.mxu0  ;;  %v1206_v30 = vpop.f32.mrf.mxu1  ;;  %1675 = vmatmul.mubr.bf16.gmra.mxu0 %v1441_v18  ;;  %v1347_v37 = vadd.f32 %v1291_v23, %v1032_v22 }
 0x1a5   :  { %v1034_v25 = vmax.f32 %v946_v15, 0.0  ;;  %v948_v27 = vadd.f32 %v947_v21, %v5705_v26  ;;  %v1293_v42 = vmax.f32 %v1205_v60, 0.0  ;;  %v1207_v43 = vadd.f32 %v1206_v30, %v5705_v26 }
 0x1a6   :  { %v1348_v29 = vadd.f32 %v1292_v20, %v1033_v19  ;;  %v1403_v54 = vmul.f32 0.5, %v1347_v37 }
 0x1a7   :  { %v1035_v44 = vmax.f32 %v948_v27, 0.0  ;;  %v1349_v45 = vadd.f32 %v1293_v42, %v1034_v25  ;;  %v1294_v24 = vmax.f32 %v1207_v43, 0.0 }
 0x1a8   :  { %v1404_v51 = vmul.f32 0.5, %v1348_v29 }
 0x1a9   :  { %v1350_v38 = vadd.f32 %v1294_v24, %v1035_v44  ;;  %v1405_v49 = vmul.f32 0.5, %v1349_v45 }
 0x1aa   :  { %v951_v47 = vpop.f32.mrf.mxu0  ;;  %v1210_v50 = vpop.f32.mrf.mxu1 }
 0x1ab   :  { %v1406_v52 = vmul.f32 0.5, %v1350_v38  ;;  %v952_v56 = vadd.f32 %v951_v47, %v5701_v17  ;;  %v1211_v57 = vadd.f32 %v1210_v50, %v5701_v17  ;;  %v1443_v63 = vpack.c.bf16 %v1405_v49, %v1403_v54 }
 0x1ac   :  { %v953_v53 = vpop.f32.mrf.mxu0  ;;  %v1212_v39 = vpop.f32.mrf.mxu1 }
 0x1ad   :  { %v954_v58 = vadd.f32 %v953_v53, %v5705_v26  ;;  %v1444_v40 = vpack.c.bf16 %v1406_v52, %v1404_v51  ;;  %v1213_v31 = vadd.f32 %v1212_v39, %v5705_v26  ;;  %v1036_v4 = vmax.f32 %v952_v56, 0.0 }
 0x1ae   :  { %v955_v59 = vpop.f32.mrf.mxu0  ;;  %v1214_v62 = vpop.f32.mrf.mxu1  ;;  %v1295_v41 = vmax.f32 %v1211_v57, 0.0 }
 0x1af   :  { %v956_v32 = vadd.f32 %v955_v59, %v5701_v17  ;;  %v1037_v0 = vmax.f32 %v954_v58, 0.0  ;;  %v1296_v1 = vmax.f32 %v1213_v31, 0.0  ;;  %v1215_v2 = vadd.f32 %v1214_v62, %v5701_v17  ;;  %4266 = vmatprep.mubr.msk.bf16.mxu0 %vm1539_vm4, %v1444_v40 }
 0x1b0   :  { %v957_v3 = vpop.f32.mrf.mxu0  ;;  %v1216_v6 = vpop.f32.mrf.mxu1  ;;  %1683 = vmatmul.mubr.bf16.gmra.mxu0 %v1443_v63  ;;  %v1351_v46 = vadd.f32 %v1295_v41, %v1036_v4 }
 0x1b1   :  { %v1038_v48 = vmax.f32 %v956_v32, 0.0  ;;  %v958_v5 = vadd.f32 %v957_v3, %v5705_v26  ;;  %v1297_v8 = vmax.f32 %v1215_v2, 0.0  ;;  %v1217_v9 = vadd.f32 %v1216_v6, %v5705_v26 }
 0x1b2   :  { %v1352_v28 = vadd.f32 %v1296_v1, %v1037_v0  ;;  %v1407_v18 = vmul.f32 0.5, %v1351_v46 }
 0x1b3   :  { %v1039_v10 = vmax.f32 %v958_v5, 0.0  ;;  %v1353_v33 = vadd.f32 %v1297_v8, %v1038_v48  ;;  %v1298_v34 = vmax.f32 %v1217_v9, 0.0 }
 0x1b4   :  { %v1408_v14 = vmul.f32 0.5, %v1352_v28 }
 0x1b5   :  { %v1354_v11 = vadd.f32 %v1298_v34, %v1039_v10  ;;  %v1409_v61 = vmul.f32 0.5, %v1353_v33 }
 0x1b6   :  { %v961_v55 = vpop.f32.mrf.mxu0 }
 0x1b7   :  { %v1220_v12 = vpop.f32.mrf.mxu1  ;;  %v1410_v15 = vmul.f32 0.5, %v1354_v11  ;;  %v962_v19 = vadd.f32 %v961_v55, %v5701_v17  ;;  %v1445_v42 = vpack.c.bf16 %v1409_v61, %v1407_v18 }
 0x1b8   :  { %v963_v16 = vpop.f32.mrf.mxu0  ;;  %v1221_v20 = vadd.f32 %v1220_v12, %v5701_v17 }
 0x1b9   :  { %v964_v60 = vadd.f32 %v963_v16, %v5705_v26  ;;  %v1222_v21 = vpop.f32.mrf.mxu1  ;;  %v1446_v22 = vpack.c.bf16 %v1410_v15, %v1408_v14  ;;  %v1040_v24 = vmax.f32 %v962_v19, 0.0 }
 0x1ba   :  { %v1223_v23 = vadd.f32 %v1222_v21, %v5705_v26  ;;  %v965_v25 = vpop.f32.mrf.mxu0  ;;  %v1299_v37 = vmax.f32 %v1221_v20, 0.0 }
 0x1bb   :  { %v966_v27 = vadd.f32 %v965_v25, %v5701_v17  ;;  %v1224_v30 = vpop.f32.mrf.mxu1  ;;  %v1041_v43 = vmax.f32 %v964_v60, 0.0  ;;  %4267 = vmatprep.mubr.msk.bf16.mxu0 %vm1539_vm4, %v1446_v22 }
 0x1bc   :  { %v1300_v44 = vmax.f32 %v1223_v23, 0.0  ;;  %v1225_v29 = vadd.f32 %v1224_v30, %v5701_v17  ;;  %v967_v45 = vpop.f32.mrf.mxu0  ;;  %1691 = vmatmul.mubr.bf16.gmra.mxu0 %v1445_v42  ;;  %v1355_v57 = vadd.f32 %v1299_v37, %v1040_v24 }
 0x1bd   :  { %v1042_v38 = vmax.f32 %v966_v27, 0.0  ;;  %v968_v47 = vadd.f32 %v967_v45, %v5705_v26  ;;  %v1226_v49 = vpop.f32.mrf.mxu1 }
 0x1be   :  { %v1301_v50 = vmax.f32 %v1225_v29, 0.0  ;;  %v1227_v51 = vadd.f32 %v1226_v49, %v5705_v26  ;;  %v1356_v53 = vadd.f32 %v1300_v44, %v1041_v43  ;;  %v1411_v63 = vmul.f32 0.5, %v1355_v57 }
 0x1bf   :  { %v1043_v52 = vmax.f32 %v968_v47, 0.0 }
 0x1c0   :  { %v1357_v54 = vadd.f32 %v1301_v50, %v1042_v38  ;;  %v1302_v56 = vmax.f32 %v1227_v51, 0.0  ;;  %v1412_v59 = vmul.f32 0.5, %v1356_v53 }
 0x1c2   :  { %v1358_v58 = vadd.f32 %v1302_v56, %v1043_v52  ;;  %v971_v39 = vpop.f32.mrf.mxu0  ;;  %v1413_v40 = vmul.f32 0.5, %v1357_v54 }
 0x1c3   :  { %v1230_v31 = vpop.f32.mrf.mxu1  ;;  %v972_v0 = vadd.f32 %v971_v39, %v5701_v17 }
 0x1c4   :  { %v1414_v32 = vmul.f32 0.5, %v1358_v58  ;;  %v973_v62 = vpop.f32.mrf.mxu0  ;;  %v1231_v1 = vadd.f32 %v1230_v31, %v5701_v17  ;;  %v1447_v8 = vpack.c.bf16 %v1413_v40, %v1411_v63 }
 0x1c5   :  { %v974_v2 = vadd.f32 %v973_v62, %v5705_v26  ;;  %v1232_v3 = vpop.f32.mrf.mxu1  ;;  %v1044_v34 = vmax.f32 %v972_v0, 0.0 }
 0x1c6   :  { %v1448_v4 = vpack.c.bf16 %v1414_v32, %v1412_v59  ;;  %v1233_v41 = vadd.f32 %v1232_v3, %v5705_v26  ;;  %v975_v48 = vpop.f32.mrf.mxu0  ;;  %v1303_v46 = vmax.f32 %v1231_v1, 0.0 }
 0x1c7   :  { %v976_v5 = vadd.f32 %v975_v48, %v5701_v17  ;;  %v1234_v6 = vpop.f32.mrf.mxu1  ;;  %v1045_v9 = vmax.f32 %v974_v2, 0.0 }
 0x1c8   :  { %v1304_v10 = vmax.f32 %v1233_v41, 0.0  ;;  %v1235_v28 = vadd.f32 %v1234_v6, %v5701_v17  ;;  %4268 = vmatprep.mubr.msk.bf16.mxu0 %vm1539_vm4, %v1448_v4  ;;  %v977_v33 = vpop.f32.mrf.mxu0  ;;  %v1359_v20 = vadd.f32 %v1303_v46, %v1044_v34 }
 0x1c9   :  { %v1046_v11 = vmax.f32 %v976_v5, 0.0  ;;  %v978_v55 = vadd.f32 %v977_v33, %v5705_v26  ;;  %v1236_v61 = vpop.f32.mrf.mxu1  ;;  %1699 = vmatmul.mubr.bf16.gmra.mxu0 %v1447_v8 }
 0x1ca   :  { %v1305_v12 = vmax.f32 %v1235_v28, 0.0  ;;  %v1237_v14 = vadd.f32 %v1236_v61, %v5705_v26  ;;  %v1360_v16 = vadd.f32 %v1304_v10, %v1045_v9  ;;  %v1415_v42 = vmul.f32 0.5, %v1359_v20 }
 0x1cb   :  { %v1047_v15 = vmax.f32 %v978_v55, 0.0 }
 0x1cc   :  { %v1361_v18 = vadd.f32 %v1305_v12, %v1046_v11  ;;  %v1306_v19 = vmax.f32 %v1237_v14, 0.0  ;;  %v1416_v25 = vmul.f32 0.5, %v1360_v16 }
 0x1ce   :  { %v1362_v60 = vadd.f32 %v1306_v19, %v1047_v15  ;;  %v981_v21 = vpop.f32.mrf.mxu0  ;;  %v1417_v22 = vmul.f32 0.5, %v1361_v18 }
 0x1cf   :  { %v1240_v23 = vpop.f32.mrf.mxu1  ;;  %v982_v43 = vadd.f32 %v981_v21, %v5701_v17 }
 0x1d0   :  { %v1418_v27 = vmul.f32 0.5, %v1362_v60  ;;  %v983_v30 = vpop.f32.mrf.mxu0  ;;  %v1241_v44 = vadd.f32 %v1240_v23, %v5701_v17  ;;  %v1449_v50 = vpack.c.bf16 %v1417_v22, %v1415_v42  ;;  %v4790_v22 = vld [vmem:[%s6858_s5 + $0x70] ss:$8 sps:$4 sm:$0xff]   ;;  %v4792_v23 = vld [vmem:[%s6858_s5 + $0x74] ss:$8 sps:$4 sm:$0xff]  }
 0x1d1   :  { %v984_v29 = vadd.f32 %v983_v30, %v5705_v26  ;;  %v1242_v45 = vpop.f32.mrf.mxu1  ;;  %v1048_v56 = vmax.f32 %v982_v43, 0.0  ;;  %2319 = vmatprep.subr.bf16.mxu1 %v4792_v23 }
 0x1d2   :  { %v1450_v24 = vpack.c.bf16 %v1418_v27, %v1416_v25  ;;  %v1243_v37 = vadd.f32 %v1242_v45, %v5705_v26  ;;  %v985_v38 = vpop.f32.mrf.mxu0  ;;  %v1307_v57 = vmax.f32 %v1241_v44, 0.0  ;;  %2320 = vmatpush1.bf16.msra.mxu1 %v4790_v22 }
 0x1d3   :  { %v986_v47 = vadd.f32 %v985_v38, %v5701_v17  ;;  %v1244_v49 = vpop.f32.mrf.mxu1  ;;  %v1049_v51 = vmax.f32 %v984_v29, 0.0 }
 0x1d4   :  { %v1308_v52 = vmax.f32 %v1243_v37, 0.0  ;;  %v1245_v53 = vadd.f32 %v1244_v49, %v5701_v17  ;;  %4269 = vmatprep.mubr.msk.bf16.mxu0 %vm1539_vm4, %v1450_v24  ;;  %v987_v54 = vpop.f32.mrf.mxu0  ;;  %v1363_v3 = vadd.f32 %v1307_v57, %v1048_v56  ;;  %v4801_v56 = vld [vmem:[%s6858_s5 + $0x44] ss:$8 sps:$4 sm:$0xff]   ;;  %v4802_v57 = vld [vmem:[%s6858_s5 + $0x30] ss:$8 sps:$4 sm:$0xff]  }
 0x1d5   :  { %v1050_v58 = vmax.f32 %v986_v47, 0.0  ;;  %v988_v39 = vadd.f32 %v987_v54, %v5705_v26  ;;  %v1246_v40 = vpop.f32.mrf.mxu1  ;;  %1707 = vmatmul.mubr.bf16.gmra.mxu0 %v1449_v50  ;;  %v4799_v54 = vld [vmem:[%s6858_s5 + $0x40] ss:$8 sps:$4 sm:$0xff]  }
 0x1d6   :  { %v1309_v31 = vmax.f32 %v1245_v53, 0.0  ;;  %v1247_v59 = vadd.f32 %v1246_v40, %v5705_v26  ;;  %v991_v32 = vpop.f32.mrf.mxu0  ;;  %v1364_v63 = vadd.f32 %v1308_v52, %v1049_v51  ;;  %v1419_v46 = vmul.f32 0.5, %v1363_v3  ;;  %v4793_v51 = vld [vmem:[%s6858_s5 + $0x60] ss:$8 sps:$4 sm:$0xff]   ;;  %v4795_v52 = vld [vmem:[%s6858_s5 + $0x64] ss:$8 sps:$4 sm:$0xff]  }
 0x1d7   :  { %v1051_v62 = vmax.f32 %v988_v39, 0.0  ;;  %v992_v4 = vadd.f32 %v991_v32, %v5701_v17  ;;  %2321 = vmatprep.subr.bf16.mxu1 %v4795_v52  ;;  %v4798_v53 = vld [vmem:[%s6858_s5 + $0x54] ss:$8 sps:$4 sm:$0xff]   ;;  %v4807_v39 = vld [vmem:[%s6858_s5 + $0x24] ss:$8 sps:$4 sm:$0xff]  }
 0x1d8   :  { %v1365_v0 = vadd.f32 %v1309_v31, %v1050_v58  ;;  %v1310_v1 = vmax.f32 %v1247_v59, 0.0  ;;  %v993_v2 = vpop.f32.mrf.mxu0  ;;  %v1420_v9 = vmul.f32 0.5, %v1364_v63  ;;  %2322 = vmatpush1.bf16.msra.mxu1 %v4793_v51  ;;  %v4804_v58 = vld [vmem:[%s6858_s5 + $0x34] ss:$8 sps:$4 sm:$0xff]   ;;  %v4805_v40 = vld [vmem:[%s6858_s5 + $0x20] ss:$8 sps:$4 sm:$0xff]  }
 0x1d9   :  { %v994_v41 = vadd.f32 %v993_v2, %v5705_v26  ;;  %v1052_v11 = vmax.f32 %v992_v4, 0.0  ;;  %2323 = vmatprep.subr.bf16.mxu1 %v4798_v53  ;;  %v4810_v31 = vld [vmem:[%s6858_s5 + $0x14] ss:$8 sps:$4 sm:$0xff]   ;;  %v4808_v59 = vld [vmem:[%s6858_s5 + $0x10] ss:$8 sps:$4 sm:$0xff]  }
 0x1da   :  { %v1366_v48 = vadd.f32 %v1310_v1, %v1051_v62  ;;  %v995_v5 = vpop.f32.mrf.mxu0  ;;  %v1421_v6 = vmul.f32 0.5, %v1365_v0  ;;  %v4813_v32 = vld [vmem:[%s6858_s5 + $0x4] ss:$8 sps:$4 sm:$0xff]   ;;  %v4811_v62 = vld [vmem:[%s6858_s5] ss:$8 sps:$4 sm:$0xff]  }
 0x1db   :  { %v1250_v8 = vpop.f32.mrf.mxu1  ;;  %v996_v33 = vadd.f32 %v995_v5, %v5701_v17  ;;  %v1053_v55 = vmax.f32 %v994_v41, 0.0  ;;  %v4816_v63 = vld [vmem:[%s6858_s5 + $0xf4] ss:$8 sps:$4 sm:$0xff]   ;;  %v4814_v0 = vld [vmem:[%s6858_s5 + $0xf0] ss:$8 sps:$4 sm:$0xff]  }
 0x1dc   :  { %v1422_v10 = vmul.f32 0.5, %v1366_v48  ;;  %v1251_v28 = vadd.f32 %v1250_v8, %v5701_v17  ;;  %v997_v34 = vpop.f32.mrf.mxu0  ;;  %v1451_v18 = vpack.c.bf16 %v1421_v6, %v1419_v46  ;;  %v4819_v3 = vld [vmem:[%s6858_s5 + $0xe4] ss:$8 sps:$4 sm:$0xff]   ;;  %v4817_v4 = vld [vmem:[%s6858_s5 + $0xe0] ss:$8 sps:$4 sm:$0xff]  }
 0x1dd   :  { %v1252_v61 = vpop.f32.mrf.mxu1  ;;  %v998_v16 = vadd.f32 %v997_v34, %v5705_v26  ;;  %v1054_v60 = vmax.f32 %v996_v33, 0.0  ;;  %v4822_v6 = vld [vmem:[%s6858_s5 + $0xd4] ss:$8 sps:$4 sm:$0xff]   ;;  %v4820_v8 = vld [vmem:[%s6858_s5 + $0xd0] ss:$8 sps:$4 sm:$0xff]  }
 0x1de   :  { %v1452_v12 = vpack.c.bf16 %v1422_v10, %v1420_v9  ;;  %v1311_v14 = vmax.f32 %v1251_v28, 0.0  ;;  %v1253_v15 = vadd.f32 %v1252_v61, %v5705_v26  ;;  %v4825_v9 = vld [vmem:[%s6858_s5 + $0xc4] ss:$8 sps:$4 sm:$0xff]   ;;  %v4823_v10 = vld [vmem:[%s6858_s5 + $0xc0] ss:$8 sps:$4 sm:$0xff]  }
 0x1df   :  { %v1254_v19 = vpop.f32.mrf.mxu1  ;;  %v1055_v43 = vmax.f32 %v998_v16, 0.0  ;;  %v4828_v34 = vld [vmem:[%s6858_s5 + $0xb4] ss:$8 sps:$4 sm:$0xff]   ;;  %v4826_v46 = vld [vmem:[%s6858_s5 + $0xb0] ss:$8 sps:$4 sm:$0xff]  }
 0x1e0   :  { %4270 = vmatprep.mubr.msk.bf16.mxu0 %vm1539_vm4, %v1452_v12  ;;  %v1312_v20 = vmax.f32 %v1253_v15, 0.0  ;;  %v1255_v21 = vadd.f32 %v1254_v19, %v5701_v17  ;;  %v1367_v25 = vadd.f32 %v1311_v14, %v1052_v11  ;;  %v4831_v12 = vld [vmem:[%s6858_s5 + $0xa4] ss:$8 sps:$4 sm:$0xff]   ;;  %v4829_v14 = vld [vmem:[%s6858_s5 + $0xa0] ss:$8 sps:$4 sm:$0xff]  }
 0x1e1   :  { %1715 = vmatmul.mubr.bf16.gmra.mxu0 %v1451_v18  ;;  %v1256_v27 = vpop.f32.mrf.mxu1  ;;  %v4834_v15 = vld [vmem:[%s6858_s5 + $0x94] ss:$8 sps:$4 sm:$0xff]   ;;  %v4832_v16 = vld [vmem:[%s6858_s5 + $0x90] ss:$8 sps:$4 sm:$0xff]  }
 0x1e2   :  { %v1368_v30 = vadd.f32 %v1312_v20, %v1053_v55  ;;  %v1313_v42 = vmax.f32 %v1255_v21, 0.0  ;;  %v1257_v44 = vadd.f32 %v1256_v27, %v5705_v26  ;;  %v1423_v45 = vmul.f32 0.5, %v1367_v25  ;;  %v4796_v26 = vld [vmem:[%s6858_s5 + $0x50] ss:$8 sps:$4 sm:$0xff]   ;;  %v4837_v20 = vld [vmem:[%s6858_s5 + $0x84] ss:$8 sps:$4 sm:$0xff]  }
 0x1e3   :  { %2324 = vmatpush1.bf16.msra.mxu1 %v4796_v26  ;;  %v4840_v51 = vld [vmem:[%s6858_s5 + $0x174] ss:$8 sps:$4 sm:$0xff]  }
 0x1e4   :  { %v1369_v29 = vadd.f32 %v1313_v42, %v1054_v60  ;;  %v1314_v17 = vmax.f32 %v1257_v44, 0.0  ;;  %v1424_v24 = vmul.f32 0.5, %v1368_v30  ;;  %2325 = vmatprep.subr.bf16.mxu1 %v4801_v56  ;;  %v4835_v60 = vld [vmem:[%s6858_s5 + $0x80] ss:$8 sps:$4 sm:$0xff]  }
 0x1e6   :  { %v1425_v37 = vmul.f32 0.5, %v1369_v29  ;;  %v1370_v38 = vadd.f32 %v1314_v17, %v1055_v43 }
 0x1e7   :  { %2326 = vmatpush1.bf16.msra.mxu1 %v4799_v54 }
 0x1e8   :  { %v1426_v47 = vmul.f32 0.5, %v1370_v38  ;;  %v1453_v49 = vpack.c.bf16 %v1425_v37, %v1423_v45  ;;  %2327 = vmatprep.subr.bf16.mxu1 %v4804_v58 }
 0x1ea   :  { %v1454_v50 = vpack.c.bf16 %v1426_v47, %v1424_v24 }
 0x1eb   :  { %2328 = vmatpush1.bf16.msra.mxu1 %v4802_v57 }
 0x1ec   :  { %4271 = vmatprep.mubr.msk.bf16.mxu0 %vm1539_vm4, %v1454_v50  ;;  %2329 = vmatprep.subr.bf16.mxu1 %v4807_v39 }
 0x1ed   :  { %1723 = vmatmul.mubr.bf16.gmra.mxu0 %v1453_v49 }
 0x1ef   :  { %2330 = vmatpush1.bf16.msra.mxu1 %v4805_v40 }
 0x1f0   :  { %2331 = vmatprep.subr.bf16.mxu1 %v4810_v31 }
 0x1f3   :  { %2332 = vmatpush1.bf16.msra.mxu1 %v4808_v59 }
 0x1f4   :  { %2333 = vmatprep.subr.bf16.mxu1 %v4813_v32 }
 0x1f7   :  { %2334 = vmatpush1.bf16.msra.mxu1 %v4811_v62 }
 0x1f8   :  { %2335 = vmatprep.subr.bf16.mxu1 %v4816_v63 }
 0x1fb   :  { %2336 = vmatpush2.bf16.msra.mxu1 %v4814_v0 }
 0x1fc   :  { %2337 = vmatprep.subr.bf16.mxu1 %v4819_v3 }
 0x1ff   :  { %2338 = vmatpush2.bf16.msra.mxu1 %v4817_v4 }
 0x200   :  { %2339 = vmatprep.subr.bf16.mxu1 %v4822_v6 }
 0x203   :  { %2340 = vmatpush2.bf16.msra.mxu1 %v4820_v8 }
 0x204   :  { %2341 = vmatprep.subr.bf16.mxu1 %v4825_v9 }
 0x207   :  { %2342 = vmatpush2.bf16.msra.mxu1 %v4823_v10 }
 0x208   :  { %2343 = vmatprep.subr.bf16.mxu1 %v4828_v34 }
 0x20b   :  { %2344 = vmatpush2.bf16.msra.mxu1 %v4826_v46 }
 0x20c   :  { %2345 = vmatprep.subr.bf16.mxu1 %v4831_v12 }
 0x20f   :  { %2346 = vmatpush2.bf16.msra.mxu1 %v4829_v14 }
 0x210   :  { %2347 = vmatprep.subr.bf16.mxu1 %v4834_v15 }
 0x211   :  { %v5887_v1 = vpop.f32.mrf.mxu0 }
 0x213   :  { %v1622_v2 = vpop.f32.mrf.mxu0  ;;  %2348 = vmatpush2.bf16.msra.mxu1 %v4832_v16 }
 0x214   :  { %2349 = vmatprep.subr.bf16.mxu1 %v4837_v20 }
 0x215   :  { %v5895_v41 = vpop.f32.mrf.mxu0 }
 0x216   :  { %v1731_v48 = vpack.c.bf16 %v5895_v41, %v5887_v1  ;;  %v4846_v1 = vld [vmem:[%s6858_s5 + $0x154] ss:$8 sps:$4 sm:$0xff]  }
 0x217   :  { %v1625_v5 = vpop.f32.mrf.mxu0  ;;  %2350 = vmatpush2.bf16.msra.mxu1 %v4835_v60 }
 0x218   :  { %2452 = vmatprep.subr.bf16.mxu1 %v4840_v51 }
 0x21d   :  { %v1628_v28 = vpop.f32.mrf.mxu0 }
 0x21f   :  { %v1630_v33 = vpop.f32.mrf.mxu0 }
 0x221   :  { %v1631_v11 = vpop.f32.mrf.mxu0 }
 0x222   :  { %v5917_v55 = vpack.c.bf16 %v1631_v11, %v1628_v28 }
 0x223   :  { %v1633_v61 = vpop.f32.mrf.mxu0 }
 0x224   :  { %1755 = vrot.lane.b32.xlu0 %v5917_v55, %s5021_s0 }
 0x22a   :  { %v1636_v18 = vpop.f32.mrf.mxu0 }
 0x22c   :  { %v1638_v19 = vpop.f32.mrf.mxu0 }
 0x22e   :  { %v1639_v21 = vpop.f32.mrf.mxu0 }
 0x22f   :  { %v5939_v22 = vpack.c.bf16 %v1639_v21, %v1636_v18 }
 0x230   :  { %v1641_v23 = vpop.f32.mrf.mxu0 }
 0x231   :  { %1776 = vrot.lane.b32.xlu1 %v5939_v22, %s5022_s29 }
 0x235   :  { %1757 = vrot.lane.b32.xlu1 %v5939_v22, %s5021_s0  ;;  %v1644_v25 = vpop.f32.mrf.mxu0 }
 0x237   :  { %v1646_v27 = vpop.f32.mrf.mxu0 }
 0x238   :  { %v4838_v27 = vld [vmem:[%s6858_s5 + $0x170] ss:$8 sps:$4 sm:$0xff]  }
 0x239   :  { %v1647_v30 = vpop.f32.mrf.mxu0 }
 0x23a   :  { %v5945_v42 = vpack.c.bf16 %v1647_v30, %v1644_v25 }
 0x23b   :  { %v1649_v43 = vpop.f32.mrf.mxu0 }
 0x23c   :  { %1797 = vrot.lane.b32.xlu0 %v5945_v42, %s5023_s3 }
 0x240   :  { %1778 = vrot.lane.b32.xlu0 %v5945_v42, %s5022_s29  ;;  %v1652_v44 = vpop.f32.mrf.mxu0 }
 0x242   :  { %v1654_v29 = vpop.f32.mrf.mxu0 }
 0x244   :  { %1759 = vrot.lane.b32.xlu0 %v5945_v42, %s5021_s0  ;;  %v1655_v17 = vpop.f32.mrf.mxu0 }
 0x245   :  { %v5953_v45 = vpack.c.bf16 %v1655_v17, %v1652_v44  ;;  %v4843_v44 = vld [vmem:[%s6858_s5 + $0x164] ss:$8 sps:$4 sm:$0xff]  }
 0x246   :  { %v1657_v24 = vpop.f32.mrf.mxu0 }
 0x247   :  { %1799 = vrot.lane.b32.xlu1 %v5953_v45, %s5023_s3  ;;  %v4841_v24 = vld [vmem:[%s6858_s5 + $0x160] ss:$8 sps:$4 sm:$0xff]  }
 0x24b   :  { %1780 = vrot.lane.b32.xlu1 %v5953_v45, %s5022_s29 }
 0x24c   :  { %v1660_v37 = vpop.f32.mrf.mxu0 }
 0x24e   :  { %v1662_v38 = vpop.f32.mrf.mxu0 }
 0x24f   :  { %1761 = vrot.lane.b32.xlu1 %v5953_v45, %s5021_s0 }
 0x250   :  { %v1663_v47 = vpop.f32.mrf.mxu0 }
 0x251   :  { %v5961_v49 = vpack.c.bf16 %v1663_v47, %v1660_v37  ;;  %v4844_v37 = vld [vmem:[%s6858_s5 + $0x150] ss:$8 sps:$4 sm:$0xff]   ;;  %v4849_v47 = vld [vmem:[%s6858_s5 + $0x144] ss:$8 sps:$4 sm:$0xff]  }
 0x252   :  { %v1665_v50 = vpop.f32.mrf.mxu0 }
 0x253   :  { %1801 = vrot.lane.b32.xlu0 %v5961_v49, %s5023_s3 }
 0x257   :  { %1782 = vrot.lane.b32.xlu0 %v5961_v49, %s5022_s29 }
 0x258   :  { %v1668_v52 = vpop.f32.mrf.mxu0 }
 0x25a   :  { %v1670_v26 = vpop.f32.mrf.mxu0 }
 0x25b   :  { %1763 = vrot.lane.b32.xlu0 %v5961_v49, %s5021_s0  ;;  %v4847_v26 = vld [vmem:[%s6858_s5 + $0x140] ss:$8 sps:$4 sm:$0xff]  }
 0x25c   :  { %v1671_v53 = vpop.f32.mrf.mxu0 }
 0x25d   :  { %v5972_v54 = vpack.c.bf16 %v1671_v53, %v1668_v52 }
 0x25e   :  { %v1673_v56 = vpop.f32.mrf.mxu0 }
 0x25f   :  { %1803 = vrot.lane.b32.xlu1 %v5972_v54, %s5023_s3  ;;  %v4852_v56 = vld [vmem:[%s6858_s5 + $0x134] ss:$8 sps:$4 sm:$0xff]  }
 0x263   :  { %1784 = vrot.lane.b32.xlu1 %v5972_v54, %s5022_s29 }
 0x264   :  { %v1676_v57 = vpop.f32.mrf.mxu0 }
 0x266   :  { %v1678_v58 = vpop.f32.mrf.mxu0 }
 0x267   :  { %1765 = vrot.lane.b32.xlu1 %v5972_v54, %s5021_s0  ;;  %v4850_v58 = vld [vmem:[%s6858_s5 + $0x130] ss:$8 sps:$4 sm:$0xff]  }
 0x268   :  { %v1679_v39 = vpop.f32.mrf.mxu0 }
 0x269   :  { %v5980_v40 = vpack.c.bf16 %v1679_v39, %v1676_v57  ;;  %v4855_v39 = vld [vmem:[%s6858_s5 + $0x124] ss:$8 sps:$4 sm:$0xff]  }
 0x26a   :  { %v1681_v31 = vpop.f32.mrf.mxu0 }
 0x26b   :  { %1805 = vrot.lane.b32.xlu0 %v5980_v40, %s5023_s3 }
 0x26f   :  { %1786 = vrot.lane.b32.xlu0 %v5980_v40, %s5022_s29 }
 0x270   :  { %v1684_v59 = vpop.f32.mrf.mxu0 }
 0x272   :  { %v1686_v32 = vpop.f32.mrf.mxu0 }
 0x273   :  { %1767 = vrot.lane.b32.xlu0 %v5980_v40, %s5021_s0  ;;  %v4858_v32 = vld [vmem:[%s6858_s5 + $0x114] ss:$8 sps:$4 sm:$0xff]  }
 0x274   :  { %v1687_v62 = vpop.f32.mrf.mxu0 }
 0x275   :  { %v5988_v63 = vpack.c.bf16 %v1687_v62, %v1684_v59  ;;  %v4853_v59 = vld [vmem:[%s6858_s5 + $0x120] ss:$8 sps:$4 sm:$0xff]  }
 0x276   :  { %v1689_v0 = vpop.f32.mrf.mxu0 }
 0x277   :  { %1807 = vrot.lane.b32.xlu1 %v5988_v63, %s5023_s3 }
 0x27b   :  { %1788 = vrot.lane.b32.xlu1 %v5988_v63, %s5022_s29 }
 0x27c   :  { %v1692_v2 = vpop.f32.mrf.mxu0 }
 0x27e   :  { %v1694_v3 = vpop.f32.mrf.mxu0 }
 0x27f   :  { %1769 = vrot.lane.b32.xlu1 %v5988_v63, %s5021_s0 }
 0x280   :  { %v1695_v4 = vpop.f32.mrf.mxu0 }
 0x281   :  { %v5996_v5 = vpack.c.bf16 %v1695_v4, %v1692_v2  ;;  %v4856_v2 = vld [vmem:[%s6858_s5 + $0x110] ss:$8 sps:$4 sm:$0xff]   ;;  %v4861_v4 = vld [vmem:[%s6858_s5 + $0x104] ss:$8 sps:$4 sm:$0xff]  }
 0x282   :  { %v1697_v6 = vpop.f32.mrf.mxu0 }
 0x283   :  { %1809 = vrot.lane.b32.xlu0 %v5996_v5, %s5023_s3 }
 0x287   :  { %1790 = vrot.lane.b32.xlu0 %v5996_v5, %s5022_s29 }
 0x289   :  { %v1700_v8 = vpop.f32.mrf.mxu0 }
 0x28b   :  { %v1702_v9 = vpop.f32.mrf.mxu0  ;;  %1771 = vrot.lane.b32.xlu0 %v5996_v5, %s5021_s0 }
 0x28c   :  { %v4859_v9 = vld [vmem:[%s6858_s5 + $0x100] ss:$8 sps:$4 sm:$0xff]  }
 0x28d   :  { %v1703_v10 = vpop.f32.mrf.mxu0 }
 0x28e   :  { %v1741_v28 = vpack.c.bf16 %v1703_v10, %v1700_v8  ;;  %v2013_v8 = vld [vmem:[%s6858_s5 + $0x1a0] sm:$0x33] }
 0x28f   :  { %v1705_v33 = vpop.f32.mrf.mxu0  ;;  %v4325_v10 = vcombine.high %v2013_v8, %v2013_v8 }
 0x290   :  { %1811 = vrot.lane.b32.xlu1 %v1741_v28, %s5023_s3 }
 0x294   :  { %1792 = vrot.lane.b32.xlu1 %v1741_v28, %s5022_s29 }
 0x295   :  { %v1708_v34 = vpop.f32.mrf.mxu0 }
 0x296   :  { %v1756_v20 = vpop.permute.xlu0 %1755 }
 0x297   :  { %v1710_v46 = vpop.f32.mrf.mxu0  ;;  %v1841_v29 = vsel %vm1838_vm6, %v1731_v48, %v1756_v20 }
 0x298   :  { %1773 = vrot.lane.b32.xlu1 %v1741_v28, %s5021_s0 }
 0x299   :  { %v1711_v11 = vpop.f32.mrf.mxu0 }
 0x29a   :  { %v1742_v61 = vpack.c.bf16 %v1711_v11, %v1708_v34 }
 0x29b   :  { %v1713_v12 = vpop.f32.mrf.mxu0 }
 0x29c   :  { %1813 = vrot.lane.b32.xlu0 %v1742_v61, %s5023_s3  ;;  %v4864_v12 = vld [vmem:[%s6858_s5 + $0x190] ss:$8 sps:$4 sm:$0xff]  }
 0x2a0   :  { %1794 = vrot.lane.b32.xlu0 %v1742_v61, %s5022_s29 }
 0x2a1   :  { %v1716_v14 = vpop.f32.mrf.mxu0 }
 0x2a3   :  { %v1718_v15 = vpop.f32.mrf.mxu0  ;;  %v1777_v60 = vpop.permute.xlu1 %1776 }
 0x2a4   :  { %1818 = vrot.lane.b32.xlu0 %v5953_v45, %s5024_s19  ;;  %v1880_v23 = vsel %vm1539_vm4, %v1756_v20, %v1777_v60  ;;  %v4869_v15 = vld [vmem:[%s6858_s5 + $0x184] ss:$8 sps:$4 sm:$0xff]  }
 0x2a5   :  { %v1719_v16 = vpop.f32.mrf.mxu0 }
 0x2a6   :  { %v1743_v18 = vpack.c.bf16 %v1719_v16, %v1716_v14 }
 0x2a7   :  { %v1721_v19 = vpop.f32.mrf.mxu0  ;;  %v1758_v48 = vpop.permute.xlu1 %1757 }
 0x2a8   :  { %1822 = vrot.lane.b32.xlu0 %v5972_v54, %s5024_s19  ;;  %1815 = vrot.lane.b32.xlu1 %v1743_v18, %s5023_s3  ;;  %v1845_v57 = vsel %vm1838_vm6, %v5917_v55, %v1758_v48 }
 0x2ac   :  { %1826 = vrot.lane.b32.xlu0 %v5988_v63, %s5024_s19  ;;  %1820 = vrot.lane.b32.xlu1 %v5961_v49, %s5024_s19 }
 0x2ad   :  { %v1724_v21 = vpop.f32.mrf.mxu0 }
 0x2ae   :  { %v6019_v25 = vpop.permute.xlu0 %1797 }
 0x2af   :  { %v1901_v30 = vsel %vm1899_vm5, %v1880_v23, %v6019_v25  ;;  %v1726_v43 = vpop.f32.mrf.mxu0 }
 0x2b0   :  { %2351 = vmatprep.mubr.bf16.mxu1 %v1901_v30  ;;  %1830 = vrot.lane.b32.xlu0 %v1741_v28, %s5024_s19  ;;  %v4324_v28 = vcombine.low %v2013_v8, %v2013_v8 }
 0x2b1   :  { %1824 = vrot.lane.b32.xlu1 %v5980_v40, %s5024_s19  ;;  %2352 = vmatmul.mubr.bf16.vlgmr.msra.gmra.mxu1 %v1841_v29  ;;  %v1727_v17 = vpop.f32.mrf.mxu0 }
 0x2b2   :  { %2453 = vmatpush1.bf16.msra.mxu1 %v4838_v27  ;;  %v1779_v38 = vpop.permute.xlu0 %1778  ;;  %v1744_v50 = vpack.c.bf16 %v1727_v17, %v1724_v21  ;;  %v2314_v46 = vsel %vm2312_vm7, %v4324_v28, 0 }
 0x2b3   :  { %2454 = vmatprep.subr.bf16.mxu1 %v4843_v44  ;;  %v1729_v41 = vpop.f32.mrf.mxu0  ;;  %v1882_v51 = vsel %vm1539_vm4, %v1758_v48, %v1779_v38 }
 0x2b4   :  { %1834 = vrot.lane.b32.xlu0 %v1743_v18, %s5024_s19  ;;  %v4867_v18 = vld [vmem:[%s6858_s5 + $0x180] ss:$8 sps:$4 sm:$0xff]  }
 0x2b5   :  { %1828 = vrot.lane.b32.xlu1 %v5996_v5, %s5024_s19 }
 0x2b6   :  { %2455 = vmatpush1.bf16.msra.mxu1 %v4841_v24  ;;  %v1760_v31 = vpop.permute.xlu0 %1759 }
 0x2b7   :  { %2456 = vmatprep.subr.bf16.mxu1 %v4846_v1  ;;  %v1849_v6 = vsel %vm1838_vm6, %v5939_v22, %v1760_v31  ;;  %v4866_v22 = vld [vmem:[%s6858_s5 + $0x194] ss:$8 sps:$4 sm:$0xff]  }
 0x2b9   :  { %1832 = vrot.lane.b32.xlu1 %v1742_v61, %s5024_s19  ;;  %v6053_v52 = vpop.permute.xlu1 %1799 }
 0x2ba   :  { %2457 = vmatpush1.bf16.msra.mxu1 %v4844_v37  ;;  %v1904_v53 = vsel %vm1899_vm5, %v1882_v51, %v6053_v52 }
 0x2bb   :  { %2458 = vmatprep.subr.bf16.mxu1 %v4849_v47  ;;  %2361 = vmatprep.mubr.bf16.mxu1 %v1904_v53 }
 0x2bc   :  { %2362 = vmatmul.mubr.bf16.gmra.mxu1 %v1845_v57 }
 0x2bd   :  { %1836 = vrot.lane.b32.xlu1 %v1744_v50, %s5024_s19  ;;  %v1781_v55 = vpop.permute.xlu1 %1780 }
 0x2be   :  { %2459 = vmatpush1.bf16.msra.mxu1 %v4847_v26  ;;  %v1884_v62 = vsel %vm1539_vm4, %v1760_v31, %v1781_v55 }
 0x2bf   :  { %2460 = vmatprep.subr.bf16.mxu1 %v4852_v56 }
 0x2c1   :  { %v1762_v33 = vpop.permute.xlu1 %1761 }
 0x2c2   :  { %2461 = vmatpush1.bf16.msra.mxu1 %v4850_v58  ;;  %v1853_v16 = vsel %vm1838_vm6, %v5945_v42, %v1762_v33 }
 0x2c3   :  { %2462 = vmatprep.subr.bf16.mxu1 %v4855_v39 }
 0x2c5   :  { %v6079_v0 = vpop.permute.xlu0 %1801 }
 0x2c6   :  { %2463 = vmatpush1.bf16.msra.mxu1 %v4853_v59  ;;  %v1907_v3 = vsel %vm1899_vm5, %v1884_v62, %v6079_v0 }
 0x2c7   :  { %2464 = vmatprep.subr.bf16.mxu1 %v4858_v32  ;;  %2371 = vmatprep.mubr.bf16.mxu1 %v1907_v3  ;;  %v4871_v32 = vld [vmem:[%s6860_s7 + $0x80] sm:$0xff]  }
 0x2c8   :  { %2372 = vmatmul.mubr.bf16.gmra.mxu1 %v1849_v6 }
 0x2c9   :  { %v1783_v34 = vpop.permute.xlu0 %1782 }
 0x2ca   :  { %2465 = vmatpush1.bf16.msra.mxu1 %v4856_v2  ;;  %v1886_v11 = vsel %vm1539_vm4, %v1762_v33, %v1783_v34 }
 0x2cb   :  { %2466 = vmatprep.subr.bf16.mxu1 %v4861_v4 }
 0x2cd   :  { %v1764_v19 = vpop.permute.xlu0 %1763 }
 0x2ce   :  { %2467 = vmatpush1.bf16.msra.mxu1 %v4859_v9  ;;  %v1857_v42 = vsel %vm1838_vm6, %v5953_v45, %v1764_v19 }
 0x2cf   :  { %4326 = vmatprep.subr.msk.bf16.mxu1 %vm2312_vm7, %v4325_v10  ;;  %v4872_v10 = vld [vmem:[%s6860_s7 + $0x78] sm:$0xff]  }
 0x2d1   :  { %v6101_v61 = vpop.permute.xlu1 %1803 }
 0x2d2   :  { %2479 = vmatpush2.bf16.msra.mxu1 %v2314_v46  ;;  %v1910_v14 = vsel %vm1899_vm5, %v1886_v11, %v6101_v61 }
 0x2d3   :  { %2480 = vmatprep.subr.bf16.mxu1 %v4866_v22  ;;  %2381 = vmatprep.mubr.bf16.mxu1 %v1910_v14 }
 0x2d4   :  { %2382 = vmatmul.mubr.bf16.gmra.mxu1 %v1853_v16 }
 0x2d5   :  { %v1785_v20 = vpop.permute.xlu1 %1784 }
 0x2d6   :  { %2481 = vmatpush2.bf16.msra.mxu1 %v4864_v12  ;;  %v1888_v60 = vsel %vm1539_vm4, %v1764_v19, %v1785_v20 }
 0x2d7   :  { %2482 = vmatprep.subr.bf16.mxu1 %v4869_v15 }
 0x2d9   :  { %v1766_v27 = vpop.permute.xlu1 %1765 }
 0x2da   :  { %2483 = vmatpush2.bf16.msra.mxu1 %v4867_v18  ;;  %v1861_v17 = vsel %vm1838_vm6, %v5961_v49, %v1766_v27 }
 0x2db   :  { %2978 = vmatprep.subr.bf16.mxu1 %v5020_v13 }
 0x2dd   :  { %v6118_v21 = vpop.permute.xlu0 %1805 }
 0x2de   :  { %v1913_v23 = vsel %vm1899_vm5, %v1888_v60, %v6118_v21  ;;  %v4877_v60 = vld [vmem:[%s6860_s7 + $0x50] sm:$0xff]  }
 0x2df   :  { %2391 = vmatprep.mubr.bf16.mxu1 %v1913_v23 }
 0x2e0   :  { %2392 = vmatmul.mubr.bf16.gmra.mxu1 %v1857_v42  ;;  %v4879_v42 = vld [vmem:[%s6860_s7 + $0xd0] sm:$0xff]  }
 0x2e1   :  { %v1787_v30 = vpop.permute.xlu0 %1786 }
 0x2e2   :  { %v1890_v43 = vsel %vm1539_vm4, %v1766_v27, %v1787_v30  ;;  %v4880_v27 = vld [vmem:[%s6860_s7 + $0xc8] sm:$0xff]   ;;  %v4882_v30 = vld [vmem:[%s6860_s7 + $0xc0] sm:$0xff]  }
 0x2e5   :  { %v1768_v24 = vpop.permute.xlu0 %1767 }
 0x2e6   :  { %v1865_v37 = vsel %vm1838_vm6, %v5972_v54, %v1768_v24  ;;  %v4870_v54 = vld [vmem:[%s6860_s7 + $0x88] sm:$0xff]  }
 0x2e7   :  { %2750 = vmatpush1.bf16.msra.mxu0 %v4870_v54 }
 0x2e8   :  { %2751 = vmatprep.subr.bf16.mxu0 %v5020_v13 }
 0x2e9   :  { %v6125_v44 = vpop.permute.xlu1 %1807 }
 0x2ea   :  { %v1916_v29 = vsel %vm1899_vm5, %v1890_v43, %v6125_v44  ;;  %v4881_v43 = vld [vmem:[%s6860_s7 + $0x98] sm:$0xff]  }
 0x2eb   :  { %2401 = vmatprep.mubr.bf16.mxu1 %v1916_v29  ;;  %2752 = vmatpush1.bf16.msra.mxu0 %v4871_v32  ;;  %v4884_v29 = vld [vmem:[%s6860_s7 + $0xb0] sm:$0xff]  }
 0x2ec   :  { %2402 = vmatmul.mubr.bf16.gmra.mxu1 %v1861_v17  ;;  %2753 = vmatprep.subr.bf16.mxu0 %v5020_v13 }
 0x2ed   :  { %v1789_v1 = vpop.permute.xlu1 %1788 }
 0x2ee   :  { %v1892_v41 = vsel %vm1539_vm4, %v1768_v24, %v1789_v1  ;;  %v4885_v24 = vld [vmem:[%s6860_s7 + $0x90] sm:$0xff]   ;;  %v4886_v1 = vld [vmem:[%s6860_s7 + $0xa8] sm:$0xff]  }
 0x2ef   :  { %2754 = vmatpush1.bf16.msra.mxu0 %v4872_v10 }
 0x2f0   :  { %2755 = vmatprep.subr.bf16.mxu0 %v5020_v13 }
 0x2f1   :  { %v1770_v38 = vpop.permute.xlu1 %1769 }
 0x2f2   :  { %v1869_v26 = vsel %vm1838_vm6, %v5980_v40, %v1770_v38 }
 0x2f5   :  { %v6132_v45 = vpop.permute.xlu0 %1809 }
 0x2f6   :  { %v1919_v48 = vsel %vm1899_vm5, %v1892_v41, %v6132_v45 }
 0x2f7   :  { %2411 = vmatprep.mubr.bf16.mxu1 %v1919_v48 }
 0x2f8   :  { %2412 = vmatmul.mubr.bf16.gmra.mxu1 %v1865_v37  ;;  %v4889_v37 = vld [vmem:[%s6860_s7 + $0xe8] sm:$0xff]  }
 0x2f9   :  { %v1791_v47 = vpop.permute.xlu0 %1790 }
 0x2fa   :  { %v1894_v50 = vsel %vm1539_vm4, %v1770_v38, %v1791_v47 }
 0x2fd   :  { %v1772_v53 = vpop.permute.xlu0 %1771 }
 0x2fe   :  { %v1873_v31 = vsel %vm1838_vm6, %v5988_v63, %v1772_v53 }
 0x302   :  { %v6139_v49 = vpop.permute.xlu1 %1811 }
 0x303   :  { %v1922_v51 = vsel %vm1899_vm5, %v1894_v50, %v6139_v49  ;;  %v4891_v50 = vld [vmem:[%s6860_s7 + $0xe0] sm:$0xff]  }
 0x304   :  { %2421 = vmatprep.mubr.bf16.mxu1 %v1922_v51 }
 0x305   :  { %2422 = vmatmul.mubr.bf16.gmra.mxu1 %v1869_v26 }
 0x306   :  { %v1793_v56 = vpop.permute.xlu1 %1792 }
 0x307   :  { %v1896_v57 = vsel %vm1539_vm4, %v1772_v53, %v1793_v56 }
 0x30a   :  { %v1774_v59 = vpop.permute.xlu1 %1773 }
 0x30b   :  { %v1877_v63 = vsel %vm1838_vm6, %v5996_v5, %v1774_v59 }
 0x30e   :  { %v1814_v58 = vpop.permute.xlu0 %1813 }
 0x30f   :  { %v1925_v39 = vsel %vm1899_vm5, %v1896_v57, %v1814_v58 }
 0x310   :  { %2431 = vmatprep.mubr.bf16.mxu1 %v1925_v39 }
 0x311   :  { %2432 = vmatmul.mubr.bf16.gmra.mxu1 %v1873_v31 }
 0x312   :  { %v1795_v40 = vpop.permute.xlu0 %1794 }
 0x313   :  { %v1898_v62 = vsel %vm1539_vm4, %v1774_v59, %v1795_v40 }
 0x316   :  { %v1819_v55 = vpop.permute.xlu0 %1818 }
 0x317   :  { %v1932_v33 = vsel %vm1930_vm9, %v6019_v25, %v1819_v55  ;;  %v4873_v25 = vld [vmem:[%s6860_s7 + $0x70] sm:$0xff]  }
 0x318   :  { %2756 = vmatpush1.bf16.msra.mxu0 %v4873_v25 }
 0x319   :  { %2757 = vmatprep.subr.bf16.mxu0 %v5020_v13 }
 0x31a   :  { %v1823_v2 = vpop.permute.xlu0 %1822  ;;  %v1816_v3 = vpop.permute.xlu1 %1815 }
 0x31b   :  { %v1928_v4 = vsel %vm1899_vm5, %v1898_v62, %v1816_v3  ;;  %v1938_v15 = vsel %vm1930_vm9, %v6079_v0, %v1823_v2  ;;  %v4875_v0 = vld [vmem:[%s6860_s7 + $0x60] sm:$0xff]  }
 0x31c   :  { %2441 = vmatprep.mubr.bf16.mxu1 %v1928_v4 }
 0x31d   :  { %2442 = vmatmul.mubr.bf16.gmra.mxu1 %v1877_v63 }
 0x31e   :  { %v1827_v6 = vpop.permute.xlu0 %1826  ;;  %4327 = vmatprep.mubr.msk.bf16.mxu1 %vm2291_vm8, %v1819_v55  ;;  %v1821_v8 = vpop.permute.xlu1 %1820 }
 0x31f   :  { %v1935_v11 = vsel %vm1930_vm9, %v6053_v52, %v1821_v8  ;;  %v4874_v52 = vld [vmem:[%s6860_s7 + $0x68] sm:$0xff]   ;;  %v1944_v18 = vsel %vm1930_vm9, %v6118_v21, %v1827_v6  ;;  %v4878_v21 = vld [vmem:[%s6860_s7 + $0xd8] sm:$0xff]  }
 0x320   :  { %2758 = vmatpush1.bf16.msra.mxu0 %v4874_v52 }
 0x321   :  { %2759 = vmatprep.subr.bf16.mxu0 %v5020_v13 }
 0x322   :  { %v1831_v9 = vpop.permute.xlu0 %1830 }
 0x323   :  { %v1825_v28 = vpop.permute.xlu1 %1824  ;;  %v1950_v20 = vsel %vm1930_vm9, %v6132_v45, %v1831_v9  ;;  %v4887_v45 = vld [vmem:[%s6860_s7 + $0xa0] sm:$0xff]  }
 0x324   :  { %v1941_v16 = vsel %vm1930_vm9, %v6101_v61, %v1825_v28  ;;  %2760 = vmatpush1.bf16.msra.mxu0 %v4875_v0  ;;  %v4876_v61 = vld [vmem:[%s6860_s7 + $0x58] sm:$0xff]  }
 0x325   :  { %2485 = vmatmul.mubr.bf16.vlgmr.msra.gmra.mxu1 %v1932_v33  ;;  %2761 = vmatprep.subr.bf16.mxu0 %v5020_v13 }
 0x326   :  { %v1835_v5 = vpop.permute.xlu0 %1834  ;;  %4328 = vmatprep.mubr.msk.bf16.mxu1 %vm2291_vm8, %v1821_v8  ;;  %2979 = vmatpush1.bf16.msra.mxu1 %v4878_v21 }
 0x327   :  { %v1956_v34 = vsel %vm1930_vm9, %v1814_v58, %v1835_v5  ;;  %v1829_v46 = vpop.permute.xlu1 %1828  ;;  %2980 = vmatprep.subr.bf16.mxu1 %v5020_v13 }
 0x328   :  { %v1947_v19 = vsel %vm1930_vm9, %v6125_v44, %v1829_v46  ;;  %2762 = vmatpush1.bf16.msra.mxu0 %v4876_v61  ;;  %v4883_v44 = vld [vmem:[%s6860_s7 + $0xb8] sm:$0xff]  }
 0x329   :  { %2763 = vmatprep.subr.bf16.mxu0 %v5020_v13 }
 0x32a   :  { %2981 = vmatpush1.bf16.msra.mxu1 %v4879_v42 }
 0x32b   :  { %v1833_v22 = vpop.permute.xlu1 %1832  ;;  %2982 = vmatprep.subr.bf16.mxu1 %v5020_v13 }
 0x32c   :  { %2764 = vmatpush1.bf16.msra.mxu0 %v4877_v60  ;;  %v1953_v23 = vsel %vm1930_vm9, %v6139_v49, %v1833_v22 }
 0x32d   :  { %2495 = vmatmul.mubr.bf16.gmra.mxu1 %v1935_v11  ;;  %2777 = vmatprep.subr.bf16.mxu0 %v5020_v13 }
 0x32e   :  { %4329 = vmatprep.mubr.msk.bf16.mxu1 %vm2291_vm8, %v1823_v2  ;;  %2983 = vmatpush1.bf16.msra.mxu1 %v4880_v27 }
 0x32f   :  { %v1837_v12 = vpop.permute.xlu1 %1836  ;;  %2984 = vmatprep.subr.bf16.mxu1 %v5020_v13 }
 0x330   :  { %v1959_v14 = vsel %vm1930_vm9, %v1816_v3, %v1837_v12  ;;  %2778 = vmatpush2.bf16.msra.mxu0 %v4881_v43 }
 0x331   :  { %2779 = vmatprep.subr.bf16.mxu0 %v5020_v13 }
 0x332   :  { %2985 = vmatpush1.bf16.msra.mxu1 %v4882_v30 }
 0x333   :  { %2986 = vmatprep.subr.bf16.mxu1 %v5020_v13 }
 0x334   :  { %2780 = vmatpush2.bf16.msra.mxu0 %v4885_v24 }
 0x335   :  { %2505 = vmatmul.mubr.bf16.gmra.mxu1 %v1938_v15  ;;  %2853 = vmatprep.subr.bf16.mxu0 %v5020_v13 }
 0x336   :  { %4330 = vmatprep.mubr.msk.bf16.mxu1 %vm2291_vm8, %v1825_v28  ;;  %2987 = vmatpush1.bf16.msra.mxu1 %v4883_v44 }
 0x337   :  { %2988 = vmatprep.subr.bf16.mxu1 %v5020_v13 }
 0x33a   :  { %2989 = vmatpush1.bf16.msra.mxu1 %v4884_v29 }
 0x33b   :  { %2990 = vmatprep.subr.bf16.mxu1 %v5020_v13 }
 0x33d   :  { %2515 = vmatmul.mubr.bf16.gmra.mxu1 %v1941_v16 }
 0x33e   :  { %4331 = vmatprep.mubr.msk.bf16.mxu1 %vm2291_vm8, %v1827_v6  ;;  %2991 = vmatpush1.bf16.msra.mxu1 %v4886_v1 }
 0x33f   :  { %2992 = vmatprep.subr.bf16.mxu1 %v5020_v13 }
 0x342   :  { %2993 = vmatpush1.bf16.msra.mxu1 %v4887_v45 }
 0x343   :  { %3006 = vmatprep.subr.bf16.mxu1 %v5020_v13 }
 0x345   :  { %2525 = vmatmul.mubr.bf16.gmra.mxu1 %v1944_v18 }
 0x346   :  { %4332 = vmatprep.mubr.msk.bf16.mxu1 %vm2291_vm8, %v1829_v46  ;;  %3007 = vmatpush2.bf16.msra.mxu1 %v4889_v37 }
 0x347   :  { %3008 = vmatprep.subr.bf16.mxu1 %v5020_v13 }
 0x34a   :  { %3009 = vmatpush2.bf16.msra.mxu1 %v4891_v50 }
 0x34b   :  { %3232 = vmatprep.subr.bf16.mxu1 %v5020_v13 }
 0x34d   :  { %2535 = vmatmul.mubr.bf16.gmra.mxu1 %v1947_v19 }
 0x34e   :  { %4333 = vmatprep.mubr.msk.bf16.mxu1 %vm2291_vm8, %v1831_v9 }
 0x355   :  { %2545 = vmatmul.mubr.bf16.gmra.mxu1 %v1950_v20 }
 0x356   :  { %4334 = vmatprep.mubr.msk.bf16.mxu1 %vm2291_vm8, %v1833_v22 }
 0x35d   :  { %2555 = vmatmul.mubr.bf16.gmra.mxu1 %v1953_v23 }
 0x35e   :  { %4335 = vmatprep.mubr.msk.bf16.mxu1 %vm2291_vm8, %v1835_v5 }
 0x365   :  { %2565 = vmatmul.mubr.bf16.gmra.mxu1 %v1956_v34 }
 0x366   :  { %4336 = vmatprep.mubr.msk.bf16.mxu1 %vm2291_vm8, %v1837_v12 }
 0x36d   :  { %2575 = vmatmul.mubr.bf16.gmra.mxu1 %v1959_v14  ;;  %v2014_v14 = vld [vmem:[%s6859_s6] sm:$0x3] }
 0x36e   :  { %v6328_v16 = vrot.slane %v2014_v14, %v689_v35  ;;  %v6334_v18 = vrot.slane %v2014_v14, %v693_v36 }
 0x371   :  { %v2353_v17 = vpop.f32.mrf.mxu1 }
 0x372   :  { %v2354_v61 = vadd.f32 %v2353_v17, %v6328_v16 }
 0x373   :  { %v2355_v41 = vpop.f32.mrf.mxu1 }
 0x374   :  { %v2356_v60 = vadd.f32 %v2355_v41, %v6334_v18 }
 0x375   :  { %v2357_v48 = vpop.f32.mrf.mxu1 }
 0x376   :  { %v2358_v21 = vadd.f32 %v2357_v48, %v6328_v16 }
 0x377   :  { %v2359_v38 = vpop.f32.mrf.mxu1 }
 0x378   :  { %v2360_v27 = vadd.f32 %v2359_v38, %v6334_v18 }
 0x37c   :  { %v2363_v47 = vpop.f32.mrf.mxu1 }
 0x37d   :  { %v2364_v24 = vadd.f32 %v2363_v47, %v6328_v16 }
 0x37e   :  { %v2365_v49 = vpop.f32.mrf.mxu1 }
 0x37f   :  { %v2366_v48 = vadd.f32 %v2365_v49, %v6334_v18 }
 0x380   :  { %v2367_v51 = vpop.f32.mrf.mxu1 }
 0x381   :  { %v2368_v37 = vadd.f32 %v2367_v51, %v6328_v16 }
 0x382   :  { %v2369_v26 = vpop.f32.mrf.mxu1 }
 0x388   :  { %v6261_v53 = vpop.f32.mrf.mxu1 }
 0x38a   :  { %v6263_v56 = vpop.f32.mrf.mxu1 }
 0x38b   :  { %v2376_v51 = vadd.f32 %v6263_v56, %v6334_v18 }
 0x38c   :  { %v6265_v54 = vpop.f32.mrf.mxu1 }
 0x38e   :  { %v6267_v57 = vpop.f32.mrf.mxu1 }
 0x394   :  { %v6269_v58 = vpop.f32.mrf.mxu1 }
 0x395   :  { %v2384_v56 = vadd.f32 %v6269_v58, %v6328_v16 }
 0x396   :  { %v6271_v39 = vpop.f32.mrf.mxu1 }
 0x397   :  { %v2386_v58 = vadd.f32 %v6271_v39, %v6334_v18 }
 0x398   :  { %v6273_v31 = vpop.f32.mrf.mxu1 }
 0x39a   :  { %v6275_v40 = vpop.f32.mrf.mxu1 }
 0x3a0   :  { %v6277_v59 = vpop.f32.mrf.mxu1 }
 0x3a2   :  { %v6279_v55 = vpop.f32.mrf.mxu1 }
 0x3a4   :  { %v6281_v32 = vpop.f32.mrf.mxu1 }
 0x3a6   :  { %v6283_v62 = vpop.f32.mrf.mxu1 }
 0x3ac   :  { %v6285_v2 = vpop.f32.mrf.mxu1 }
 0x3ae   :  { %v6287_v3 = vpop.f32.mrf.mxu1 }
 0x3b0   :  { %v6289_v4 = vpop.f32.mrf.mxu1 }
 0x3b2   :  { %v6291_v63 = vpop.f32.mrf.mxu1 }
 0x3b8   :  { %v6293_v6 = vpop.f32.mrf.mxu1 }
 0x3ba   :  { %v6295_v8 = vpop.f32.mrf.mxu1 }
 0x3bc   :  { %v6297_v9 = vpop.f32.mrf.mxu1 }
 0x3be   :  { %v6299_v10 = vpop.f32.mrf.mxu1 }
 0x3c5   :  { %v6301_v28 = vpop.f32.mrf.mxu1 }
 0x3c7   :  { %v6303_v33 = vpop.f32.mrf.mxu1 }
 0x3c9   :  { %v6305_v5 = vpop.f32.mrf.mxu1 }
 0x3cb   :  { %v6307_v34 = vpop.f32.mrf.mxu1 }
 0x3d1   :  { %v6309_v46 = vpop.f32.mrf.mxu1 }
 0x3d3   :  { %v6311_v22 = vpop.f32.mrf.mxu1 }
 0x3d5   :  { %v6313_v11 = vpop.f32.mrf.mxu1 }
 0x3d7   :  { %v6315_v25 = vpop.f32.mrf.mxu1 }
 0x3dd   :  { %v6317_v12 = vpop.f32.mrf.mxu1 }
 0x3df   :  { %v6322_v15 = vpop.f32.mrf.mxu1 }
 0x3e1   :  { %v6324_v52 = vpop.f32.mrf.mxu1 }
 0x3e3   :  { %v6330_v0 = vpop.f32.mrf.mxu1 }
 0x3e5   :  { %v2486_v19 = vpop.f32.mrf.mxu1 }
 0x3e6   :  { %v2487_v23 = vadd.f32 %v2486_v19, %v2354_v61  ;;  %v2370_v19 = vadd.f32 %v2369_v26, %v6334_v18  ;;  %v2378_v26 = vadd.f32 %v6265_v54, %v6328_v16 }
 0x3e7   :  { %v2488_v20 = vpop.f32.mrf.mxu1 }
 0x3e8   :  { %v2489_v35 = vadd.f32 %v2488_v20, %v2356_v60  ;;  %v2585_v44 = vmax.f32 %v2487_v23, 0.0 }
 0x3e9   :  { %v2490_v42 = vpop.f32.mrf.mxu1 }
 0x3ea   :  { %v2491_v30 = vadd.f32 %v2490_v42, %v2358_v21  ;;  %v2586_v1 = vmax.f32 %v2489_v35, 0.0 }
 0x3eb   :  { %v2492_v43 = vpop.f32.mrf.mxu1 }
 0x3ec   :  { %v2587_v29 = vmax.f32 %v2491_v30, 0.0  ;;  %v2493_v7 = vadd.f32 %v2492_v43, %v2360_v27  ;;  %v2374_v27 = vadd.f32 %v6261_v53, %v6328_v16  ;;  %v2380_v53 = vadd.f32 %v6267_v57, %v6334_v18 }
 0x3ed   :  { %v2496_v36 = vpop.f32.mrf.mxu1 }
 0x3ee   :  { %v6341_v17 = vpack.c.bf16 %v2587_v29, %v2585_v44  ;;  %v2588_v45 = vmax.f32 %v2493_v7, 0.0  ;;  %v2497_v38 = vadd.f32 %v2496_v36, %v2364_v24  ;;  %v4888_v7 = vld [vmem:[%s6860_s7 + $0x38] sm:$0xff]  }
 0x3ef   :  { %v2498_v41 = vpop.f32.mrf.mxu1 }
 0x3f0   :  { %v2626_v50 = vpack.c.bf16 %v2588_v45, %v2586_v1  ;;  %v2499_v61 = vadd.f32 %v2498_v41, %v2366_v48  ;;  %v2589_v21 = vmax.f32 %v2497_v38, 0.0 }
 0x3f1   :  { %v2500_v14 = vpop.f32.mrf.mxu1 }
 0x3f2   :  { %v2501_v20 = vadd.f32 %v2500_v14, %v2368_v37  ;;  %v2590_v35 = vmax.f32 %v2499_v61, 0.0  ;;  %v4890_v37 = vld [vmem:[%s6860_s7 + $0x30] sm:$0xff]  }
 0x3f3   :  { %v2502_v60 = vpop.f32.mrf.mxu1 }
 0x3f4   :  { %v2591_v23 = vmax.f32 %v2501_v20, 0.0  ;;  %v2503_v47 = vadd.f32 %v2502_v60, %v2370_v19  ;;  %v2388_v60 = vadd.f32 %v6273_v31, %v6328_v16 }
 0x3f5   :  { %v2506_v42 = vpop.f32.mrf.mxu1 }
 0x3f6   :  { %v2627_v30 = vpack.c.bf16 %v2591_v23, %v2589_v21  ;;  %v2592_v49 = vmax.f32 %v2503_v47, 0.0  ;;  %v2507_v29 = vadd.f32 %v2506_v42, %v2374_v27  ;;  %v4893_v23 = vld [vmem:[%s6860_s7 + $0x178] sm:$0xff]   ;;  %v2390_v42 = vadd.f32 %v6275_v40, %v6334_v18 }
 0x3f7   :  { %v2508_v43 = vpop.f32.mrf.mxu1 }
 0x3f8   :  { %v2628_v44 = vpack.c.bf16 %v2592_v49, %v2590_v35  ;;  %v2509_v24 = vadd.f32 %v2508_v43, %v2376_v51  ;;  %v2593_v54 = vmax.f32 %v2507_v29, 0.0  ;;  %v4894_v43 = vld [vmem:[%s6860_s7 + $0x20] sm:$0xff]   ;;  %v4895_v51 = vld [vmem:[%s6860_s7 + $0x170] sm:$0xff]  }
 0x3f9   :  { %v2510_v36 = vpop.f32.mrf.mxu1 }
 0x3fa   :  { %v2511_v1 = vadd.f32 %v2510_v36, %v2378_v26  ;;  %4367 = vmatprep.mubr.msk.bf16.mxu0 %vm349_vm0, %v2628_v44  ;;  %v2594_v38 = vmax.f32 %v2509_v24, 0.0  ;;  %v2394_v26 = vadd.f32 %v6277_v59, %v6328_v16  ;;  %v2396_v36 = vadd.f32 %v6279_v55, %v6334_v18  ;;  %v4896_v59 = vld [vmem:[%s6860_s7 + $0x18] sm:$0xff]  }
 0x3fb   :  { %v2512_v45 = vpop.f32.mrf.mxu1  ;;  %2782 = vmatmul.mubr.bf16.vlgmr.msra.gmra.mxu0 %v2627_v30  ;;  %v2398_v24 = vadd.f32 %v6281_v32, %v6328_v16  ;;  %v2400_v55 = vadd.f32 %v6283_v62, %v6334_v18 }
 0x3fc   :  { %v2595_v41 = vmax.f32 %v2511_v1, 0.0  ;;  %v2513_v48 = vadd.f32 %v2512_v45, %v2380_v53  ;;  %2854 = vmatpush1.bf16.msra.mxu0 %v4888_v7  ;;  %4378 = vmatprep.mubr.msk.bf16.mxu0 %vm349_vm0, %v2626_v50  ;;  %v4892_v50 = vld [vmem:[%s6860_s7 + $0x28] sm:$0xff]  }
 0x3fd   :  { %v2516_v57 = vpop.f32.mrf.mxu1  ;;  %2855 = vmatprep.subr.bf16.mxu0 %v5020_v13 }
 0x3fe   :  { %v2629_v14 = vpack.c.bf16 %v2595_v41, %v2593_v54  ;;  %v2596_v19 = vmax.f32 %v2513_v48, 0.0  ;;  %v2517_v61 = vadd.f32 %v2516_v57, %v2384_v56  ;;  %v4897_v56 = vld [vmem:[%s6860_s7 + $0x168] sm:$0xff]  }
 0x3ff   :  { %v2518_v20 = vpop.f32.mrf.mxu1 }
 0x400   :  { %v2630_v21 = vpack.c.bf16 %v2596_v19, %v2594_v38  ;;  %2856 = vmatpush1.bf16.msra.mxu0 %v4890_v37  ;;  %v2519_v39 = vadd.f32 %v2518_v20, %v2386_v58  ;;  %v2597_v35 = vmax.f32 %v2517_v61, 0.0  ;;  %v2404_v37 = vadd.f32 %v6285_v2, %v6328_v16  ;;  %v4898_v19 = vld [vmem:[%s6860_s7 + $0x10] sm:$0xff]   ;;  %v4899_v61 = vld [vmem:[%s6860_s7 + $0x160] sm:$0xff]  }
 0x401   :  { %v2520_v47 = vpop.f32.mrf.mxu1  ;;  %2857 = vmatprep.subr.bf16.mxu0 %v5020_v13 }
 0x402   :  { %v2521_v27 = vadd.f32 %v2520_v47, %v2388_v60  ;;  %4409 = vmatprep.mubr.msk.bf16.mxu1 %vm349_vm0, %v2630_v21  ;;  %v2598_v44 = vmax.f32 %v2519_v39, 0.0  ;;  %v4901_v39 = vld [vmem:[%s6860_s7 + $0x158] sm:$0xff]  }
 0x403   :  { %v2522_v31 = vpop.f32.mrf.mxu1  ;;  %3011 = vmatmul.mubr.bf16.vlgmr.msra.gmra.mxu1 %v2629_v14 }
 0x404   :  { %v2599_v30 = vmax.f32 %v2521_v27, 0.0  ;;  %v2523_v49 = vadd.f32 %v2522_v31, %v2390_v42  ;;  %2858 = vmatpush1.bf16.msra.mxu0 %v4892_v50  ;;  %3233 = vmatpush1.bf16.msra.mxu1 %v4893_v23  ;;  %v2406_v50 = vadd.f32 %v6287_v3, %v6334_v18  ;;  %v2408_v23 = vadd.f32 %v6289_v4, %v6328_v16  ;;  %v4900_v42 = vld [vmem:[%s6860_s7 + $0x8] sm:$0xff]  }
 0x405   :  { %v2526_v40 = vpop.f32.mrf.mxu1  ;;  %2859 = vmatprep.subr.bf16.mxu0 %v5020_v13  ;;  %3234 = vmatprep.subr.bf16.mxu1 %v5020_v13  ;;  %v2410_v3 = vadd.f32 %v6291_v63, %v6334_v18  ;;  %v2414_v63 = vadd.f32 %v6293_v6, %v6328_v16  ;;  %v4904_v6 = vld [vmem:[%s6860_s7 + $0x48] sm:$0xff]  }
 0x406   :  { %v6389_v29 = vpack.c.bf16 %v2599_v30, %v2597_v35  ;;  %v2600_v7 = vmax.f32 %v2523_v49, 0.0  ;;  %v2527_v45 = vadd.f32 %v2526_v40, %v2394_v26  ;;  %v4903_v40 = vld [vmem:[%s6860_s7 + $0x150] sm:$0xff]  }
 0x407   :  { %v2528_v53 = vpop.f32.mrf.mxu1 }
 0x408   :  { %v6395_v1 = vpack.c.bf16 %v2600_v7, %v2598_v44  ;;  %2860 = vmatpush1.bf16.msra.mxu0 %v4894_v43  ;;  %3235 = vmatpush1.bf16.msra.mxu1 %v4895_v51  ;;  %v2529_v32 = vadd.f32 %v2528_v53, %v2396_v36  ;;  %v2601_v57 = vmax.f32 %v2527_v45, 0.0  ;;  %v4902_v51 = vld [vmem:[%s6860_s7] sm:$0xff]   ;;  %v2416_v53 = vadd.f32 %v6295_v8, %v6334_v18 }
 0x409   :  { %v2530_v54 = vpop.f32.mrf.mxu1  ;;  %2861 = vmatprep.subr.bf16.mxu0 %v5020_v13  ;;  %3236 = vmatprep.subr.bf16.mxu1 %v5020_v13  ;;  %v2418_v45 = vadd.f32 %v6297_v9, %v6328_v16  ;;  %v2420_v8 = vadd.f32 %v6299_v10, %v6334_v18 }
 0x40a   :  { %v2531_v41 = vadd.f32 %v2530_v54, %v2398_v24  ;;  %v2602_v20 = vmax.f32 %v2529_v32, 0.0  ;;  %v4905_v54 = vld [vmem:[%s6860_s7 + $0x148] sm:$0xff]  }
 0x40b   :  { %v2532_v48 = vpop.f32.mrf.mxu1 }
 0x40c   :  { %v2603_v38 = vmax.f32 %v2531_v41, 0.0  ;;  %v2533_v14 = vadd.f32 %v2532_v48, %v2400_v55  ;;  %2862 = vmatpush1.bf16.msra.mxu0 %v4896_v59  ;;  %3237 = vmatpush1.bf16.msra.mxu1 %v4897_v56  ;;  %v2424_v48 = vadd.f32 %v6301_v28, %v6328_v16 }
 0x40d   :  { %v2536_v62 = vpop.f32.mrf.mxu1  ;;  %2863 = vmatprep.subr.bf16.mxu0 %v5020_v13  ;;  %3238 = vmatprep.subr.bf16.mxu1 %v5020_v13 }
 0x40e   :  { %v6417_v2 = vpack.c.bf16 %v2603_v38, %v2601_v57  ;;  %v2604_v58 = vmax.f32 %v2533_v14, 0.0  ;;  %v2537_v60 = vadd.f32 %v2536_v62, %v2404_v37  ;;  %v4906_v14 = vld [vmem:[%s6860_s7 + $0x40] sm:$0xff]  }
 0x40f   :  { %v2538_v21 = vpop.f32.mrf.mxu1 }
 0x410   :  { %v2634_v47 = vpack.c.bf16 %v2604_v58, %v2602_v20  ;;  %2864 = vmatpush1.bf16.msra.mxu0 %v4898_v19  ;;  %3239 = vmatpush1.bf16.msra.mxu1 %v4899_v61  ;;  %v2539_v4 = vadd.f32 %v2538_v21, %v2406_v50  ;;  %v2605_v30 = vmax.f32 %v2537_v60, 0.0  ;;  %v4907_v19 = vld [vmem:[%s6860_s7 + $0x140] sm:$0xff]   ;;  %v2426_v60 = vadd.f32 %v6303_v33, %v6334_v18 }
 0x411   :  { %v2540_v27 = vpop.f32.mrf.mxu1  ;;  %2865 = vmatprep.subr.bf16.mxu0 %v5020_v13  ;;  %3240 = vmatprep.subr.bf16.mxu1 %v5020_v13  ;;  %v2428_v21 = vadd.f32 %v6305_v5, %v6328_v16  ;;  %v2430_v33 = vadd.f32 %v6307_v34, %v6334_v18  ;;  %v4911_v34 = vld [vmem:[%s6860_s7 + $0x180] sm:$0xff]  }
 0x412   :  { %v2541_v31 = vadd.f32 %v2540_v27, %v2408_v23  ;;  %4471 = vmatprep.mubr.msk.bf16.mxu1 %vm349_vm0, %v2634_v47  ;;  %v2606_v44 = vmax.f32 %v2539_v4, 0.0  ;;  %v4908_v23 = vld [vmem:[%s6860_s7 + $0x128] sm:$0xff]  }
 0x413   :  { %v2542_v35 = vpop.f32.mrf.mxu1 }
 0x414   :  { %v2607_v49 = vmax.f32 %v2541_v31, 0.0  ;;  %v2543_v43 = vadd.f32 %v2542_v35, %v2410_v3  ;;  %2866 = vmatpush1.bf16.msra.mxu0 %v4900_v42  ;;  %3241 = vmatpush1.bf16.msra.mxu1 %v4901_v39  ;;  %v4909_v42 = vld [vmem:[%s6860_s7 + $0x188] sm:$0xff]   ;;  %v4910_v35 = vld [vmem:[%s6860_s7 + $0x120] sm:$0xff]  }
 0x415   :  { %v2546_v26 = vpop.f32.mrf.mxu1  ;;  %2867 = vmatprep.subr.bf16.mxu0 %v5020_v13  ;;  %3242 = vmatprep.subr.bf16.mxu1 %v5020_v13 }
 0x416   :  { %v6444_v7 = vpack.c.bf16 %v2607_v49, %v2605_v30  ;;  %v2608_v36 = vmax.f32 %v2543_v43, 0.0  ;;  %v2547_v56 = vadd.f32 %v2546_v26, %v2414_v63  ;;  %v2438_v26 = vadd.f32 %v6313_v11, %v6328_v16 }
 0x417   :  { %v2548_v24 = vpop.f32.mrf.mxu1 }
 0x418   :  { %v6450_v59 = vpack.c.bf16 %v2608_v36, %v2606_v44  ;;  %2868 = vmatpush1.bf16.msra.mxu0 %v4902_v51  ;;  %3243 = vmatpush1.bf16.msra.mxu1 %v4903_v40  ;;  %v2549_v9 = vadd.f32 %v2548_v24, %v2416_v53  ;;  %v2609_v37 = vmax.f32 %v2547_v56, 0.0  ;;  %v2436_v40 = vadd.f32 %v6311_v22, %v6334_v18  ;;  %v4913_v53 = vld [vmem:[%s6860_s7 + $0x218] sm:$0xff]  }
 0x419   :  { %v2550_v55 = vpop.f32.mrf.mxu1  ;;  %2881 = vmatprep.subr.bf16.mxu0 %v5020_v13  ;;  %3244 = vmatprep.subr.bf16.mxu1 %v5020_v13  ;;  %v2440_v22 = vadd.f32 %v6315_v25, %v6334_v18  ;;  %v4915_v25 = vld [vmem:[%s6860_s7 + $0x210] sm:$0xff]  }
 0x41a   :  { %v2551_v32 = vadd.f32 %v2550_v55, %v2418_v45  ;;  %v2610_v61 = vmax.f32 %v2549_v9, 0.0  ;;  %v4914_v55 = vld [vmem:[%s6860_s7 + $0x110] sm:$0xff]   ;;  %v2444_v9 = vadd.f32 %v6317_v12, %v6328_v16  ;;  %v4916_v12 = vld [vmem:[%s6860_s7 + $0x108] sm:$0xff]  }
 0x41b   :  { %v2552_v41 = vpop.f32.mrf.mxu1 }
 0x41c   :  { %v2611_v57 = vmax.f32 %v2551_v32, 0.0  ;;  %v2553_v38 = vadd.f32 %v2552_v41, %v2420_v8  ;;  %2882 = vmatpush2.bf16.msra.mxu0 %v4904_v6  ;;  %3245 = vmatpush1.bf16.msra.mxu1 %v4905_v54 }
 0x41d   :  { %v2556_v10 = vpop.f32.mrf.mxu1  ;;  %2883 = vmatprep.subr.bf16.mxu0 %v5020_v13  ;;  %3246 = vmatprep.subr.bf16.mxu1 %v5020_v13 }
 0x41e   :  { %v6472_v28 = vpack.c.bf16 %v2611_v57, %v2609_v37  ;;  %v2612_v62 = vmax.f32 %v2553_v38, 0.0  ;;  %v2557_v20 = vadd.f32 %v2556_v10, %v2424_v48  ;;  %v2446_v37 = vadd.f32 %v6322_v15, %v6334_v18  ;;  %v4917_v10 = vld [vmem:[%s6860_s7 + $0x208] sm:$0xff]  }
 0x41f   :  { %v2558_v58 = vpop.f32.mrf.mxu1  ;;  %v2448_v57 = vadd.f32 %v6324_v52, %v6328_v16  ;;  %v2450_v15 = vadd.f32 %v6330_v0, %v6334_v18  ;;  %v4919_v0 = vld [vmem:[%s6860_s7 + $0x200] sm:$0xff]  }
 0x420   :  { %v2638_v50 = vpack.c.bf16 %v2612_v62, %v2610_v61  ;;  %2884 = vmatpush2.bf16.msra.mxu0 %v4906_v14  ;;  %3247 = vmatpush1.bf16.msra.mxu1 %v4907_v19  ;;  %v2559_v5 = vadd.f32 %v2558_v58, %v2426_v60  ;;  %v2613_v3 = vmax.f32 %v2557_v20, 0.0  ;;  %v4918_v60 = vld [vmem:[%s6860_s7 + $0x100] sm:$0xff]  }
 0x421   :  { %v2560_v47 = vpop.f32.mrf.mxu1  ;;  %3105 = vmatprep.subr.bf16.mxu0 %v5020_v13  ;;  %3260 = vmatprep.subr.bf16.mxu1 %v5020_v13 }
 0x422   :  { %v2561_v39 = vadd.f32 %v2560_v47, %v2428_v21  ;;  %v2614_v49 = vmax.f32 %v2559_v5, 0.0  ;;  %v4920_v47 = vld [vmem:[%s6860_s7 + $0xf8] sm:$0xff]   ;;  %v4923_v5 = vld [vmem:[%s6860_s7 + $0x1f0] sm:$0xff]  }
 0x423   :  { %2886 = vmatmul.mubr.bf16.vlgmr.msra.gmra.mxu0 %v6341_v17  ;;  %v2562_v27 = vpop.f32.mrf.mxu1  ;;  %v2434_v17 = vadd.f32 %v6309_v46, %v6328_v16  ;;  %v4912_v46 = vld [vmem:[%s6860_s7 + $0x118] sm:$0xff]  }
 0x424   :  { %v2615_v4 = vmax.f32 %v2561_v39, 0.0  ;;  %v2563_v31 = vadd.f32 %v2562_v27, %v2430_v33  ;;  %3106 = vmatpush1.bf16.msra.mxu0 %v4908_v23  ;;  %4440 = vmatprep.mubr.msk.bf16.mxu0 %vm349_vm0, %v6395_v1  ;;  %v4922_v33 = vld [vmem:[%s6860_s7 + $0xf0] sm:$0xff]   ;;  %v4924_v39 = vld [vmem:[%s6860_s7 + $0x138] sm:$0xff]   ;;  %v4925_v27 = vld [vmem:[%s6860_s7 + $0x1e8] sm:$0xff]  }
 0x425   :  { %3261 = vmatpush2.bf16.msra.mxu1 %v4909_v42  ;;  %v2566_v30 = vpop.f32.mrf.mxu1  ;;  %3107 = vmatprep.subr.bf16.mxu0 %v5020_v13  ;;  %v4921_v42 = vld [vmem:[%s6860_s7 + $0x1f8] sm:$0xff]  }
 0x426   :  { %v6500_v43 = vpack.c.bf16 %v2615_v4, %v2613_v3  ;;  %v2616_v51 = vmax.f32 %v2563_v31, 0.0  ;;  %3262 = vmatprep.subr.bf16.mxu1 %v5020_v13  ;;  %v2567_v44 = vadd.f32 %v2566_v30, %v2434_v17  ;;  %v4926_v3 = vld [vmem:[%s6860_s7 + $0x130] sm:$0xff]   ;;  %v4927_v4 = vld [vmem:[%s6860_s7 + $0x1e0] sm:$0xff]   ;;  %v4928_v31 = vld [vmem:[%s6860_s7 + $0x1c8] sm:$0xff]  }
 0x427   :  { %v2568_v1 = vpop.f32.mrf.mxu1  ;;  %v4930_v30 = vld [vmem:[%s6860_s7 + $0x1c0] sm:$0xff]   ;;  %v4934_v17 = vld [vmem:[%s6860_s7 + $0x1b0] sm:$0xff]  }
 0x428   :  { %v6507_v63 = vpack.c.bf16 %v2616_v51, %v2614_v49  ;;  %3108 = vmatpush1.bf16.msra.mxu0 %v4910_v35  ;;  %v2569_v11 = vadd.f32 %v2568_v1, %v2436_v40  ;;  %v2617_v56 = vmax.f32 %v2567_v44, 0.0  ;;  %v4929_v35 = vld [vmem:[%s6860_s7 + $0x228] sm:$0xff]   ;;  %v4935_v49 = vld [vmem:[%s6860_s7 + $0x2b0] sm:$0xff]   ;;  %v4938_v1 = vld [vmem:[%s6860_s7 + $0x1a0] sm:$0xff]  }
 0x429   :  { %3263 = vmatpush2.bf16.msra.mxu1 %v4911_v34  ;;  %v2570_v36 = vpop.f32.mrf.mxu1  ;;  %3109 = vmatprep.subr.bf16.mxu0 %v5020_v13  ;;  %v4931_v34 = vld [vmem:[%s6860_s7 + $0x220] sm:$0xff]   ;;  %v4937_v51 = vld [vmem:[%s6860_s7 + $0x2a8] sm:$0xff]   ;;  %v4941_v44 = vld [vmem:[%s6860_s7 + $0x298] sm:$0xff]  }
 0x42a   :  { %v2571_v24 = vadd.f32 %v2570_v36, %v2438_v26  ;;  %3486 = vmatprep.subr.bf16.mxu1 %v5020_v13  ;;  %v2618_v32 = vmax.f32 %v2569_v11, 0.0  ;;  %v4939_v40 = vld [vmem:[%s6860_s7 + $0x2a0] sm:$0xff]   ;;  %v4940_v26 = vld [vmem:[%s6860_s7 + $0x198] sm:$0xff]   ;;  %v4943_v36 = vld [vmem:[%s6860_s7 + $0x290] sm:$0xff]  }
 0x42b   :  { %v2572_v45 = vpop.f32.mrf.mxu1  ;;  %v4946_v11 = vld [vmem:[%s6860_s7 + $0x1d0] sm:$0xff]  }
 0x42c   :  { %v2619_v6 = vmax.f32 %v2571_v24, 0.0  ;;  %3265 = vmatmul.mubr.bf16.vlgmr.msra.gmra.mxu1 %v6417_v2  ;;  %v2573_v54 = vadd.f32 %v2572_v45, %v2440_v22  ;;  %3110 = vmatpush1.bf16.msra.mxu0 %v4912_v46  ;;  %v4942_v46 = vld [vmem:[%s6860_s7 + $0x190] sm:$0xff]   ;;  %v4945_v22 = vld [vmem:[%s6860_s7 + $0x288] sm:$0xff]   ;;  %v4947_v24 = vld [vmem:[%s6860_s7 + $0x280] sm:$0xff]  }
 0x42d   :  { %3487 = vmatpush1.bf16.msra.mxu1 %v4913_v53  ;;  %4533 = vmatprep.mubr.msk.bf16.mxu1 %vm349_vm0, %v2638_v50  ;;  %v2576_v8 = vpop.f32.mrf.mxu1  ;;  %v4944_v53 = vld [vmem:[%s6860_s7 + $0x1d8] sm:$0xff]   ;;  %v4948_v45 = vld [vmem:[%s6860_s7 + $0x268] sm:$0xff]  }
 0x42e   :  { %v6529_v41 = vpack.c.bf16 %v2619_v6, %v2617_v56  ;;  %v2620_v2 = vmax.f32 %v2573_v54, 0.0  ;;  %3111 = vmatprep.subr.bf16.mxu0 %v5020_v13  ;;  %3488 = vmatprep.subr.bf16.mxu1 %v5020_v13  ;;  %v2577_v14 = vadd.f32 %v2576_v8, %v2444_v9  ;;  %v4949_v56 = vld [vmem:[%s6860_s7 + $0x2c8] sm:$0xff]   ;;  %v4950_v6 = vld [vmem:[%s6860_s7 + $0x260] sm:$0xff]   ;;  %v4957_v9 = vld [vmem:[%s6860_s7 + $0x230] sm:$0xff]  }
 0x42f   :  { %v2578_v48 = vpop.f32.mrf.mxu1  ;;  %v4951_v54 = vld [vmem:[%s6860_s7 + $0x2c0] sm:$0xff]  }
 0x430   :  { %v6537_v38 = vpack.c.bf16 %v2620_v2, %v2618_v32  ;;  %3112 = vmatpush1.bf16.msra.mxu0 %v4914_v55  ;;  %v2579_v52 = vadd.f32 %v2578_v48, %v2446_v37  ;;  %v2621_v62 = vmax.f32 %v2577_v14, 0.0  ;;  %v4954_v55 = vld [vmem:[%s6860_s7 + $0x248] sm:$0xff]   ;;  %v4955_v8 = vld [vmem:[%s6860_s7 + $0x240] sm:$0xff]   ;;  %v4958_v32 = vld [vmem:[%s6860_s7 + $0x278] sm:$0xff]  }
 0x431   :  { %3489 = vmatpush1.bf16.msra.mxu1 %v4915_v25  ;;  %v2580_v19 = vpop.f32.mrf.mxu1  ;;  %3113 = vmatprep.subr.bf16.mxu0 %v5020_v13  ;;  %v4956_v25 = vld [vmem:[%s6860_s7 + $0x238] sm:$0xff]   ;;  %v4960_v2 = vld [vmem:[%s6860_s7 + $0x308] sm:$0xff]   ;;  %v4961_v48 = vld [vmem:[%s6860_s7 + $0x300] sm:$0xff]  }
 0x432   :  { %v2581_v16 = vadd.f32 %v2580_v19, %v2448_v57  ;;  %3490 = vmatprep.subr.bf16.mxu1 %v5020_v13  ;;  %v2622_v18 = vmax.f32 %v2579_v52, 0.0  ;;  %v4962_v37 = vld [vmem:[%s6860_s7 + $0x2f8] sm:$0xff]   ;;  %v4964_v57 = vld [vmem:[%s6860_s7 + $0x2e8] sm:$0xff]  }
 0x433   :  { %v2582_v61 = vpop.f32.mrf.mxu1  ;;  %v4966_v14 = vld [vmem:[%s6860_s7 + $0x2d8] sm:$0xff]  }
 0x434   :  { %v2623_v20 = vmax.f32 %v2581_v16, 0.0  ;;  %v2583_v58 = vadd.f32 %v2582_v61, %v2450_v15  ;;  %3114 = vmatpush1.bf16.msra.mxu0 %v4916_v12  ;;  %v4967_v12 = vld [vmem:[%s6860_s7 + $0x2d0] sm:$0xff]   ;;  %v4968_v19 = vld [vmem:[%s6860_s7 + $0x318] sm:$0xff]  }
 0x435   :  { %3491 = vmatpush1.bf16.msra.mxu1 %v4917_v10  ;;  %3115 = vmatprep.subr.bf16.mxu0 %v5020_v13  ;;  %v4969_v15 = vld [vmem:[%s6860_s7 + $0x310] sm:$0xff]  }
 0x436   :  { %v6556_v21 = vpack.c.bf16 %v2623_v20, %v2621_v62  ;;  %v2624_v50 = vmax.f32 %v2583_v58, 0.0  ;;  %3492 = vmatprep.subr.bf16.mxu1 %v5020_v13 }
 0x438   :  { %v6559_v23 = vpack.c.bf16 %v2624_v50, %v2622_v18  ;;  %3116 = vmatpush1.bf16.msra.mxu0 %v4918_v60  ;;  %v5025_v18 = vmov 0.0  }
 0x439   :  { %3493 = vmatpush1.bf16.msra.mxu1 %v4919_v0  ;;  %3117 = vmatprep.subr.bf16.mxu0 %v5020_v13  ;;  %v4970_v0 = vld [vmem:[%s6862_s9 + $0x38] sm:$0xff]  }
 0x43a   :  { %3494 = vmatprep.subr.bf16.mxu1 %v5020_v13 }
 0x43c   :  { %3118 = vmatpush1.bf16.msra.mxu0 %v4920_v47 }
 0x43d   :  { %3495 = vmatpush1.bf16.msra.mxu1 %v4921_v42  ;;  %3119 = vmatprep.subr.bf16.mxu0 %v5020_v13 }
 0x43e   :  { %3496 = vmatprep.subr.bf16.mxu1 %v5020_v13 }
 0x440   :  { %3120 = vmatpush1.bf16.msra.mxu0 %v4922_v33  ;;  %v4972_v33 = vld [vmem:[%s6862_s9 + $0x28] sm:$0xff]  }
 0x441   :  { %3497 = vmatpush1.bf16.msra.mxu1 %v4923_v5  ;;  %3133 = vmatprep.subr.bf16.mxu0 %v5020_v13 }
 0x442   :  { %3498 = vmatprep.subr.bf16.mxu1 %v5020_v13 }
 0x444   :  { %3134 = vmatpush2.bf16.msra.mxu0 %v4924_v39 }
 0x445   :  { %3499 = vmatpush1.bf16.msra.mxu1 %v4925_v27  ;;  %3135 = vmatprep.subr.bf16.mxu0 %v5020_v13 }
 0x446   :  { %3500 = vmatprep.subr.bf16.mxu1 %v5020_v13 }
 0x448   :  { %3136 = vmatpush2.bf16.msra.mxu0 %v4926_v3  ;;  %v4973_v3 = vld [vmem:[%s6862_s9 + $0x20] sm:$0xff]  }
 0x449   :  { %3501 = vmatpush1.bf16.msra.mxu1 %v4927_v4  ;;  %3359 = vmatprep.subr.bf16.mxu0 %v5020_v13 }
 0x44a   :  { %3514 = vmatprep.subr.bf16.mxu1 %v5020_v13 }
 0x44b   :  { %3138 = vmatmul.mubr.bf16.vlgmr.msra.gmra.mxu0 %v6389_v29  ;;  %v4932_v29 = vld [vmem:[%s6860_s7 + $0x1b8] sm:$0xff]  }
 0x44c   :  { %3360 = vmatpush1.bf16.msra.mxu0 %v4928_v31  ;;  %4502 = vmatprep.mubr.msk.bf16.mxu0 %vm349_vm0, %v6450_v59  ;;  %v4933_v59 = vld [vmem:[%s6860_s7 + $0x2b8] sm:$0xff]  }
 0x44d   :  { %3515 = vmatpush2.bf16.msra.mxu1 %v4929_v35  ;;  %3361 = vmatprep.subr.bf16.mxu0 %v5020_v13  ;;  %v4974_v35 = vld [vmem:[%s6862_s9 + $0x18] sm:$0xff]  }
 0x44e   :  { %3516 = vmatprep.subr.bf16.mxu1 %v5020_v13 }
 0x450   :  { %3362 = vmatpush1.bf16.msra.mxu0 %v4930_v30 }
 0x451   :  { %3517 = vmatpush2.bf16.msra.mxu1 %v4931_v34  ;;  %3363 = vmatprep.subr.bf16.mxu0 %v5020_v13 }
 0x452   :  { %3740 = vmatprep.subr.bf16.mxu1 %v5020_v13 }
 0x454   :  { %3519 = vmatmul.mubr.bf16.vlgmr.msra.gmra.mxu1 %v6472_v28  ;;  %3364 = vmatpush1.bf16.msra.mxu0 %v4932_v29  ;;  %v4936_v28 = vld [vmem:[%s6860_s7 + $0x1a8] sm:$0xff]   ;;  %v4975_v29 = vld [vmem:[%s6862_s9 + $0x10] sm:$0xff]  }
 0x455   :  { %3741 = vmatpush1.bf16.msra.mxu1 %v4933_v59  ;;  %4595 = vmatprep.mubr.msk.bf16.mxu1 %vm349_vm0, %v6537_v38  ;;  %v4965_v38 = vld [vmem:[%s6860_s7 + $0x2e0] sm:$0xff]   ;;  %v4976_v59 = vld [vmem:[%s6862_s9 + $0x8] sm:$0xff]  }
 0x456   :  { %3365 = vmatprep.subr.bf16.mxu0 %v5020_v13  ;;  %3742 = vmatprep.subr.bf16.mxu1 %v5020_v13 }
 0x458   :  { %3366 = vmatpush1.bf16.msra.mxu0 %v4934_v17 }
 0x459   :  { %3743 = vmatpush1.bf16.msra.mxu1 %v4935_v49  ;;  %3367 = vmatprep.subr.bf16.mxu0 %v5020_v13 }
 0x45a   :  { %3744 = vmatprep.subr.bf16.mxu1 %v5020_v13 }
 0x45c   :  { %3368 = vmatpush1.bf16.msra.mxu0 %v4936_v28  ;;  %v4977_v28 = vld [vmem:[%s6862_s9] sm:$0xff]  }
 0x45d   :  { %3745 = vmatpush1.bf16.msra.mxu1 %v4937_v51  ;;  %3369 = vmatprep.subr.bf16.mxu0 %v5020_v13 }
 0x45e   :  { %3746 = vmatprep.subr.bf16.mxu1 %v5020_v13 }
 0x460   :  { %3370 = vmatpush1.bf16.msra.mxu0 %v4938_v1 }
 0x461   :  { %3747 = vmatpush1.bf16.msra.mxu1 %v4939_v40  ;;  %3371 = vmatprep.subr.bf16.mxu0 %v5020_v13 }
 0x462   :  { %3748 = vmatprep.subr.bf16.mxu1 %v5020_v13 }
 0x464   :  { %3372 = vmatpush1.bf16.msra.mxu0 %v4940_v26 }
 0x465   :  { %3749 = vmatpush1.bf16.msra.mxu1 %v4941_v44  ;;  %3373 = vmatprep.subr.bf16.mxu0 %v5020_v13  ;;  %v4978_v44 = vld [vmem:[%s6864_s11 + $0x38] sm:$0xff]  }
 0x466   :  { %3750 = vmatprep.subr.bf16.mxu1 %v5020_v13 }
 0x468   :  { %3374 = vmatpush1.bf16.msra.mxu0 %v4942_v46 }
 0x469   :  { %3751 = vmatpush1.bf16.msra.mxu1 %v4943_v36  ;;  %3387 = vmatprep.subr.bf16.mxu0 %v5020_v13 }
 0x46a   :  { %3752 = vmatprep.subr.bf16.mxu1 %v5020_v13 }
 0x46c   :  { %3388 = vmatpush2.bf16.msra.mxu0 %v4944_v53  ;;  %v4979_v53 = vld [vmem:[%s6864_s11 + $0x30] sm:$0xff]  }
 0x46d   :  { %3753 = vmatpush1.bf16.msra.mxu1 %v4945_v22  ;;  %3389 = vmatprep.subr.bf16.mxu0 %v5020_v13 }
 0x46e   :  { %3754 = vmatprep.subr.bf16.mxu1 %v5020_v13 }
 0x470   :  { %3390 = vmatpush2.bf16.msra.mxu0 %v4946_v11 }
 0x471   :  { %3755 = vmatpush1.bf16.msra.mxu1 %v4947_v24  ;;  %3613 = vmatprep.subr.bf16.mxu0 %v5020_v13  ;;  %v4980_v24 = vld [vmem:[%s6864_s11 + $0x28] sm:$0xff]  }
 0x472   :  { %3768 = vmatprep.subr.bf16.mxu1 %v5020_v13 }
 0x473   :  { %3392 = vmatmul.mubr.bf16.vlgmr.msra.gmra.mxu0 %v6444_v7  ;;  %v4952_v7 = vld [vmem:[%s6860_s7 + $0x258] sm:$0xff]  }
 0x474   :  { %3614 = vmatpush1.bf16.msra.mxu0 %v4948_v45  ;;  %4564 = vmatprep.mubr.msk.bf16.mxu0 %vm349_vm0, %v6507_v63  ;;  %v4953_v63 = vld [vmem:[%s6860_s7 + $0x250] sm:$0xff]  }
 0x475   :  { %3769 = vmatpush2.bf16.msra.mxu1 %v4949_v56  ;;  %3615 = vmatprep.subr.bf16.mxu0 %v5020_v13 }
 0x476   :  { %3770 = vmatprep.subr.bf16.mxu1 %v5020_v13 }
 0x478   :  { %3616 = vmatpush1.bf16.msra.mxu0 %v4950_v6  ;;  %v4981_v6 = vld [vmem:[%s6864_s11 + $0x20] sm:$0xff]  }
 0x479   :  { %3771 = vmatpush2.bf16.msra.mxu1 %v4951_v54  ;;  %3617 = vmatprep.subr.bf16.mxu0 %v5020_v13  ;;  %v4982_v54 = vld [vmem:[%s6864_s11 + $0x18] sm:$0xff]  }
 0x47a   :  { %4664 = vmatprep.subr.bf16.mxu1 %v5025_v18 }
 0x47c   :  { %3773 = vmatmul.mubr.bf16.vlgmr.msra.gmra.mxu1 %v6529_v41  ;;  %3618 = vmatpush1.bf16.msra.mxu0 %v4952_v7  ;;  %v4959_v41 = vld [vmem:[%s6860_s7 + $0x270] sm:$0xff]  }
 0x47d   :  { %3619 = vmatprep.subr.bf16.mxu0 %v5020_v13  ;;  %4665 = vmatpush3.bf16.msra.mxu1 %v4970_v0 }
 0x47e   :  { %4666 = vmatprep.subr.bf16.mxu1 %v5025_v18  ;;  %4680 = vmatprep.mubr.msk.bf16.mxu1 %vm5026_vm10, %v5025_v18 }
 0x480   :  { %3620 = vmatpush1.bf16.msra.mxu0 %v4953_v63 }
 0x481   :  { %3621 = vmatprep.subr.bf16.mxu0 %v5020_v13 }
 0x484   :  { %3622 = vmatpush1.bf16.msra.mxu0 %v4954_v55 }
 0x485   :  { %3623 = vmatprep.subr.bf16.mxu0 %v5020_v13 }
 0x488   :  { %3624 = vmatpush1.bf16.msra.mxu0 %v4955_v8 }
 0x489   :  { %3625 = vmatprep.subr.bf16.mxu0 %v5020_v13 }
 0x48c   :  { %3626 = vmatpush1.bf16.msra.mxu0 %v4956_v25 }
 0x48d   :  { %3627 = vmatprep.subr.bf16.mxu0 %v5020_v13 }
 0x490   :  { %3628 = vmatpush1.bf16.msra.mxu0 %v4957_v9 }
 0x491   :  { %3641 = vmatprep.subr.bf16.mxu0 %v5020_v13 }
 0x494   :  { %3642 = vmatpush2.bf16.msra.mxu0 %v4958_v32 }
 0x495   :  { %3643 = vmatprep.subr.bf16.mxu0 %v5020_v13 }
 0x498   :  { %3644 = vmatpush2.bf16.msra.mxu0 %v4959_v41 }
 0x499   :  { %3867 = vmatprep.subr.bf16.mxu0 %v5020_v13 }
 0x49b   :  { %3646 = vmatmul.mubr.bf16.vlgmr.msra.gmra.mxu0 %v6500_v43  ;;  %v4963_v43 = vld [vmem:[%s6860_s7 + $0x2f0] sm:$0xff]  }
 0x49c   :  { %3868 = vmatpush1.bf16.msra.mxu0 %v4960_v2  ;;  %4626 = vmatprep.mubr.msk.bf16.mxu0 %vm349_vm0, %v6559_v23 }
 0x49d   :  { %3869 = vmatprep.subr.bf16.mxu0 %v5020_v13 }
 0x4a0   :  { %3870 = vmatpush1.bf16.msra.mxu0 %v4961_v48 }
 0x4a1   :  { %3871 = vmatprep.subr.bf16.mxu0 %v5020_v13 }
 0x4a4   :  { %3872 = vmatpush1.bf16.msra.mxu0 %v4962_v37 }
 0x4a5   :  { %3873 = vmatprep.subr.bf16.mxu0 %v5020_v13 }
 0x4a8   :  { %3874 = vmatpush1.bf16.msra.mxu0 %v4963_v43 }
 0x4a9   :  { %3875 = vmatprep.subr.bf16.mxu0 %v5020_v13 }
 0x4ac   :  { %3876 = vmatpush1.bf16.msra.mxu0 %v4964_v57 }
 0x4ad   :  { %3877 = vmatprep.subr.bf16.mxu0 %v5020_v13 }
 0x4b0   :  { %3878 = vmatpush1.bf16.msra.mxu0 %v4965_v38 }
 0x4b1   :  { %3879 = vmatprep.subr.bf16.mxu0 %v5020_v13 }
 0x4b4   :  { %3880 = vmatpush1.bf16.msra.mxu0 %v4966_v14 }
 0x4b5   :  { %3881 = vmatprep.subr.bf16.mxu0 %v5020_v13 }
 0x4b8   :  { %3882 = vmatpush1.bf16.msra.mxu0 %v4967_v12 }
 0x4b9   :  { %3895 = vmatprep.subr.bf16.mxu0 %v5020_v13 }
 0x4bb   :  { %v2783_v10 = vpop.f32.mrf.mxu0 }
 0x4bc   :  { %3896 = vmatpush2.bf16.msra.mxu0 %v4968_v19 }
 0x4bd   :  { %v2785_v52 = vpop.f32.mrf.mxu0  ;;  %3897 = vmatprep.subr.bf16.mxu0 %v5020_v13  ;;  %v4971_v13 = vld [vmem:[%s6862_s9 + $0x30] sm:$0xff]  }
 0x4be   :  { %4667 = vmatpush3.bf16.msra.mxu1 %v4971_v13 }
 0x4bf   :  { %v2786_v16 = vpop.f32.mrf.mxu0  ;;  %4668 = vmatprep.subr.bf16.mxu1 %v5025_v18 }
 0x4c0   :  { %3898 = vmatpush2.bf16.msra.mxu0 %v4969_v15 }
 0x4c1   :  { %v2788_v61 = vpop.f32.mrf.mxu0  ;;  %4684 = vmatprep.subr.bf16.mxu0 %v5025_v18 }
 0x4c2   :  { %4669 = vmatpush3.bf16.msra.mxu1 %v4972_v33  ;;  %v4984_v33 = vld [vmem:[%s6864_s11 + $0x8] sm:$0xff]  }
 0x4c3   :  { %3900 = vmatmul.mubr.bf16.vlgmr.msra.gmra.mxu0 %v6556_v21  ;;  %v3012_v62 = vpop.f32.mrf.mxu1  ;;  %4670 = vmatprep.subr.bf16.mxu1 %v5025_v18 }
 0x4c4   :  { %4700 = vmatprep.mubr.msk.bf16.mxu0 %vm5026_vm10, %v5025_v18  ;;  %4685 = vmatpush3.bf16.msra.mxu0 %v4978_v44 }
 0x4c5   :  { %v3014_v20 = vpop.f32.mrf.mxu1  ;;  %4686 = vmatprep.subr.bf16.mxu0 %v5025_v18 }
 0x4c6   :  { %4671 = vmatpush3.bf16.msra.mxu1 %v4973_v3 }
 0x4c7   :  { %v3015_v58 = vpop.f32.mrf.mxu1  ;;  %4672 = vmatprep.subr.bf16.mxu1 %v5025_v18 }
 0x4c8   :  { %4687 = vmatpush3.bf16.msra.mxu0 %v4979_v53 }
 0x4c9   :  { %v3017_v60 = vpop.f32.mrf.mxu1  ;;  %4688 = vmatprep.subr.bf16.mxu0 %v5025_v18 }
 0x4ca   :  { %4673 = vmatpush3.bf16.msra.mxu1 %v4974_v35 }
 0x4cb   :  { %4674 = vmatprep.subr.bf16.mxu1 %v5025_v18 }
 0x4cc   :  { %4689 = vmatpush3.bf16.msra.mxu0 %v4980_v24 }
 0x4cd   :  { %4690 = vmatprep.subr.bf16.mxu0 %v5025_v18 }
 0x4ce   :  { %4675 = vmatpush3.bf16.msra.mxu1 %v4975_v29 }
 0x4cf   :  { %4676 = vmatprep.subr.bf16.mxu1 %v5025_v18 }
 0x4d0   :  { %4691 = vmatpush3.bf16.msra.mxu0 %v4981_v6 }
 0x4d1   :  { %4692 = vmatprep.subr.bf16.mxu0 %v5025_v18 }
 0x4d2   :  { %4677 = vmatpush3.bf16.msra.mxu1 %v4976_v59 }
 0x4d3   :  { %4678 = vmatprep.subr.bf16.mxu1 %v5025_v18 }
 0x4d4   :  { %4693 = vmatpush3.bf16.msra.mxu0 %v4982_v54 }
 0x4d5   :  { %4694 = vmatprep.subr.bf16.mxu0 %v5025_v18 }
 0x4d6   :  { %4679 = vmatpush3.bf16.msra.mxu1 %v4977_v28 }
 0x4e3   :  { %v2887_v50 = vpop.f32.mrf.mxu0 }
 0x4e4   :  { %v2888_v21 = vadd.f32 %v2887_v50, %v2783_v10 }
 0x4e5   :  { %v2889_v23 = vpop.f32.mrf.mxu0 }
 0x4e6   :  { %v3019_v47 = vadd.f32 %v3012_v62, %v2888_v21  ;;  %v4627_v62 = vld [vmem:[%s6861_s8] ss:$0 sm:$0xff] }
 0x4e7   :  { %v2890_v42 = vpop.f32.mrf.mxu0 }
 0x4e8   :  { %v2891_v5 = vadd.f32 %v2890_v42, %v2786_v16  ;;  %v4983_v42 = vld [vmem:[%s6864_s11 + $0x10] sm:$0xff]  }
 0x4e9   :  { %v2892_v39 = vpop.f32.mrf.mxu0  ;;  %4695 = vmatpush3.bf16.msra.mxu0 %v4983_v42 }
 0x4ea   :  { %v3020_v27 = vadd.f32 %v3015_v58, %v2891_v5  ;;  %4696 = vmatprep.subr.bf16.mxu0 %v5025_v18  ;;  %v4985_v5 = vld [vmem:[%s6864_s11] sm:$0xff]   ;;  %s5027_s11 = smov [#allocation2]  }
 0x4eb   :  { %v4628_v39 = vld [vmem:[%s6863_s10] ss:$0 sm:$0xff]  ;;  %s4156_s17 = sshll.u32 %s5027_s11, 4  ;;  %s4157_s17 = int_to_ptr.vmem [resolvable:$true] %s4156_s17 }
 0x4ec   :  { %v3266_v4 = vpop.f32.mrf.mxu1  ;;  %s4995_s10 = scalar_lea.vmem %s4157_s17, 256  ;;  %p5000_p1 = scmp.lt.s32.totalorder %s4157_s17, %s4157_s17 }
 0x4ed   :  { %4697 = vmatpush3.bf16.msra.mxu0 %v4984_v33  ;;  %p4996_p0 = scmp.ne.s32.totalorder %s4157_s17, %s4995_s10  ;;  %p5001_p2 = scmp.lt.s32.totalorder %s4995_s10, %s4995_s10 }
 0x4ee   :  { %v3268_v31 = vpop.f32.mrf.mxu1  ;;  %4698 = vmatprep.subr.bf16.mxu0 %v5025_v18  ;;  %v4637_v18 = vld [vmem:[%s6865_s12] ss:$0 sm:$0xff] }
 0x4ef   :  { %p5002_p3 = por %p5001_p2, %p5000_p1 }
 0x4f0   :  { %v3269_v30 = vpop.f32.mrf.mxu1 }
 0x4f1   :  { %4699 = vmatpush3.bf16.msra.mxu0 %v4985_v5  ;;  %p5003_p4 = pnand %p5002_p3, %p4996_p0 }
 0x4f2   :  { %v3271_v34 = vpop.f32.mrf.mxu1 }
 0x50b   :  { %v3139_v17 = vpop.f32.mrf.mxu0 }
 0x50c   :  { %v3146_v49 = vadd.f32 %v3139_v17, %v3019_v47 }
 0x50d   :  { %v3141_v51 = vpop.f32.mrf.mxu0 }
 0x50e   :  { %v3273_v1 = vadd.f32 %v3266_v4, %v3146_v49 }
 0x50f   :  { %v3142_v40 = vpop.f32.mrf.mxu0 }
 0x510   :  { %v3147_v26 = vadd.f32 %v3142_v40, %v3020_v27 }
 0x511   :  { %v3144_v46 = vpop.f32.mrf.mxu0 }
 0x512   :  { %v3274_v36 = vadd.f32 %v3269_v30, %v3147_v26 }
 0x514   :  { %v3520_v22 = vpop.f32.mrf.mxu1 }
 0x516   :  { %v3522_v11 = vpop.f32.mrf.mxu1 }
 0x518   :  { %v3523_v45 = vpop.f32.mrf.mxu1 }
 0x51a   :  { %v3525_v56 = vpop.f32.mrf.mxu1 }
 0x533   :  { %v3393_v7 = vpop.f32.mrf.mxu0 }
 0x534   :  { %v3400_v63 = vadd.f32 %v3393_v7, %v3273_v1 }
 0x535   :  { %v3395_v55 = vpop.f32.mrf.mxu0 }
 0x536   :  { %v3527_v8 = vadd.f32 %v3520_v22, %v3400_v63 }
 0x537   :  { %v3396_v25 = vpop.f32.mrf.mxu0 }
 0x538   :  { %v3401_v9 = vadd.f32 %v3396_v25, %v3274_v36 }
 0x539   :  { %v3398_v32 = vpop.f32.mrf.mxu0 }
 0x53a   :  { %v3528_v41 = vadd.f32 %v3523_v45, %v3401_v9 }
 0x53c   :  { %v3774_v2 = vpop.f32.mrf.mxu1 }
 0x53e   :  { %v3776_v48 = vpop.f32.mrf.mxu1 }
 0x540   :  { %v3777_v37 = vpop.f32.mrf.mxu1 }
 0x542   :  { %v3779_v43 = vpop.f32.mrf.mxu1 }
 0x55b   :  { %v3647_v57 = vpop.f32.mrf.mxu0 }
 0x55c   :  { %v3654_v38 = vadd.f32 %v3647_v57, %v3527_v8 }
 0x55d   :  { %v3649_v14 = vpop.f32.mrf.mxu0 }
 0x55e   :  { %v3781_v12 = vadd.f32 %v3774_v2, %v3654_v38 }
 0x55f   :  { %v3650_v19 = vpop.f32.mrf.mxu0 }
 0x560   :  { %v3655_v10 = vadd.f32 %v3650_v19, %v3528_v41 }
 0x561   :  { %v3652_v15 = vpop.f32.mrf.mxu0 }
 0x562   :  { %v3782_v52 = vadd.f32 %v3777_v37, %v3655_v10 }
 0x583   :  { %v3901_v16 = vpop.f32.mrf.mxu0 }
 0x584   :  { %v3908_v61 = vadd.f32 %v3901_v16, %v3781_v12 }
 0x585   :  { %v3903_v20 = vpop.f32.mrf.mxu0 }
 0x586   :  { %v3917_v60 = vadd.f32 %v4627_v62, %v3908_v61 }
 0x587   :  { %v3904_v58 = vpop.f32.mrf.mxu0 }
 0x588   :  { %v3909_v0 = vadd.f32 %v3904_v58, %v3782_v52  ;;  %v3919_v21 = vmax.f32 %v3917_v60, 0.0 }
 0x589   :  { %v3906_v50 = vpop.f32.mrf.mxu0 }
 0x58a   :  { %v3918_v13 = vadd.f32 %v4627_v62, %v3909_v0 }
 0x58c   :  { %v3920_v23 = vmax.f32 %v3918_v13, 0.0 }
 0x58e   :  { %v3921_v47 = vpack.c.bf16 %v3920_v23, %v3919_v21 }
 0x590   :  { %4681 = vmatmul.mubr.bf16.vlgmr.msra.gmra.mxu1 %v3921_v47 }
 0x650   :  { %v4027_v27 = vpop.f32.mrf.mxu1 }
 0x651   :  { %v4028_v4 = vadd.f32 %v4628_v39, %v4027_v27 }
 0x652   :  { %v4682_v3 = vpop.f32.mrf.mxu1 }
 0x653   :  { %v4034_v34 = vmax.f32 %v4028_v4, 0.0 }
 0x654   :  { %v4030_v31 = vpop.f32.mrf.mxu1 }
 0x655   :  { %v4031_v35 = vadd.f32 %v4628_v39, %v4030_v31 }
 0x656   :  { %v4683_v30 = vpop.f32.mrf.mxu1 }
 0x657   :  { %v4035_v29 = vmax.f32 %v4031_v35, 0.0 }
 0x659   :  { %v4036_v59 = vpack.c.bf16 %v4035_v29, %v4034_v34 }
 0x65b   :  { %4701 = vmatmul.mubr.bf16.vlgmr.msra.gmra.mxu0 %v4036_v59 }
 0x71b   :  { %v4142_v17 = vpop.f32.mrf.mxu0 }
 0x71c   :  { %v4143_v49 = vadd.f32 %v4637_v18, %v4142_v17 }
 0x71d   :  { %v4702_v28 = vpop.f32.mrf.mxu0 }
 0x71e   :  { %4149 = vst [vmem:[#allocation2] sm:$0xff] %v4143_v49 }
 0x71f   :  { %v4145_v51 = vpop.f32.mrf.mxu0 }
 0x720   :  { %v4146_v1 = vadd.f32 %v4637_v18, %v4145_v51 }
 0x721   :  { %v4703_v40 = vpop.f32.mrf.mxu0 }
 0x722   :  { %4150 = vst [vmem:[#allocation2 + $0x8] sm:$0xff] %v4146_v1 }
 0x723   :  { %5006 = shalt.err (!%p5003_p4)
}
 0x724   :  { %s5028_s1 = smov 128   ;;  %s5029_s12 = smov 8  }
 0x725   :  { %4162 = dma.vmem_to_hbm [thread:$0]  %s4157_s17, 256, %s6866_s13, [#allocation3], %s5028_s1, %s5028_s1, %s5029_s12  }
 0x726   :  { %5015 = dma.done.wait [#allocation3], 256  }
 0x727   :  { %5016 = vsyncadd [#allocation3], 4294967040 }
 0x728   :  { %4166 = vsyncpa [#allocation3], 1 }

</bundles_post_ra>
